<compile_context>
chip_gen: v5e
topology: v5e:2x2
jax: 0.10.0
libtpu: 0.0.40
codegen_flags: <defaults>
</compile_context>

<pallas_src>
import functools
import math

import jax
import jax.numpy as jnp
from jax.experimental import pallas as pl
from jax.experimental.pallas import tpu as pltpu

BN_EPS = 1e-5
LEAKY = 0.2
COMPUTE_DTYPE = jnp.bfloat16   # MXU operand / stored-activation dtype; accumulation stays f32


def _leaky(y, slope=LEAKY):
    return jnp.where(y >= 0, y, slope * y)


def _ru(x, m=128):
    return ((x + m - 1) // m) * m


# ------------------------------ fused Pallas kernel ------------------------------

def make_encoder_kernel(n_res, cps, acts_dtype, precision, slope=LEAKY):
    """Whole AudioEncoder forward for one batch element; activations stay VMEM-resident."""
    cp0, cp1, cp2, cp3 = cps
    f32 = jnp.float32

    def kernel(x_ref, wp_ref, bp_ref,
               wc1_ref, bc1_ref, wd1_ref, bd1_ref,
               wc2_ref, bc2_ref, wd2_ref, bd2_ref,
               wc3_ref, bc3_ref, wd3_ref, bd3_ref,
               wc4_ref, bc4_ref,
               o_ref, ps_ref):

        def conv_s1(h, w, b, cp_out):
            # Conv1d K=3, stride=1, pad=1: ONE wide matmul + shifted-slice tap accumulation.
            t = h.shape[0]
            zrow = jnp.zeros((1, h.shape[1]), h.dtype)
            hp = jnp.concatenate([zrow, h, zrow], axis=0)                    # (t+2, cp_in)
            y = jnp.dot(hp, w, preferred_element_type=f32, precision=precision)
            out = (y[0:t, 0:cp_out]
                   + y[1:t + 1, cp_out:2 * cp_out]
                   + y[2:t + 2, 2 * cp_out:3 * cp_out]) + b                   # f32
            return out

        def cnr(h, w, b, cp_out):
            return _leaky(conv_s1(h, w, b, cp_out), slope).astype(acts_dtype)

        def stack(h, wc_ref, bc_ref, cp):
            # Res_CNR_Stack: n_res CNR layers (fori_loop keeps only one layer live) + skip add.
            skip = h

            def body(l, hh):
                return cnr(hh, wc_ref[l], bc_ref[l], cp)

            h = jax.lax.fori_loop(0, n_res, body, h)
            return _leaky(h.astype(f32) + skip.astype(f32), slope).astype(acts_dtype)

        def down(h, wd_ref, bd_ref, cp_in, cp_out):
            # Conv1d K=4, stride=2, pad=1 (+ folded residual conv branch), phase-split:
            #   out[t] = x[2t-1] w0 + x[2t] w1 + x[2t+1] w2 + x[2t+2] w3
            t_in = h.shape[0]
            t2 = t_in // 2
            ps_ref[pl.ds(0, t_in), pl.ds(0, cp_in)] = h.astype(f32)
            e = ps_ref[pl.ds(0, t2, 2), pl.ds(0, cp_in)].astype(acts_dtype)   # x[2t]
            o = ps_ref[pl.ds(1, t2, 2), pl.ds(0, cp_in)].astype(acts_dtype)   # x[2t+1]
            zrow = jnp.zeros((1, cp_in), acts_dtype)
            op = jnp.concatenate([zrow, o], axis=0)        # op[t] = x[2t-1]  (op[0]   = pad 0)
            ep = jnp.concatenate([e, zrow], axis=0)        # ep[t] = x[2t]    (ep[t2]  = pad 0)
            yo = jnp.dot(op, wd_ref[0], preferred_element_type=f32, precision=precision)
            ye = jnp.dot(ep, wd_ref[1], preferred_element_type=f32, precision=precision)
            out = (yo[0:t2, 0:cp_out] + ye[0:t2, 0:cp_out]
                   + yo[1:t2 + 1, cp_out:2 * cp_out]
                   + ye[1:t2 + 1, cp_out:2 * cp_out]) + bd_ref[...]
            return _leaky(out, slope).astype(acts_dtype)

        h = x_ref[0]                                        # (T, cp_x), compute dtype
        h = cnr(h, wp_ref[...], bp_ref[...], cp0)           # project
        h = stack(h, wc1_ref, bc1_ref, cp0)                 # enc1
        h = down(h, wd1_ref, bd1_ref, cp0, cp1)             # down1
        h = stack(h, wc2_ref, bc2_ref, cp1)                 # enc2
        h = down(h, wd2_ref, bd2_ref, cp1, cp2)             # down2
        h = stack(h, wc3_ref, bc3_ref, cp2)                 # enc3
        h = down(h, wd3_ref, bd3_ref, cp2, cp3)             # down3
        h = stack(h, wc4_ref, bc4_ref, cp3)                 # enc4
        o_ref[0, :, :] = h.astype(o_ref.dtype)

    return kernel


def audio_encoder_forward(x_ncw, packed, *, out_channels):
    """x_ncw: (B, C_in, T) as PyTorch Conv1d NCW; returns (B, out_channels, T // 8) f32."""
    wp, bp = packed["wp"], packed["bp"]
    wcs, bcs = packed["wc"], packed["bc"]
    wds, bds = packed["wd"], packed["bd"]

    dtype = wp.dtype
    cp_x = wp.shape[0]
    cps = tuple(w.shape[1] for w in wcs)                    # per-stage lane widths
    n_res = wcs[0].shape[0]
    n_down = len(wds)

    B, c_in, T = x_ncw.shape
    assert T % (2 ** n_down) == 0 and c_in <= cp_x
    t_out = T // (2 ** n_down)

    precision = jax.lax.Precision.HIGHEST if dtype == jnp.float32 else None

    # layout: NCW -> NTC so channels sit on TPU lanes; lane-pad and ship in the compute dtype.
    x = jnp.transpose(x_ncw, (0, 2, 1)).astype(dtype)
    x = jnp.pad(x, ((0, 0), (0, 0), (0, cp_x - c_in)))

    weights = [wp, bp,
               wcs[0], bcs[0], wds[0], bds[0],
               wcs[1], bcs[1], wds[1], bds[1],
               wcs[2], bcs[2], wds[2], bds[2],
               wcs[3], bcs[3]]

    def _full_spec(a):
        return pl.BlockSpec(a.shape, lambda b, n=a.ndim: (0,) * n)

    # phase-split scratch for the stride-2 down blocks (f32, max over down inputs)
    ps_rows, ps_cols = T, max(cps[0], cps[1], cps[2])

    # explicit scoped-VMEM budget (weights possibly double-buffered + activation working set),
    # capped at 64 MiB so the request is valid on every TPU generation (v7x has 64 MiB/core).
    itemsize = jnp.dtype(dtype).itemsize
    w_bytes = sum(int(a.size) * a.dtype.itemsize for a in weights)
    act_bytes = (T + 2) * 3 * max(cps) * 4 + 6 * T * max(max(cps), cp_x) * itemsize
    io_bytes = 2 * T * cp_x * itemsize + 2 * t_out * cps[3] * itemsize
    vmem_est = 2 * w_bytes + act_bytes + io_bytes + ps_rows * ps_cols * 4
    vmem_limit = int(min(64 * 2 ** 20, max(32 * 2 ** 20, 2 * vmem_est)))

    out = pl.pallas_call(
        make_encoder_kernel(n_res, cps, dtype, precision),
        out_shape=jax.ShapeDtypeStruct((B, t_out, cps[3]), dtype),
        grid=(B,),                                          # B >= 2 feeds both v7x TensorCores
        in_specs=[pl.BlockSpec((1, T, cp_x), lambda b: (b, 0, 0))]
                 + [_full_spec(a) for a in weights],
        out_specs=pl.BlockSpec((1, t_out, cps[3]), lambda b: (b, 0, 0)),
        scratch_shapes=[pltpu.VMEM((ps_rows, ps_cols), jnp.float32)],
        compiler_params=pltpu.CompilerParams(
            dimension_semantics=("parallel",),
            vmem_limit_bytes=vmem_limit),
    )(x, *weights)

    # NTC -> NCW, strip channel padding, upcast outside the kernel.
    return jnp.transpose(out, (0, 2, 1))[:, :out_channels, :].astype(jnp.float32)


# ------------------------------ parameter packing ------------------------------

def _fold_bn(p):
    """Fold eval-mode BatchNorm (running stats) into conv weight/bias."""
    scale = p["gamma"] * jax.lax.rsqrt(p["rv"] + BN_EPS)            # (1, Cout)
    w = p["w"] * scale.reshape(1, 1, -1)                            # (K, Cin, Cout)
    b = (p["b"] - p["rm"]) * scale + p["beta"]                      # (1, Cout)
    return w, b


def _widen_taps(w, taps, cp_in, cp_out):
    """Lane-pad channels and lay selected taps out as [cp_in, len(taps)*cp_out] columns."""
    _, c_in, c_out = w.shape
    cols = []
    for k in taps:
        wk = jnp.zeros((cp_in, cp_out), jnp.float32).at[:c_in, :c_out].set(w[k])
        cols.append(wk)
    return jnp.concatenate(cols, axis=1)


def _widen_bias(b, cp_out):
    return jnp.zeros((1, cp_out), jnp.float32).at[:, :b.shape[1]].set(b)


def pack_audio_encoder_params(params, dtype=COMPUTE_DTYPE):
    """Fold BN / residual branches, per-stage lane-pad channels, stack per-stage weights."""
    in_dim = params["project"]["w"].shape[1]
    ch = [params["project"]["w"].shape[2],          # stage 0 width (= num_hiddens // 4)
          params["down1"]["w"].shape[2],            # stage 1
          params["down2"]["w"].shape[2],            # stage 2
          params["down3"]["w"].shape[2]]            # stage 3 (= num_hiddens)
    cp = [_ru(c) for c in ch]
    cp_x = _ru(in_dim)

    def cnr_wide(p, cp_in, cp_out):
        w, b = _fold_bn(p)
        return _widen_taps(w, (0, 1, 2), cp_in, cp_out).astype(dtype), _widen_bias(b, cp_out)

    def down_wide(p, cp_in, cp_out):
        # BN(conv_w(x)+b) + conv_wr(x)+br  ==  conv_{w*s + wr}(x) + b'   (both branches affine)
        w, b = _fold_bn(p)
        w = w + p["wr"]
        b = b + p["br"]
        w_odd = _widen_taps(w, (0, 2), cp_in, cp_out)    # taps hitting x[2t-1], x[2t+1]
        w_even = _widen_taps(w, (1, 3), cp_in, cp_out)   # taps hitting x[2t],   x[2t+2]
        return jnp.stack([w_odd, w_even]).astype(dtype), _widen_bias(b, cp_out)

    wp, bp = cnr_wide(params["project"], cp_x, cp[0])

    stage_layers = [params["enc1"], params["enc2"], params["enc3"], params["enc4"]]
    wc, bc = [], []
    for s, layers in enumerate(stage_layers):
        ws, bs = zip(*[cnr_wide(p, cp[s], cp[s]) for p in layers])
        wc.append(jnp.stack(ws))                         # (n_res, cp_s, 3*cp_s)
        bc.append(jnp.stack(bs))                         # (n_res, 1, cp_s) f32

    wd, bd = [], []
    for i, p in enumerate([params["down1"], params["down2"], params["down3"]]):
        w2, b2 = down_wide(p, cp[i], cp[i + 1])
        wd.append(w2)                                    # (2, cp_i, 2*cp_{i+1})
        bd.append(b2)                                    # (1, cp_{i+1}) f32

    return {"wp": wp, "bp": bp, "wc": tuple(wc), "bc": tuple(bc),
            "wd": tuple(wd), "bd": tuple(bd)}


# ------------------------------ parameter init (PyTorch-like) ------------------------------

def _xavier_uniform(key, K, c_in, c_out):
    fan_in, fan_out = c_in * K, c_out * K
    bound = math.sqrt(6.0 / (fan_in + fan_out))
    return jax.random.uniform(key, (K, c_in, c_out), jnp.float32, -bound, bound)


def _cnr_params(key, c_in, c_out, K):
    return {
        "w": _xavier_uniform(key, K, c_in, c_out),       # conv weight (xavier), bias = 0
        "b": jnp.zeros((1, c_out), jnp.float32),
        "gamma": jnp.ones((1, c_out), jnp.float32),      # BatchNorm defaults
        "beta": jnp.zeros((1, c_out), jnp.float32),
        "rm": jnp.zeros((1, c_out), jnp.float32),
        "rv": jnp.ones((1, c_out), jnp.float32),
    }


def _down_params(key, c_in, c_out, K=4):
    k1, k2 = jax.random.split(key)
    p = _cnr_params(k1, c_in, c_out, K)
    p["wr"] = _xavier_uniform(k2, K, c_in, c_out)        # parallel residual conv branch
    p["br"] = jnp.zeros((1, c_out), jnp.float32)
    return p


def init_audio_encoder_params(key, in_dim, num_hiddens, num_residual_layers):
    h4, h2, h = num_hiddens // 4, num_hiddens // 2, num_hiddens
    keys = iter(jax.random.split(key, 8 + 4 * num_residual_layers))
    return {
        "project": _cnr_params(next(keys), in_dim, h4, 3),
        "enc1": [_cnr_params(next(keys), h4, h4, 3) for _ in range(num_residual_layers)],
        "down1": _down_params(next(keys), h4, h4),
        "enc2": [_cnr_params(next(keys), h4, h4, 3) for _ in range(num_residual_layers)],
        "down2": _down_params(next(keys), h4, h2),
        "enc3": [_cnr_params(next(keys), h2, h2, 3) for _ in range(num_residual_layers)],
        "down3": _down_params(next(keys), h2, h),
        "enc4": [_cnr_params(next(keys), h, h, 3) for _ in range(num_residual_layers)],
    }


# ------------------------------ pure-JAX reference ------------------------------

def _ref_conv(x, w, b, stride, pad):
    K, T = w.shape[0], x.shape[1]
    xp = jnp.pad(x, ((0, 0), (pad, pad), (0, 0)))
    t_out = (T + 2 * pad - K) // stride + 1
    taps = jnp.stack([xp[:, k:k + stride * (t_out - 1) + 1:stride, :] for k in range(K)],
                     axis=2)                                   # (B, t_out, K, Cin)
    return jnp.einsum("btkc,kcd->btd", taps, w,
                      precision=jax.lax.Precision.HIGHEST) + b


def _ref_bn(y, p):
    scale = p["gamma"] * jax.lax.rsqrt(p["rv"] + BN_EPS)
    return (y - p["rm"]) * scale + p["beta"]


def _ref_cnr(x, p):
    return _leaky(_ref_bn(_ref_conv(x, p["w"], p["b"], 1, 1), p))


def _ref_down(x, p):
    main = _ref_bn(_ref_conv(x, p["w"], p["b"], 2, 1), p)
    res = _ref_conv(x, p["wr"], p["br"], 2, 1)
    return _leaky(main + res)


def _ref_stack(x, layers):
    h = x
    for p in layers:
        h = _ref_cnr(h, p)
    return _leaky(h + x)


def audio_encoder_reference(x_ncw, params):
    h = jnp.transpose(x_ncw, (0, 2, 1)).astype(jnp.float32)
    h = _ref_cnr(h, params["project"])
    h = _ref_stack(h, params["enc1"]); h = _ref_down(h, params["down1"])
    h = _ref_stack(h, params["enc2"]); h = _ref_down(h, params["down2"])
    h = _ref_stack(h, params["enc3"]); h = _ref_down(h, params["down3"])
    h = _ref_stack(h, params["enc4"])
    return jnp.transpose(h, (0, 2, 1))


# ---------------------------------- main ----------------------------------

if __name__ == "__main__":
    key = jax.random.PRNGKey(0)
    kx, kp = jax.random.split(key)

    B, in_dim, T = 2, 4, 16                     # Conv1d NCW input (B, C_in, T); B>=2 for v7x
    num_hiddens, num_residual_layers = 32, 2

    x = jax.random.normal(kx, (B, in_dim, T), jnp.float32)
    params = init_audio_encoder_params(kp, in_dim, num_hiddens, num_residual_layers)
    ref = audio_encoder_reference(x, params)

    fwd = jax.jit(functools.partial(audio_encoder_forward, out_channels=num_hiddens))

    # 1) production run: bf16 weights + activations, f32 accumulation/elementwise.
    packed = pack_audio_encoder_params(params)
    out = fwd(x, packed)
    jax.block_until_ready(out)
    assert out.shape == (B, num_hiddens, T // 8), out.shape
    assert bool(jnp.all(jnp.isfinite(out)))
    ref_scale = float(jnp.max(jnp.abs(ref)))
    err_bf16 = float(jnp.max(jnp.abs(out - ref)))
    assert err_bf16 < 0.05 * ref_scale + 0.05, (err_bf16, ref_scale)

    # 2) f32 parity run (precision=HIGHEST): tight check of the BN / residual-conv folding.
    packed_f32 = pack_audio_encoder_params(params, dtype=jnp.float32)
    out_f32 = fwd(x, packed_f32)
    jax.block_until_ready(out_f32)
    err_f32 = float(jnp.max(jnp.abs(out_f32 - ref)))
    assert err_f32 < 2e-3, err_f32

    print("KERNEL_OK")
</pallas_src>

<mosaic_0001>
module attributes {stable_mosaic.version = 11 : i64} {
  func.func @kernel(%arg0: i32, %arg1: memref<1x16x128xbf16, #tpu.memory_space<vmem>>, %arg2: memref<128x384xbf16, #tpu.memory_space<vmem>>, %arg3: memref<1x128xf32, #tpu.memory_space<vmem>>, %arg4: memref<2x128x384xbf16, #tpu.memory_space<vmem>>, %arg5: memref<2x1x128xf32, #tpu.memory_space<vmem>>, %arg6: memref<2x128x256xbf16, #tpu.memory_space<vmem>>, %arg7: memref<1x128xf32, #tpu.memory_space<vmem>>, %arg8: memref<2x128x384xbf16, #tpu.memory_space<vmem>>, %arg9: memref<2x1x128xf32, #tpu.memory_space<vmem>>, %arg10: memref<2x128x256xbf16, #tpu.memory_space<vmem>>, %arg11: memref<1x128xf32, #tpu.memory_space<vmem>>, %arg12: memref<2x128x384xbf16, #tpu.memory_space<vmem>>, %arg13: memref<2x1x128xf32, #tpu.memory_space<vmem>>, %arg14: memref<2x128x256xbf16, #tpu.memory_space<vmem>>, %arg15: memref<1x128xf32, #tpu.memory_space<vmem>>, %arg16: memref<2x128x384xbf16, #tpu.memory_space<vmem>>, %arg17: memref<2x1x128xf32, #tpu.memory_space<vmem>>, %arg18: memref<1x2x128xbf16, #tpu.memory_space<vmem>>, %arg19: memref<16x128xf32, #tpu.memory_space<vmem>>) attributes {dimension_semantics = [#tpu.dimension_semantics<parallel>], iteration_bounds = array<i64: 2>, scalar_prefetch = 0 : i64, scratch_operands = 1 : i64, tpu.core_type = #tpu.core_type<tc>, window_params = [{transform_indices = @transform_0, window_bounds = array<i64: 1, 16, 128>}, {pipeline_mode = #tpu.pipeline_mode<synchronous>, transform_indices = @transform_1, window_bounds = array<i64: 128, 384>}, {pipeline_mode = #tpu.pipeline_mode<synchronous>, transform_indices = @transform_2, window_bounds = array<i64: 1, 128>}, {pipeline_mode = #tpu.pipeline_mode<synchronous>, transform_indices = @transform_3, window_bounds = array<i64: 2, 128, 384>}, {pipeline_mode = #tpu.pipeline_mode<synchronous>, transform_indices = @transform_4, window_bounds = array<i64: 2, 1, 128>}, {pipeline_mode = #tpu.pipeline_mode<synchronous>, transform_indices = @transform_5, window_bounds = array<i64: 2, 128, 256>}, {pipeline_mode = #tpu.pipeline_mode<synchronous>, transform_indices = @transform_6, window_bounds = array<i64: 1, 128>}, {pipeline_mode = #tpu.pipeline_mode<synchronous>, transform_indices = @transform_7, window_bounds = array<i64: 2, 128, 384>}, {pipeline_mode = #tpu.pipeline_mode<synchronous>, transform_indices = @transform_8, window_bounds = array<i64: 2, 1, 128>}, {pipeline_mode = #tpu.pipeline_mode<synchronous>, transform_indices = @transform_9, window_bounds = array<i64: 2, 128, 256>}, {pipeline_mode = #tpu.pipeline_mode<synchronous>, transform_indices = @transform_10, window_bounds = array<i64: 1, 128>}, {pipeline_mode = #tpu.pipeline_mode<synchronous>, transform_indices = @transform_11, window_bounds = array<i64: 2, 128, 384>}, {pipeline_mode = #tpu.pipeline_mode<synchronous>, transform_indices = @transform_12, window_bounds = array<i64: 2, 1, 128>}, {pipeline_mode = #tpu.pipeline_mode<synchronous>, transform_indices = @transform_13, window_bounds = array<i64: 2, 128, 256>}, {pipeline_mode = #tpu.pipeline_mode<synchronous>, transform_indices = @transform_14, window_bounds = array<i64: 1, 128>}, {pipeline_mode = #tpu.pipeline_mode<synchronous>, transform_indices = @transform_15, window_bounds = array<i64: 2, 128, 384>}, {pipeline_mode = #tpu.pipeline_mode<synchronous>, transform_indices = @transform_16, window_bounds = array<i64: 2, 1, 128>}, {transform_indices = @transform_17, window_bounds = array<i64: 1, 2, 128>}]} {
    %c0 = arith.constant 0 : index
    %c0_0 = arith.constant 0 : index
    %c0_1 = arith.constant 0 : index
    %0 = vector.load %arg1[%c0, %c0_0, %c0_1] : memref<1x16x128xbf16, #tpu.memory_space<vmem>>, vector<1x16x128xbf16>
    %1 = vector.shape_cast %0 : vector<1x16x128xbf16> to vector<16x128xbf16>
    %c0_2 = arith.constant 0 : index
    %c0_3 = arith.constant 0 : index
    %2 = vector.load %arg2[%c0_2, %c0_3] : memref<128x384xbf16, #tpu.memory_space<vmem>>, vector<128x384xbf16>
    %c0_4 = arith.constant 0 : index
    %c0_5 = arith.constant 0 : index
    %3 = vector.load %arg3[%c0_4, %c0_5] : memref<1x128xf32, #tpu.memory_space<vmem>>, vector<1x128xf32>
    %cst = arith.constant 0.000000e+00 : bf16
    %4 = vector.broadcast %cst : bf16 to vector<1x128xbf16>
    %5 = tpu.concatenate %4, %1, %4 in 0 : vector<1x128xbf16>, vector<16x128xbf16>, vector<1x128xbf16> -> vector<18x128xbf16>
    %cst_6 = arith.constant dense<0.000000e+00> : vector<18x384xf32>
    %6 = tpu.matmul %5, %2, %cst_6 {dimension_numbers = #tpu.dot_dimension_numbers<[1], [0], [0], [1], [0, 0, 1, 1], [], []>} : vector<18x128xbf16>, vector<128x384xbf16>, vector<18x384xf32> -> vector<18x384xf32>
    %7 = vector.extract_strided_slice %6 {offsets = [0, 0], sizes = [16, 128], strides = [1, 1]} : vector<18x384xf32> to vector<16x128xf32>
    %8 = vector.extract_strided_slice %6 {offsets = [1, 128], sizes = [16, 128], strides = [1, 1]} : vector<18x384xf32> to vector<16x128xf32>
    %9 = arith.addf %7, %8 : vector<16x128xf32>
    %10 = vector.extract_strided_slice %6 {offsets = [2, 256], sizes = [16, 128], strides = [1, 1]} : vector<18x384xf32> to vector<16x128xf32>
    %11 = arith.addf %9, %10 : vector<16x128xf32>
    %12 = vector.broadcast %3 : vector<1x128xf32> to vector<16x128xf32>
    %13 = arith.addf %11, %12 : vector<16x128xf32>
    %cst_7 = arith.constant 0.000000e+00 : f32
    %14 = vector.broadcast %cst_7 : f32 to vector<16x128xf32>
    %15 = arith.cmpf oge, %13, %14 : vector<16x128xf32>
    %cst_8 = arith.constant 2.000000e-01 : f32
    %16 = vector.broadcast %cst_8 : f32 to vector<16x128xf32>
    %17 = arith.mulf %16, %13 : vector<16x128xf32>
    %18 = arith.select %15, %13, %17 : vector<16x128xi1>, vector<16x128xf32>
    %19 = arith.truncf %18 : vector<16x128xf32> to vector<16x128xbf16>
    %c0_i32 = arith.constant 0 : i32
    %c2_i32 = arith.constant 2 : i32
    %20 = arith.addi %c0_i32, %c2_i32 : i32
    %c1_i32 = arith.constant 1 : i32
    %21 = scf.for %arg20 = %c0_i32 to %20 step %c1_i32 iter_args(%arg21 = %19) -> (vector<16x128xbf16>)  : i32 {
      %160 = arith.index_cast %arg20 : i32 to index
      %c0_89 = arith.constant 0 : index
      %c0_90 = arith.constant 0 : index
      %161 = vector.load %arg4[%160, %c0_89, %c0_90] : memref<2x128x384xbf16, #tpu.memory_space<vmem>>, vector<1x128x384xbf16>
      %162 = vector.shape_cast %161 : vector<1x128x384xbf16> to vector<128x384xbf16>
      %163 = arith.index_cast %arg20 : i32 to index
      %c0_91 = arith.constant 0 : index
      %c0_92 = arith.constant 0 : index
      %164 = vector.load %arg5[%163, %c0_91, %c0_92] : memref<2x1x128xf32, #tpu.memory_space<vmem>>, vector<1x1x128xf32>
      %165 = vector.shape_cast %164 : vector<1x1x128xf32> to vector<1x128xf32>
      %cst_93 = arith.constant 0.000000e+00 : bf16
      %166 = vector.broadcast %cst_93 : bf16 to vector<1x128xbf16>
      %167 = tpu.concatenate %166, %arg21, %166 in 0 : vector<1x128xbf16>, vector<16x128xbf16>, vector<1x128xbf16> -> vector<18x128xbf16>
      %cst_94 = arith.constant dense<0.000000e+00> : vector<18x384xf32>
      %168 = tpu.matmul %167, %162, %cst_94 {dimension_numbers = #tpu.dot_dimension_numbers<[1], [0], [0], [1], [0, 0, 1, 1], [], []>} : vector<18x128xbf16>, vector<128x384xbf16>, vector<18x384xf32> -> vector<18x384xf32>
      %169 = vector.extract_strided_slice %168 {offsets = [0, 0], sizes = [16, 128], strides = [1, 1]} : vector<18x384xf32> to vector<16x128xf32>
      %170 = vector.extract_strided_slice %168 {offsets = [1, 128], sizes = [16, 128], strides = [1, 1]} : vector<18x384xf32> to vector<16x128xf32>
      %171 = arith.addf %169, %170 : vector<16x128xf32>
      %172 = vector.extract_strided_slice %168 {offsets = [2, 256], sizes = [16, 128], strides = [1, 1]} : vector<18x384xf32> to vector<16x128xf32>
      %173 = arith.addf %171, %172 : vector<16x128xf32>
      %174 = vector.broadcast %165 : vector<1x128xf32> to vector<16x128xf32>
      %175 = arith.addf %173, %174 : vector<16x128xf32>
      %cst_95 = arith.constant 0.000000e+00 : f32
      %176 = vector.broadcast %cst_95 : f32 to vector<16x128xf32>
      %177 = arith.cmpf oge, %175, %176 : vector<16x128xf32>
      %cst_96 = arith.constant 2.000000e-01 : f32
      %178 = vector.broadcast %cst_96 : f32 to vector<16x128xf32>
      %179 = arith.mulf %178, %175 : vector<16x128xf32>
      %180 = arith.select %177, %175, %179 : vector<16x128xi1>, vector<16x128xf32>
      %181 = arith.truncf %180 : vector<16x128xf32> to vector<16x128xbf16>
      scf.yield %181 : vector<16x128xbf16>
    }
    %c2_i32_9 = arith.constant 2 : i32
    %22 = arith.extf %21 : vector<16x128xbf16> to vector<16x128xf32>
    %23 = arith.extf %19 : vector<16x128xbf16> to vector<16x128xf32>
    %24 = arith.addf %22, %23 : vector<16x128xf32>
    %cst_10 = arith.constant 0.000000e+00 : f32
    %25 = vector.broadcast %cst_10 : f32 to vector<16x128xf32>
    %26 = arith.cmpf oge, %24, %25 : vector<16x128xf32>
    %cst_11 = arith.constant 2.000000e-01 : f32
    %27 = vector.broadcast %cst_11 : f32 to vector<16x128xf32>
    %28 = arith.mulf %27, %24 : vector<16x128xf32>
    %29 = arith.select %26, %24, %28 : vector<16x128xi1>, vector<16x128xf32>
    %30 = arith.truncf %29 : vector<16x128xf32> to vector<16x128xbf16>
    %31 = arith.extf %30 : vector<16x128xbf16> to vector<16x128xf32>
    %c0_12 = arith.constant 0 : index
    %c0_13 = arith.constant 0 : index
    %32 = vector.load %arg19[%c0_12, %c0_13] : memref<16x128xf32, #tpu.memory_space<vmem>>, vector<16x128xf32>
    tpu.vector_store %arg19[%c0_12, %c0_13], %31 {strides = array<i32>} : memref<16x128xf32, #tpu.memory_space<vmem>>, vector<16x128xf32>,
    %c0_14 = arith.constant 0 : index
    %c0_15 = arith.constant 0 : index
    %33 = tpu.strided_load %arg19[%c0_14, %c0_15] {strides = array<i32: 2, 1>} : memref<16x128xf32, #tpu.memory_space<vmem>>, vector<8x128xf32>
    %34 = arith.truncf %33 : vector<8x128xf32> to vector<8x128xbf16>
    %c1 = arith.constant 1 : index
    %c0_16 = arith.constant 0 : index
    %35 = tpu.strided_load %arg19[%c1, %c0_16] {strides = array<i32: 2, 1>} : memref<16x128xf32, #tpu.memory_space<vmem>>, vector<8x128xf32>
    %36 = arith.truncf %35 : vector<8x128xf32> to vector<8x128xbf16>
    %cst_17 = arith.constant 0.000000e+00 : bf16
    %37 = vector.broadcast %cst_17 : bf16 to vector<1x128xbf16>
    %38 = tpu.concatenate %37, %36 in 0 : vector<1x128xbf16>, vector<8x128xbf16> -> vector<9x128xbf16>
    %39 = tpu.concatenate %34, %37 in 0 : vector<8x128xbf16>, vector<1x128xbf16> -> vector<9x128xbf16>
    %c0_18 = arith.constant 0 : index
    %c0_19 = arith.constant 0 : index
    %c0_20 = arith.constant 0 : index
    %40 = vector.load %arg6[%c0_18, %c0_19, %c0_20] : memref<2x128x256xbf16, #tpu.memory_space<vmem>>, vector<1x128x256xbf16>
    %41 = vector.shape_cast %40 : vector<1x128x256xbf16> to vector<128x256xbf16>
    %cst_21 = arith.constant dense<0.000000e+00> : vector<9x256xf32>
    %42 = tpu.matmul %38, %41, %cst_21 {dimension_numbers = #tpu.dot_dimension_numbers<[1], [0], [0], [1], [0, 0, 1, 1], [], []>} : vector<9x128xbf16>, vector<128x256xbf16>, vector<9x256xf32> -> vector<9x256xf32>
    %c1_22 = arith.constant 1 : index
    %c0_23 = arith.constant 0 : index
    %c0_24 = arith.constant 0 : index
    %43 = vector.load %arg6[%c1_22, %c0_23, %c0_24] : memref<2x128x256xbf16, #tpu.memory_space<vmem>>, vector<1x128x256xbf16>
    %44 = vector.shape_cast %43 : vector<1x128x256xbf16> to vector<128x256xbf16>
    %cst_25 = arith.constant dense<0.000000e+00> : vector<9x256xf32>
    %45 = tpu.matmul %39, %44, %cst_25 {dimension_numbers = #tpu.dot_dimension_numbers<[1], [0], [0], [1], [0, 0, 1, 1], [], []>} : vector<9x128xbf16>, vector<128x256xbf16>, vector<9x256xf32> -> vector<9x256xf32>
    %46 = vector.extract_strided_slice %42 {offsets = [0, 0], sizes = [8, 128], strides = [1, 1]} : vector<9x256xf32> to vector<8x128xf32>
    %47 = vector.extract_strided_slice %45 {offsets = [0, 0], sizes = [8, 128], strides = [1, 1]} : vector<9x256xf32> to vector<8x128xf32>
    %48 = arith.addf %46, %47 : vector<8x128xf32>
    %49 = vector.extract_strided_slice %42 {offsets = [1, 128], sizes = [8, 128], strides = [1, 1]} : vector<9x256xf32> to vector<8x128xf32>
    %50 = arith.addf %48, %49 : vector<8x128xf32>
    %51 = vector.extract_strided_slice %45 {offsets = [1, 128], sizes = [8, 128], strides = [1, 1]} : vector<9x256xf32> to vector<8x128xf32>
    %52 = arith.addf %50, %51 : vector<8x128xf32>
    %c0_26 = arith.constant 0 : index
    %c0_27 = arith.constant 0 : index
    %53 = vector.load %arg7[%c0_26, %c0_27] : memref<1x128xf32, #tpu.memory_space<vmem>>, vector<1x128xf32>
    %54 = vector.broadcast %53 : vector<1x128xf32> to vector<8x128xf32>
    %55 = arith.addf %52, %54 : vector<8x128xf32>
    %cst_28 = arith.constant 0.000000e+00 : f32
    %56 = vector.broadcast %cst_28 : f32 to vector<8x128xf32>
    %57 = arith.cmpf oge, %55, %56 : vector<8x128xf32>
    %cst_29 = arith.constant 2.000000e-01 : f32
    %58 = vector.broadcast %cst_29 : f32 to vector<8x128xf32>
    %59 = arith.mulf %58, %55 : vector<8x128xf32>
    %60 = arith.select %57, %55, %59 : vector<8x128xi1>, vector<8x128xf32>
    %61 = arith.truncf %60 : vector<8x128xf32> to vector<8x128xbf16>
    %c0_i32_30 = arith.constant 0 : i32
    %c2_i32_31 = arith.constant 2 : i32
    %62 = arith.addi %c0_i32_30, %c2_i32_31 : i32
    %c1_i32_32 = arith.constant 1 : i32
    %63 = scf.for %arg20 = %c0_i32_30 to %62 step %c1_i32_32 iter_args(%arg21 = %61) -> (vector<8x128xbf16>)  : i32 {
      %160 = arith.index_cast %arg20 : i32 to index
      %c0_89 = arith.constant 0 : index
      %c0_90 = arith.constant 0 : index
      %161 = vector.load %arg8[%160, %c0_89, %c0_90] : memref<2x128x384xbf16, #tpu.memory_space<vmem>>, vector<1x128x384xbf16>
      %162 = vector.shape_cast %161 : vector<1x128x384xbf16> to vector<128x384xbf16>
      %163 = arith.index_cast %arg20 : i32 to index
      %c0_91 = arith.constant 0 : index
      %c0_92 = arith.constant 0 : index
      %164 = vector.load %arg9[%163, %c0_91, %c0_92] : memref<2x1x128xf32, #tpu.memory_space<vmem>>, vector<1x1x128xf32>
      %165 = vector.shape_cast %164 : vector<1x1x128xf32> to vector<1x128xf32>
      %cst_93 = arith.constant 0.000000e+00 : bf16
      %166 = vector.broadcast %cst_93 : bf16 to vector<1x128xbf16>
      %167 = tpu.concatenate %166, %arg21, %166 in 0 : vector<1x128xbf16>, vector<8x128xbf16>, vector<1x128xbf16> -> vector<10x128xbf16>
      %cst_94 = arith.constant dense<0.000000e+00> : vector<10x384xf32>
      %168 = tpu.matmul %167, %162, %cst_94 {dimension_numbers = #tpu.dot_dimension_numbers<[1], [0], [0], [1], [0, 0, 1, 1], [], []>} : vector<10x128xbf16>, vector<128x384xbf16>, vector<10x384xf32> -> vector<10x384xf32>
      %169 = vector.extract_strided_slice %168 {offsets = [0, 0], sizes = [8, 128], strides = [1, 1]} : vector<10x384xf32> to vector<8x128xf32>
      %170 = vector.extract_strided_slice %168 {offsets = [1, 128], sizes = [8, 128], strides = [1, 1]} : vector<10x384xf32> to vector<8x128xf32>
      %171 = arith.addf %169, %170 : vector<8x128xf32>
      %172 = vector.extract_strided_slice %168 {offsets = [2, 256], sizes = [8, 128], strides = [1, 1]} : vector<10x384xf32> to vector<8x128xf32>
      %173 = arith.addf %171, %172 : vector<8x128xf32>
      %174 = vector.broadcast %165 : vector<1x128xf32> to vector<8x128xf32>
      %175 = arith.addf %173, %174 : vector<8x128xf32>
      %cst_95 = arith.constant 0.000000e+00 : f32
      %176 = vector.broadcast %cst_95 : f32 to vector<8x128xf32>
      %177 = arith.cmpf oge, %175, %176 : vector<8x128xf32>
      %cst_96 = arith.constant 2.000000e-01 : f32
      %178 = vector.broadcast %cst_96 : f32 to vector<8x128xf32>
      %179 = arith.mulf %178, %175 : vector<8x128xf32>
      %180 = arith.select %177, %175, %179 : vector<8x128xi1>, vector<8x128xf32>
      %181 = arith.truncf %180 : vector<8x128xf32> to vector<8x128xbf16>
      scf.yield %181 : vector<8x128xbf16>
    }
    %c2_i32_33 = arith.constant 2 : i32
    %64 = arith.extf %63 : vector<8x128xbf16> to vector<8x128xf32>
    %65 = arith.extf %61 : vector<8x128xbf16> to vector<8x128xf32>
    %66 = arith.addf %64, %65 : vector<8x128xf32>
    %cst_34 = arith.constant 0.000000e+00 : f32
    %67 = vector.broadcast %cst_34 : f32 to vector<8x128xf32>
    %68 = arith.cmpf oge, %66, %67 : vector<8x128xf32>
    %cst_35 = arith.constant 2.000000e-01 : f32
    %69 = vector.broadcast %cst_35 : f32 to vector<8x128xf32>
    %70 = arith.mulf %69, %66 : vector<8x128xf32>
    %71 = arith.select %68, %66, %70 : vector<8x128xi1>, vector<8x128xf32>
    %72 = arith.truncf %71 : vector<8x128xf32> to vector<8x128xbf16>
    %73 = arith.extf %72 : vector<8x128xbf16> to vector<8x128xf32>
    %c0_36 = arith.constant 0 : index
    %c0_37 = arith.constant 0 : index
    %74 = vector.load %arg19[%c0_36, %c0_37] : memref<16x128xf32, #tpu.memory_space<vmem>>, vector<8x128xf32>
    tpu.vector_store %arg19[%c0_36, %c0_37], %73 {strides = array<i32>} : memref<16x128xf32, #tpu.memory_space<vmem>>, vector<8x128xf32>,
    %c0_38 = arith.constant 0 : index
    %c0_39 = arith.constant 0 : index
    %75 = tpu.strided_load %arg19[%c0_38, %c0_39] {strides = array<i32: 2, 1>} : memref<16x128xf32, #tpu.memory_space<vmem>>, vector<4x128xf32>
    %76 = arith.truncf %75 : vector<4x128xf32> to vector<4x128xbf16>
    %c1_40 = arith.constant 1 : index
    %c0_41 = arith.constant 0 : index
    %77 = tpu.strided_load %arg19[%c1_40, %c0_41] {strides = array<i32: 2, 1>} : memref<16x128xf32, #tpu.memory_space<vmem>>, vector<4x128xf32>
    %78 = arith.truncf %77 : vector<4x128xf32> to vector<4x128xbf16>
    %cst_42 = arith.constant 0.000000e+00 : bf16
    %79 = vector.broadcast %cst_42 : bf16 to vector<1x128xbf16>
    %80 = tpu.concatenate %79, %78 in 0 : vector<1x128xbf16>, vector<4x128xbf16> -> vector<5x128xbf16>
    %81 = tpu.concatenate %76, %79 in 0 : vector<4x128xbf16>, vector<1x128xbf16> -> vector<5x128xbf16>
    %c0_43 = arith.constant 0 : index
    %c0_44 = arith.constant 0 : index
    %c0_45 = arith.constant 0 : index
    %82 = vector.load %arg10[%c0_43, %c0_44, %c0_45] : memref<2x128x256xbf16, #tpu.memory_space<vmem>>, vector<1x128x256xbf16>
    %83 = vector.shape_cast %82 : vector<1x128x256xbf16> to vector<128x256xbf16>
    %cst_46 = arith.constant dense<0.000000e+00> : vector<5x256xf32>
    %84 = tpu.matmul %80, %83, %cst_46 {dimension_numbers = #tpu.dot_dimension_numbers<[1], [0], [0], [1], [0, 0, 1, 1], [], []>} : vector<5x128xbf16>, vector<128x256xbf16>, vector<5x256xf32> -> vector<5x256xf32>
    %c1_47 = arith.constant 1 : index
    %c0_48 = arith.constant 0 : index
    %c0_49 = arith.constant 0 : index
    %85 = vector.load %arg10[%c1_47, %c0_48, %c0_49] : memref<2x128x256xbf16, #tpu.memory_space<vmem>>, vector<1x128x256xbf16>
    %86 = vector.shape_cast %85 : vector<1x128x256xbf16> to vector<128x256xbf16>
    %cst_50 = arith.constant dense<0.000000e+00> : vector<5x256xf32>
    %87 = tpu.matmul %81, %86, %cst_50 {dimension_numbers = #tpu.dot_dimension_numbers<[1], [0], [0], [1], [0, 0, 1, 1], [], []>} : vector<5x128xbf16>, vector<128x256xbf16>, vector<5x256xf32> -> vector<5x256xf32>
    %88 = vector.extract_strided_slice %84 {offsets = [0, 0], sizes = [4, 128], strides = [1, 1]} : vector<5x256xf32> to vector<4x128xf32>
    %89 = vector.extract_strided_slice %87 {offsets = [0, 0], sizes = [4, 128], strides = [1, 1]} : vector<5x256xf32> to vector<4x128xf32>
    %90 = arith.addf %88, %89 : vector<4x128xf32>
    %91 = vector.extract_strided_slice %84 {offsets = [1, 128], sizes = [4, 128], strides = [1, 1]} : vector<5x256xf32> to vector<4x128xf32>
    %92 = arith.addf %90, %91 : vector<4x128xf32>
    %93 = vector.extract_strided_slice %87 {offsets = [1, 128], sizes = [4, 128], strides = [1, 1]} : vector<5x256xf32> to vector<4x128xf32>
    %94 = arith.addf %92, %93 : vector<4x128xf32>
    %c0_51 = arith.constant 0 : index
    %c0_52 = arith.constant 0 : index
    %95 = vector.load %arg11[%c0_51, %c0_52] : memref<1x128xf32, #tpu.memory_space<vmem>>, vector<1x128xf32>
    %96 = vector.broadcast %95 : vector<1x128xf32> to vector<4x128xf32>
    %97 = arith.addf %94, %96 : vector<4x128xf32>
    %cst_53 = arith.constant 0.000000e+00 : f32
    %98 = vector.broadcast %cst_53 : f32 to vector<4x128xf32>
    %99 = arith.cmpf oge, %97, %98 : vector<4x128xf32>
    %cst_54 = arith.constant 2.000000e-01 : f32
    %100 = vector.broadcast %cst_54 : f32 to vector<4x128xf32>
    %101 = arith.mulf %100, %97 : vector<4x128xf32>
    %102 = arith.select %99, %97, %101 : vector<4x128xi1>, vector<4x128xf32>
    %103 = arith.truncf %102 : vector<4x128xf32> to vector<4x128xbf16>
    %c0_i32_55 = arith.constant 0 : i32
    %c2_i32_56 = arith.constant 2 : i32
    %104 = arith.addi %c0_i32_55, %c2_i32_56 : i32
    %c1_i32_57 = arith.constant 1 : i32
    %105 = scf.for %arg20 = %c0_i32_55 to %104 step %c1_i32_57 iter_args(%arg21 = %103) -> (vector<4x128xbf16>)  : i32 {
      %160 = arith.index_cast %arg20 : i32 to index
      %c0_89 = arith.constant 0 : index
      %c0_90 = arith.constant 0 : index
      %161 = vector.load %arg12[%160, %c0_89, %c0_90] : memref<2x128x384xbf16, #tpu.memory_space<vmem>>, vector<1x128x384xbf16>
      %162 = vector.shape_cast %161 : vector<1x128x384xbf16> to vector<128x384xbf16>
      %163 = arith.index_cast %arg20 : i32 to index
      %c0_91 = arith.constant 0 : index
      %c0_92 = arith.constant 0 : index
      %164 = vector.load %arg13[%163, %c0_91, %c0_92] : memref<2x1x128xf32, #tpu.memory_space<vmem>>, vector<1x1x128xf32>
      %165 = vector.shape_cast %164 : vector<1x1x128xf32> to vector<1x128xf32>
      %cst_93 = arith.constant 0.000000e+00 : bf16
      %166 = vector.broadcast %cst_93 : bf16 to vector<1x128xbf16>
      %167 = tpu.concatenate %166, %arg21, %166 in 0 : vector<1x128xbf16>, vector<4x128xbf16>, vector<1x128xbf16> -> vector<6x128xbf16>
      %cst_94 = arith.constant dense<0.000000e+00> : vector<6x384xf32>
      %168 = tpu.matmul %167, %162, %cst_94 {dimension_numbers = #tpu.dot_dimension_numbers<[1], [0], [0], [1], [0, 0, 1, 1], [], []>} : vector<6x128xbf16>, vector<128x384xbf16>, vector<6x384xf32> -> vector<6x384xf32>
      %169 = vector.extract_strided_slice %168 {offsets = [0, 0], sizes = [4, 128], strides = [1, 1]} : vector<6x384xf32> to vector<4x128xf32>
      %170 = vector.extract_strided_slice %168 {offsets = [1, 128], sizes = [4, 128], strides = [1, 1]} : vector<6x384xf32> to vector<4x128xf32>
      %171 = arith.addf %169, %170 : vector<4x128xf32>
      %172 = vector.extract_strided_slice %168 {offsets = [2, 256], sizes = [4, 128], strides = [1, 1]} : vector<6x384xf32> to vector<4x128xf32>
      %173 = arith.addf %171, %172 : vector<4x128xf32>
      %174 = vector.broadcast %165 : vector<1x128xf32> to vector<4x128xf32>
      %175 = arith.addf %173, %174 : vector<4x128xf32>
      %cst_95 = arith.constant 0.000000e+00 : f32
      %176 = vector.broadcast %cst_95 : f32 to vector<4x128xf32>
      %177 = arith.cmpf oge, %175, %176 : vector<4x128xf32>
      %cst_96 = arith.constant 2.000000e-01 : f32
      %178 = vector.broadcast %cst_96 : f32 to vector<4x128xf32>
      %179 = arith.mulf %178, %175 : vector<4x128xf32>
      %180 = arith.select %177, %175, %179 : vector<4x128xi1>, vector<4x128xf32>
      %181 = arith.truncf %180 : vector<4x128xf32> to vector<4x128xbf16>
      scf.yield %181 : vector<4x128xbf16>
    }
    %c2_i32_58 = arith.constant 2 : i32
    %106 = arith.extf %105 : vector<4x128xbf16> to vector<4x128xf32>
    %107 = arith.extf %103 : vector<4x128xbf16> to vector<4x128xf32>
    %108 = arith.addf %106, %107 : vector<4x128xf32>
    %cst_59 = arith.constant 0.000000e+00 : f32
    %109 = vector.broadcast %cst_59 : f32 to vector<4x128xf32>
    %110 = arith.cmpf oge, %108, %109 : vector<4x128xf32>
    %cst_60 = arith.constant 2.000000e-01 : f32
    %111 = vector.broadcast %cst_60 : f32 to vector<4x128xf32>
    %112 = arith.mulf %111, %108 : vector<4x128xf32>
    %113 = arith.select %110, %108, %112 : vector<4x128xi1>, vector<4x128xf32>
    %114 = arith.truncf %113 : vector<4x128xf32> to vector<4x128xbf16>
    %115 = arith.extf %114 : vector<4x128xbf16> to vector<4x128xf32>
    %c0_61 = arith.constant 0 : index
    %c0_62 = arith.constant 0 : index
    %116 = vector.load %arg19[%c0_61, %c0_62] : memref<16x128xf32, #tpu.memory_space<vmem>>, vector<4x128xf32>
    tpu.vector_store %arg19[%c0_61, %c0_62], %115 {strides = array<i32>} : memref<16x128xf32, #tpu.memory_space<vmem>>, vector<4x128xf32>,
    %c0_63 = arith.constant 0 : index
    %c0_64 = arith.constant 0 : index
    %117 = tpu.strided_load %arg19[%c0_63, %c0_64] {strides = array<i32: 2, 1>} : memref<16x128xf32, #tpu.memory_space<vmem>>, vector<2x128xf32>
    %118 = arith.truncf %117 : vector<2x128xf32> to vector<2x128xbf16>
    %c1_65 = arith.constant 1 : index
    %c0_66 = arith.constant 0 : index
    %119 = tpu.strided_load %arg19[%c1_65, %c0_66] {strides = array<i32: 2, 1>} : memref<16x128xf32, #tpu.memory_space<vmem>>, vector<2x128xf32>
    %120 = arith.truncf %119 : vector<2x128xf32> to vector<2x128xbf16>
    %cst_67 = arith.constant 0.000000e+00 : bf16
    %121 = vector.broadcast %cst_67 : bf16 to vector<1x128xbf16>
    %122 = tpu.concatenate %121, %120 in 0 : vector<1x128xbf16>, vector<2x128xbf16> -> vector<3x128xbf16>
    %123 = tpu.concatenate %118, %121 in 0 : vector<2x128xbf16>, vector<1x128xbf16> -> vector<3x128xbf16>
    %c0_68 = arith.constant 0 : index
    %c0_69 = arith.constant 0 : index
    %c0_70 = arith.constant 0 : index
    %124 = vector.load %arg14[%c0_68, %c0_69, %c0_70] : memref<2x128x256xbf16, #tpu.memory_space<vmem>>, vector<1x128x256xbf16>
    %125 = vector.shape_cast %124 : vector<1x128x256xbf16> to vector<128x256xbf16>
    %cst_71 = arith.constant dense<0.000000e+00> : vector<3x256xf32>
    %126 = tpu.matmul %122, %125, %cst_71 {dimension_numbers = #tpu.dot_dimension_numbers<[1], [0], [0], [1], [0, 0, 1, 1], [], []>} : vector<3x128xbf16>, vector<128x256xbf16>, vector<3x256xf32> -> vector<3x256xf32>
    %c1_72 = arith.constant 1 : index
    %c0_73 = arith.constant 0 : index
    %c0_74 = arith.constant 0 : index
    %127 = vector.load %arg14[%c1_72, %c0_73, %c0_74] : memref<2x128x256xbf16, #tpu.memory_space<vmem>>, vector<1x128x256xbf16>
    %128 = vector.shape_cast %127 : vector<1x128x256xbf16> to vector<128x256xbf16>
    %cst_75 = arith.constant dense<0.000000e+00> : vector<3x256xf32>
    %129 = tpu.matmul %123, %128, %cst_75 {dimension_numbers = #tpu.dot_dimension_numbers<[1], [0], [0], [1], [0, 0, 1, 1], [], []>} : vector<3x128xbf16>, vector<128x256xbf16>, vector<3x256xf32> -> vector<3x256xf32>
    %130 = vector.extract_strided_slice %126 {offsets = [0, 0], sizes = [2, 128], strides = [1, 1]} : vector<3x256xf32> to vector<2x128xf32>
    %131 = vector.extract_strided_slice %129 {offsets = [0, 0], sizes = [2, 128], strides = [1, 1]} : vector<3x256xf32> to vector<2x128xf32>
    %132 = arith.addf %130, %131 : vector<2x128xf32>
    %133 = vector.extract_strided_slice %126 {offsets = [1, 128], sizes = [2, 128], strides = [1, 1]} : vector<3x256xf32> to vector<2x128xf32>
    %134 = arith.addf %132, %133 : vector<2x128xf32>
    %135 = vector.extract_strided_slice %129 {offsets = [1, 128], sizes = [2, 128], strides = [1, 1]} : vector<3x256xf32> to vector<2x128xf32>
    %136 = arith.addf %134, %135 : vector<2x128xf32>
    %c0_76 = arith.constant 0 : index
    %c0_77 = arith.constant 0 : index
    %137 = vector.load %arg15[%c0_76, %c0_77] : memref<1x128xf32, #tpu.memory_space<vmem>>, vector<1x128xf32>
    %138 = vector.broadcast %137 : vector<1x128xf32> to vector<2x128xf32>
    %139 = arith.addf %136, %138 : vector<2x128xf32>
    %cst_78 = arith.constant 0.000000e+00 : f32
    %140 = vector.broadcast %cst_78 : f32 to vector<2x128xf32>
    %141 = arith.cmpf oge, %139, %140 : vector<2x128xf32>
    %cst_79 = arith.constant 2.000000e-01 : f32
    %142 = vector.broadcast %cst_79 : f32 to vector<2x128xf32>
    %143 = arith.mulf %142, %139 : vector<2x128xf32>
    %144 = arith.select %141, %139, %143 : vector<2x128xi1>, vector<2x128xf32>
    %145 = arith.truncf %144 : vector<2x128xf32> to vector<2x128xbf16>
    %c0_i32_80 = arith.constant 0 : i32
    %c2_i32_81 = arith.constant 2 : i32
    %146 = arith.addi %c0_i32_80, %c2_i32_81 : i32
    %c1_i32_82 = arith.constant 1 : i32
    %147 = scf.for %arg20 = %c0_i32_80 to %146 step %c1_i32_82 iter_args(%arg21 = %145) -> (vector<2x128xbf16>)  : i32 {
      %160 = arith.index_cast %arg20 : i32 to index
      %c0_89 = arith.constant 0 : index
      %c0_90 = arith.constant 0 : index
      %161 = vector.load %arg16[%160, %c0_89, %c0_90] : memref<2x128x384xbf16, #tpu.memory_space<vmem>>, vector<1x128x384xbf16>
      %162 = vector.shape_cast %161 : vector<1x128x384xbf16> to vector<128x384xbf16>
      %163 = arith.index_cast %arg20 : i32 to index
      %c0_91 = arith.constant 0 : index
      %c0_92 = arith.constant 0 : index
      %164 = vector.load %arg17[%163, %c0_91, %c0_92] : memref<2x1x128xf32, #tpu.memory_space<vmem>>, vector<1x1x128xf32>
      %165 = vector.shape_cast %164 : vector<1x1x128xf32> to vector<1x128xf32>
      %cst_93 = arith.constant 0.000000e+00 : bf16
      %166 = vector.broadcast %cst_93 : bf16 to vector<1x128xbf16>
      %167 = tpu.concatenate %166, %arg21, %166 in 0 : vector<1x128xbf16>, vector<2x128xbf16>, vector<1x128xbf16> -> vector<4x128xbf16>
      %cst_94 = arith.constant dense<0.000000e+00> : vector<4x384xf32>
      %168 = tpu.matmul %167, %162, %cst_94 {dimension_numbers = #tpu.dot_dimension_numbers<[1], [0], [0], [1], [0, 0, 1, 1], [], []>} : vector<4x128xbf16>, vector<128x384xbf16>, vector<4x384xf32> -> vector<4x384xf32>
      %169 = vector.extract_strided_slice %168 {offsets = [0, 0], sizes = [2, 128], strides = [1, 1]} : vector<4x384xf32> to vector<2x128xf32>
      %170 = vector.extract_strided_slice %168 {offsets = [1, 128], sizes = [2, 128], strides = [1, 1]} : vector<4x384xf32> to vector<2x128xf32>
      %171 = arith.addf %169, %170 : vector<2x128xf32>
      %172 = vector.extract_strided_slice %168 {offsets = [2, 256], sizes = [2, 128], strides = [1, 1]} : vector<4x384xf32> to vector<2x128xf32>
      %173 = arith.addf %171, %172 : vector<2x128xf32>
      %174 = vector.broadcast %165 : vector<1x128xf32> to vector<2x128xf32>
      %175 = arith.addf %173, %174 : vector<2x128xf32>
      %cst_95 = arith.constant 0.000000e+00 : f32
      %176 = vector.broadcast %cst_95 : f32 to vector<2x128xf32>
      %177 = arith.cmpf oge, %175, %176 : vector<2x128xf32>
      %cst_96 = arith.constant 2.000000e-01 : f32
      %178 = vector.broadcast %cst_96 : f32 to vector<2x128xf32>
      %179 = arith.mulf %178, %175 : vector<2x128xf32>
      %180 = arith.select %177, %175, %179 : vector<2x128xi1>, vector<2x128xf32>
      %181 = arith.truncf %180 : vector<2x128xf32> to vector<2x128xbf16>
      scf.yield %181 : vector<2x128xbf16>
    }
    %c2_i32_83 = arith.constant 2 : i32
    %148 = arith.extf %147 : vector<2x128xbf16> to vector<2x128xf32>
    %149 = arith.extf %145 : vector<2x128xbf16> to vector<2x128xf32>
    %150 = arith.addf %148, %149 : vector<2x128xf32>
    %cst_84 = arith.constant 0.000000e+00 : f32
    %151 = vector.broadcast %cst_84 : f32 to vector<2x128xf32>
    %152 = arith.cmpf oge, %150, %151 : vector<2x128xf32>
    %cst_85 = arith.constant 2.000000e-01 : f32
    %153 = vector.broadcast %cst_85 : f32 to vector<2x128xf32>
    %154 = arith.mulf %153, %150 : vector<2x128xf32>
    %155 = arith.select %152, %150, %154 : vector<2x128xi1>, vector<2x128xf32>
    %156 = arith.truncf %155 : vector<2x128xf32> to vector<2x128xbf16>
    %c0_86 = arith.constant 0 : index
    %c0_87 = arith.constant 0 : index
    %c0_88 = arith.constant 0 : index
    %157 = vector.load %arg18[%c0_86, %c0_87, %c0_88] : memref<1x2x128xbf16, #tpu.memory_space<vmem>>, vector<1x2x128xbf16>
    %158 = vector.shape_cast %157 : vector<1x2x128xbf16> to vector<2x128xbf16>
    %159 = vector.shape_cast %156 : vector<2x128xbf16> to vector<1x2x128xbf16>
    tpu.vector_store %arg18[%c0_86, %c0_87, %c0_88], %159 {strides = array<i32>} : memref<1x2x128xbf16, #tpu.memory_space<vmem>>, vector<1x2x128xbf16>,
    return
  }
  func.func @transform_0(%arg0: i32) -> (i32, i32, i32) {
    %c0_i32 = arith.constant 0 : i32
    %c0_i32_0 = arith.constant 0 : i32
    %c0_i32_1 = arith.constant 0 : i32
    return %arg0, %c0_i32, %c0_i32_0 : i32, i32, i32
  }
  func.func @transform_1(%arg0: i32) -> (i32, i32) {
    %c0_i32 = arith.constant 0 : i32
    %c0_i32_0 = arith.constant 0 : i32
    %c0_i32_1 = arith.constant 0 : i32
    return %c0_i32, %c0_i32_0 : i32, i32
  }
  func.func @transform_2(%arg0: i32) -> (i32, i32) {
    %c0_i32 = arith.constant 0 : i32
    %c0_i32_0 = arith.constant 0 : i32
    %c0_i32_1 = arith.constant 0 : i32
    return %c0_i32, %c0_i32_0 : i32, i32
  }
  func.func @transform_3(%arg0: i32) -> (i32, i32, i32) {
    %c0_i32 = arith.constant 0 : i32
    %c0_i32_0 = arith.constant 0 : i32
    %c0_i32_1 = arith.constant 0 : i32
    %c0_i32_2 = arith.constant 0 : i32
    return %c0_i32, %c0_i32_0, %c0_i32_1 : i32, i32, i32
  }
  func.func @transform_4(%arg0: i32) -> (i32, i32, i32) {
    %c0_i32 = arith.constant 0 : i32
    %c0_i32_0 = arith.constant 0 : i32
    %c0_i32_1 = arith.constant 0 : i32
    %c0_i32_2 = arith.constant 0 : i32
    return %c0_i32, %c0_i32_0, %c0_i32_1 : i32, i32, i32
  }
  func.func @transform_5(%arg0: i32) -> (i32, i32, i32) {
    %c0_i32 = arith.constant 0 : i32
    %c0_i32_0 = arith.constant 0 : i32
    %c0_i32_1 = arith.constant 0 : i32
    %c0_i32_2 = arith.constant 0 : i32
    return %c0_i32, %c0_i32_0, %c0_i32_1 : i32, i32, i32
  }
  func.func @transform_6(%arg0: i32) -> (i32, i32) {
    %c0_i32 = arith.constant 0 : i32
    %c0_i32_0 = arith.constant 0 : i32
    %c0_i32_1 = arith.constant 0 : i32
    return %c0_i32, %c0_i32_0 : i32, i32
  }
  func.func @transform_7(%arg0: i32) -> (i32, i32, i32) {
    %c0_i32 = arith.constant 0 : i32
    %c0_i32_0 = arith.constant 0 : i32
    %c0_i32_1 = arith.constant 0 : i32
    %c0_i32_2 = arith.constant 0 : i32
    return %c0_i32, %c0_i32_0, %c0_i32_1 : i32, i32, i32
  }
  func.func @transform_8(%arg0: i32) -> (i32, i32, i32) {
    %c0_i32 = arith.constant 0 : i32
    %c0_i32_0 = arith.constant 0 : i32
    %c0_i32_1 = arith.constant 0 : i32
    %c0_i32_2 = arith.constant 0 : i32
    return %c0_i32, %c0_i32_0, %c0_i32_1 : i32, i32, i32
  }
  func.func @transform_9(%arg0: i32) -> (i32, i32, i32) {
    %c0_i32 = arith.constant 0 : i32
    %c0_i32_0 = arith.constant 0 : i32
    %c0_i32_1 = arith.constant 0 : i32
    %c0_i32_2 = arith.constant 0 : i32
    return %c0_i32, %c0_i32_0, %c0_i32_1 : i32, i32, i32
  }
  func.func @transform_10(%arg0: i32) -> (i32, i32) {
    %c0_i32 = arith.constant 0 : i32
    %c0_i32_0 = arith.constant 0 : i32
    %c0_i32_1 = arith.constant 0 : i32
    return %c0_i32, %c0_i32_0 : i32, i32
  }
  func.func @transform_11(%arg0: i32) -> (i32, i32, i32) {
    %c0_i32 = arith.constant 0 : i32
    %c0_i32_0 = arith.constant 0 : i32
    %c0_i32_1 = arith.constant 0 : i32
    %c0_i32_2 = arith.constant 0 : i32
    return %c0_i32, %c0_i32_0, %c0_i32_1 : i32, i32, i32
  }
  func.func @transform_12(%arg0: i32) -> (i32, i32, i32) {
    %c0_i32 = arith.constant 0 : i32
    %c0_i32_0 = arith.constant 0 : i32
    %c0_i32_1 = arith.constant 0 : i32
    %c0_i32_2 = arith.constant 0 : i32
    return %c0_i32, %c0_i32_0, %c0_i32_1 : i32, i32, i32
  }
  func.func @transform_13(%arg0: i32) -> (i32, i32, i32) {
    %c0_i32 = arith.constant 0 : i32
    %c0_i32_0 = arith.constant 0 : i32
    %c0_i32_1 = arith.constant 0 : i32
    %c0_i32_2 = arith.constant 0 : i32
    return %c0_i32, %c0_i32_0, %c0_i32_1 : i32, i32, i32
  }
  func.func @transform_14(%arg0: i32) -> (i32, i32) {
    %c0_i32 = arith.constant 0 : i32
    %c0_i32_0 = arith.constant 0 : i32
    %c0_i32_1 = arith.constant 0 : i32
    return %c0_i32, %c0_i32_0 : i32, i32
  }
  func.func @transform_15(%arg0: i32) -> (i32, i32, i32) {
    %c0_i32 = arith.constant 0 : i32
    %c0_i32_0 = arith.constant 0 : i32
    %c0_i32_1 = arith.constant 0 : i32
    %c0_i32_2 = arith.constant 0 : i32
    return %c0_i32, %c0_i32_0, %c0_i32_1 : i32, i32, i32
  }
  func.func @transform_16(%arg0: i32) -> (i32, i32, i32) {
    %c0_i32 = arith.constant 0 : i32
    %c0_i32_0 = arith.constant 0 : i32
    %c0_i32_1 = arith.constant 0 : i32
    %c0_i32_2 = arith.constant 0 : i32
    return %c0_i32, %c0_i32_0, %c0_i32_1 : i32, i32, i32
  }
  func.func @transform_17(%arg0: i32) -> (i32, i32, i32) {
    %c0_i32 = arith.constant 0 : i32
    %c0_i32_0 = arith.constant 0 : i32
    %c0_i32_1 = arith.constant 0 : i32
    return %arg0, %c0_i32, %c0_i32_0 : i32, i32, i32
  }
}

</mosaic_0001>

<bundles_post_ra>
// kernel: audio_encoder_forward.1
= control target key start
LH: loop header
LB: loop body
LE: loop exit
PB: predicated region body
PF: predicated region fallthrough
CT: control target
= control target key end

     0   :  { %s5294_s0 = inlined_call_operand.vmem [shape: bf16[2,16,128], index: 0, kind: input, shape index: {}]   ;;  %s5295_s1 = inlined_call_operand.hbm [shape: bf16[128,384], index: 1, kind: input, shape index: {}]   ;;  %s5296_s2 = inlined_call_operand.vmem [shape: f32[1,128], index: 2, kind: input, shape index: {}]   ;;  %s5297_s3 = inlined_call_operand.hbm [shape: bf16[2,128,384], index: 3, kind: input, shape index: {}]   ;;  %s5298_s4 = inlined_call_operand.vmem [shape: f32[2,1,128], index: 4, kind: input, shape index: {}]   ;;  %s5299_s5 = inlined_call_operand.hbm [shape: bf16[2,128,256], index: 5, kind: input, shape index: {}]   ;;  %s5300_s6 = inlined_call_operand.vmem [shape: f32[1,128], index: 6, kind: input, shape index: {}]   ;;  %s5301_s7 = inlined_call_operand.hbm [shape: bf16[2,128,384], index: 7, kind: input, shape index: {}]   ;;  %s5302_s8 = inlined_call_operand.vmem [shape: f32[2,1,128], index: 8, kind: input, shape index: {}]   ;;  %s5303_s9 = inlined_call_operand.hbm [shape: bf16[2,128,256], index: 9, kind: input, shape index: {}]   ;;  %s5304_s10 = inlined_call_operand.vmem [shape: f32[1,128], index: 10, kind: input, shape index: {}]   ;;  %s5305_s11 = inlined_call_operand.hbm [shape: bf16[2,128,384], index: 11, kind: input, shape index: {}]   ;;  %s5306_s12 = inlined_call_operand.vmem [shape: f32[2,1,128], index: 12, kind: input, shape index: {}]   ;;  %s5307_s13 = inlined_call_operand.hbm [shape: bf16[2,128,256], index: 13, kind: input, shape index: {}]   ;;  %s5308_s14 = inlined_call_operand.vmem [shape: f32[1,128], index: 14, kind: input, shape index: {}]   ;;  %s5309_s15 = inlined_call_operand.hbm [shape: bf16[2,128,384], index: 15, kind: input, shape index: {}]   ;;  %s5310_s16 = inlined_call_operand.vmem [shape: f32[2,1,128], index: 16, kind: input, shape index: {}]   ;;  %s5311_s17 = inlined_call_operand.vmem [shape: bf16[2,2,128], index: 17, kind: output, shape index: {}]  }
   0x1   :  { %5314 = sst [smem:[#allocation22_spill]] %s5294_s0 }
   0x2   :  { %5315 = sst [smem:[#allocation23_spill]] %s5295_s1 }
   0x3   :  { %5316 = sst [smem:[#allocation24_spill]] %s5297_s3 }
   0x4   :  { %5317 = sst [smem:[#allocation25_spill]] %s5299_s5 }
   0x5   :  { %5318 = sst [smem:[#allocation26_spill]] %s5301_s7 }
   0x6   :  { %5319 = sst [smem:[#allocation27_spill]] %s5305_s11 }
   0x7   :  { %22 = vsyncpa [#allocation4], 0 }
   0x8   :  { %23 = vsyncpa [#allocation6], 0 }
   0x9   :  { %24 = vsyncpa [#allocation9], 0 }
   0xa   :  { %25 = vsyncpa [#allocation12], 0 }
   0xb   :  { %26 = vsyncpa [#allocation15], 0  ;;  %s4801_s24 = smov 0  }
   0xc LB: > { %5320 = sst [smem:[#allocation21_spill]] %s4661_s24  ;;  %s4807_s25 = sadd.s32 4294967295, %s4661_s24   ;;  %s4661_s24 = sphi %s4801_s24, %s32_s24  }
   0xd   : > { %p3047_p0 = scmp.ge.s32.totalorder %s4661_s24, 1  ;;  %p425_p1 = scmp.lt.s32.totalorder %s4661_s24, 3 }
   0xe   : > { %p4243_p2 = scmp.eq.s32.totalorder %s4807_s25, 0  ;;  %s5321_s3 = sld [smem:[#allocation24_spill]] }
   0xf   : > { %p4815_p3 = pnand %p3047_p0, %p425_p1  ;;  %s5323_s7 = sld [smem:[#allocation26_spill]] }
  0x10   : > { %s4699_s19 = smov [#allocation5]   ;;  %s4700_s21 = smov [#allocation8]  }
  0x11   : > { %p4218_p4 = pneg %p4815_p3  ;;  %s455_s1 = sshll.u32 %s4699_s19, 4  ;;  %s456_s1 = int_to_ptr.vmem [resolvable:$true] %s455_s1 }
  0x12   : > { %s489_s22 = sshll.u32 %s4700_s21, 4  ;;  %s5325_s11 = sld [smem:[#allocation27_spill]]  ;;  %s490_s22 = int_to_ptr.vmem [resolvable:$true] %s489_s22 }
  0x13   : > { %p4826_p5 = pnand %p4243_p2, %p4218_p4  ;;  %s5313_s0 = smov 192  }
  0x14   : > { %s453_s28 = sshll.u32 %s5321_s3, 4  ;;  %s4702_s30 = smov 12   ;;  %s454_s28 = int_to_ptr.hbm [resolvable:$true] %s453_s28 }
  0x15   : > { %s487_s18 = sshll.u32 %s5323_s7, 4  ;;  %s4703_s19 = smov [#allocation11]   ;;  %s488_s18 = int_to_ptr.hbm [resolvable:$true] %s487_s18 }
  0x16   : > { %4224 = dma.hbm_to_vmem [thread:$0]  (!%p4826_p5), %s454_s28, 6144, %s456_s1, [#allocation6], %s5313_s0, %s5313_s0, %s4702_s30  }
  0x17   : > { %4230 = dma.hbm_to_vmem [thread:$0]  (!%p4826_p5), %s488_s18, 6144, %s490_s22, [#allocation9], %s5313_s0, %s5313_s0, %s4702_s30  }
  0x18   : > { %s521_s27 = sshll.u32 %s5325_s11, 4  ;;  %s523_s21 = sshll.u32 %s4703_s19, 4  ;;  %s522_s27 = int_to_ptr.hbm [resolvable:$true] %s521_s27  ;;  %s524_s21 = int_to_ptr.vmem [resolvable:$true] %s523_s21 }
  0x19   : > { %s5326_s26 = sld [smem:[#allocation23_spill]]  ;;  %s4704_s18 = smov [#allocation3]  }
  0x1a   : > { %4236 = dma.hbm_to_vmem [thread:$0]  (!%p4826_p5), %s522_s27, 6144, %s524_s21, [#allocation12], %s5313_s0, %s5313_s0, %s4702_s30  }
  0x1b   : > { %s5327_s5 = sld [smem:[#allocation25_spill]]  ;;  %s438_s22 = sshll.u32 %s4704_s18, 4  ;;  %s439_s22 = int_to_ptr.vmem [resolvable:$true] %s438_s22 }
  0x1c   : > { %s4705_s3 = smov [#allocation7]   ;;  %s4706_s23 = smov 128  }
  0x1d   : > { %s472_s19 = sshll.u32 %s4705_s3, 4  ;;  %s4707_s27 = smov 8   ;;  %s473_s19 = int_to_ptr.vmem [resolvable:$true] %s472_s19 }
  0x1e   : > { %s504_s28 = sshll.u32 %s5303_s9, 4  ;;  %s4708_s1 = smov [#allocation10]   ;;  %s505_s28 = int_to_ptr.hbm [resolvable:$true] %s504_s28 }
  0x1f   : > { %s436_s7 = sshll.u32 %s5326_s26, 4  ;;  %s506_s18 = sshll.u32 %s4708_s1, 4  ;;  %s437_s7 = int_to_ptr.hbm [resolvable:$true] %s436_s7  ;;  %s507_s18 = int_to_ptr.vmem [resolvable:$true] %s506_s18 }
  0x20   : > { %4221 = dma.hbm_to_vmem [thread:$0]  (!%p4826_p5), %s437_s7, 3072, %s439_s22, [#allocation4], %s5313_s0, %s5313_s0, %s4702_s30  }
  0x21   : > { %s470_s11 = sshll.u32 %s5327_s5, 4  ;;  %s538_s7 = sshll.u32 %s5307_s13, 4  ;;  %s471_s11 = int_to_ptr.hbm [resolvable:$true] %s470_s11  ;;  %s539_s7 = int_to_ptr.hbm [resolvable:$true] %s538_s7 }
  0x22   : > { %4227 = dma.hbm_to_vmem [thread:$0]  (!%p4826_p5), %s471_s11, 4096, %s473_s19, [#allocation6], %s4706_s23, %s4706_s23, %s4707_s27  }
  0x23   : > { %4233 = dma.hbm_to_vmem [thread:$0]  (!%p4826_p5), %s505_s28, 4096, %s507_s18, [#allocation9], %s4706_s23, %s4706_s23, %s4707_s27  }
  0x24   : > { %s4709_s22 = smov [#allocation13]   ;;  %s555_s19 = sshll.u32 %s5309_s15, 4  ;;  %s556_s19 = int_to_ptr.hbm [resolvable:$true] %s555_s19 }
  0x25   : > { %s540_s3 = sshll.u32 %s4709_s22, 4  ;;  %s4710_s21 = smov [#allocation14]   ;;  %s541_s3 = int_to_ptr.vmem [resolvable:$true] %s540_s3 }
  0x26   : > { %4239 = dma.hbm_to_vmem [thread:$0]  (!%p4826_p5), %s539_s7, 4096, %s541_s3, [#allocation12], %s4706_s23, %s4706_s23, %s4707_s27  }
  0x27   : > { %s557_s26 = sshll.u32 %s4710_s21, 4  ;;  %s5328_s5 = smov 192   ;;  %s558_s26 = int_to_ptr.vmem [resolvable:$true] %s557_s26 }
  0x28   : > { %4242 = dma.hbm_to_vmem [thread:$0]  (!%p4826_p5), %s556_s19, 6144, %s558_s26, [#allocation15], %s5328_s5, %s5328_s5, %s4702_s30  }
  0x29   : > { %584 = sbr.rel (%p4815_p3) target bundleno = 1543 (0x607), region = 88 }
  0x2e   : > { %4640 = dma.done.wait (%p4243_p2), [#allocation4], 3072  }
  0x2f   : > { %4642 = vsyncadd (%p4243_p2), [#allocation4], 4294964224 }
  0x30   : > { %4644 = dma.done.wait (%p4243_p2), [#allocation6], 10240  }
  0x31   : > { %4646 = vsyncadd (%p4243_p2), [#allocation6], 4294957056 }
  0x32   : > { %4648 = dma.done.wait (%p4243_p2), [#allocation9], 10240  }
  0x33   : > { %4650 = vsyncadd (%p4243_p2), [#allocation9], 4294957056 }
  0x34   : > { %4652 = dma.done.wait (%p4243_p2), [#allocation12], 10240  }
  0x35   : > { %4654 = vsyncadd (%p4243_p2), [#allocation12], 4294957056 }
  0x36   : > { %4656 = dma.done.wait (%p4243_p2), [#allocation15], 6144  }
  0x37   : > { %4658 = vsyncadd (%p4243_p2), [#allocation15], 4294961152  ;;  %p670_p6 = scmp.lt.s32.totalorder %s4807_s25, 1  ;;  %v3971_v0 = vld [vmem:[#allocation3 + $0xac] sm:$0xf]  ;;  %s5329_s27 = sld [smem:[#allocation22_spill]] }
  0x38   : > { %v3160_v1 = vld [vmem:[#allocation3 + $0xb4] sm:$0xf0]  ;;  %v3166_v2 = vld [vmem:[#allocation3 + $0xb0] sm:$0xf]  ;;  %v3973_v4 = vld [vmem:[#allocation3 + $0xb8] sm:$0xf0] }
  0x39   : > { %s5348_s25 = smov (!%p670_p6, %s4807_s25), 1  ;;  %v3163_v3 = vor.u32 %v3971_v0, %v3160_v1  ;;  %v3968_v5 = vld [vmem:[#allocation3 + $0x94] sm:$0xf]  ;;  %v3148_v6 = vld [vmem:[#allocation3 + $0x9c] sm:$0xf0]  ;;  %v3167_v7 = vor.u32 %v3973_v4, %v3166_v2  ;;  %vm728_vm0 = vcmask 1040384  }
  0x3a   : > { %s677_s20 = scalar_lea.vmem %s5311_s17, %s5348_s25  ;;  %v3154_v8 = vld [vmem:[#allocation3 + $0x98] sm:$0xf]  ;;  %v3970_v9 = vld [vmem:[#allocation3 + $0xa0] sm:$0xf0]  ;;  %v3158_v10 = vld [vmem:[#allocation3 + $0xa8] sm:$0xf]  ;;  %v3151_v11 = vor.u32 %v3968_v5, %v3148_v6 }
  0x3b   : > { %878 = vmatpush.bf16.msra.mxu1 %v3163_v3  ;;  %v3972_v12 = vld [vmem:[#allocation3 + $0xb0] sm:$0xf0]  ;;  %896 = vmatpush.bf16.msra.mxu2 %v3167_v7  ;;  %v3155_v13 = vor.u32 %v3970_v9, %v3154_v8  ;;  %v3965_v15 = vld [vmem:[#allocation3 + $0x7c] sm:$0xf]  ;;  %v3136_v16 = vld [vmem:[#allocation3 + $0x84] sm:$0xf0] }
  0x3c   : > { %v3159_v14 = vor.u32 %v3972_v12, %v3158_v10  ;;  %v3146_v17 = vld [vmem:[#allocation3 + $0x90] sm:$0xf]  ;;  %v3142_v18 = vld [vmem:[#allocation3 + $0x80] sm:$0xf]  ;;  %v3967_v19 = vld [vmem:[#allocation3 + $0x88] sm:$0xf0]  ;;  %v3139_v22 = vor.u32 %v3965_v15, %v3136_v16 }
  0x3d   : > { %v3969_v20 = vld [vmem:[#allocation3 + $0x98] sm:$0xf0]  ;;  %v3134_v23 = vld [vmem:[#allocation3 + $0x78] sm:$0xf]  ;;  %v3966_v24 = vld [vmem:[#allocation3 + $0x80] sm:$0xf0]  ;;  %v3143_v25 = vor.u32 %v3967_v19, %v3142_v18 }
  0x3e   : > { %861 = vmatpush.bf16.msra.mxu0 %v3159_v14  ;;  %4170 = vmatpush.bf16.msra.mxu3 %v3159_v14  ;;  %v3147_v21 = vor.u32 %v3969_v20, %v3146_v17  ;;  %v3962_v26 = vld [vmem:[#allocation3 + $0x64] sm:$0xf]  ;;  %v3124_v27 = vld [vmem:[#allocation3 + $0x6c] sm:$0xf0]  ;;  %v3130_v28 = vld [vmem:[#allocation3 + $0x68] sm:$0xf]  ;;  %v3135_v30 = vor.u32 %v3966_v24, %v3134_v23 }
  0x3f   : > { %879 = vmatpush.bf16.msra.mxu1 %v3151_v11  ;;  %897 = vmatpush.bf16.msra.mxu2 %v3155_v13  ;;  %v3964_v29 = vld [vmem:[#allocation3 + $0x70] sm:$0xf0]  ;;  %s3948_s0 = sshll.u32 %s5348_s25, 3  ;;  %v3127_v31 = vor.u32 %v3962_v26, %v3124_v27  ;;  %v3122_v32 = vld [vmem:[#allocation3 + $0x60] sm:$0xf]  ;;  %vm917_vm3 = vcmask 1046528  }
  0x40   : > { %v3963_v33 = vld [vmem:[#allocation3 + $0x68] sm:$0xf0]  ;;  %v3131_v34 = vor.u32 %v3964_v29, %v3130_v28  ;;  %v3112_v36 = vld [vmem:[#allocation3 + $0x54] sm:$0xf0]  ;;  %s674_s28 = scalar_lea.vmem %s5329_s27, %s3948_s0  ;;  %v3118_v37 = vld [vmem:[#allocation3 + $0x50] sm:$0xf] }
  0x41   : > { %v3959_v35 = vld [vmem:[#allocation3 + $0x4c] sm:$0xf]  ;;  %v3961_v38 = vld [vmem:[#allocation3 + $0x58] sm:$0xf0]  ;;  %v3123_v39 = vor.u32 %v3963_v33, %v3122_v32  ;;  %v3110_v41 = vld [vmem:[#allocation3 + $0x48] sm:$0xf] }
  0x42   : > { %862 = vmatpush.bf16.msra.mxu0 %v3147_v21  ;;  %4171 = vmatpush.bf16.msra.mxu3 %v3147_v21  ;;  %v3115_v40 = vor.u32 %v3959_v35, %v3112_v36  ;;  %v3960_v42 = vld [vmem:[#allocation3 + $0x50] sm:$0xf0]  ;;  %v3119_v44 = vor.u32 %v3961_v38, %v3118_v37  ;;  %v3100_v46 = vld [vmem:[#allocation3 + $0x3c] sm:$0xf0]  ;;  %v3106_v47 = vld [vmem:[#allocation3 + $0x38] sm:$0xf] }
  0x43   : > { %880 = vmatpush.bf16.msra.mxu1 %v3139_v22  ;;  %898 = vmatpush.bf16.msra.mxu2 %v3143_v25  ;;  %v3949_v43 = vld [vmem:[%s674_s28] sm:$0xff]  ;;  %v3958_v48 = vld [vmem:[#allocation3 + $0x40] sm:$0xf0]  ;;  %v3111_v49 = vor.u32 %v3960_v42, %v3110_v41  ;;  %v3957_v52 = vld [vmem:[#allocation3 + $0x38] sm:$0xf0]  ;;  %vm930_vm4 = vcmask 1045504  }
  0x44   : > { %v3956_v45 = vld [vmem:[#allocation3 + $0x34] sm:$0xf]  ;;  %v3098_v51 = vld [vmem:[#allocation3 + $0x30] sm:$0xf]  ;;  %v720_v53 = vshrl.u32 %v3949_v43, 16  ;;  %v3107_v54 = vor.u32 %v3958_v48, %v3106_v47  ;;  %v723_v0 = vshll.u32 %v3949_v43, 16 }
  0x45   : > { %v3103_v50 = vor.u32 %v3956_v45, %v3100_v46  ;;  %v3953_v55 = vld [vmem:[#allocation3 + $0x1c] sm:$0xf]  ;;  %v3088_v56 = vld [vmem:[#allocation3 + $0x24] sm:$0xf0]  ;;  %v3094_v57 = vld [vmem:[#allocation3 + $0x20] sm:$0xf]  ;;  %v3099_v59 = vor.u32 %v3957_v52, %v3098_v51 }
  0x46   : > { %863 = vmatpush.bf16.msra.mxu0 %v3135_v30  ;;  %4172 = vmatpush.bf16.msra.mxu3 %v3135_v30  ;;  %v3955_v58 = vld [vmem:[#allocation3 + $0x28] sm:$0xf0]  ;;  %v3091_v60 = vor.u32 %v3953_v55, %v3088_v56  ;;  %v3086_v61 = vld [vmem:[#allocation3 + $0x18] sm:$0xf]  ;;  %v3954_v62 = vld [vmem:[#allocation3 + $0x20] sm:$0xf0] }
  0x47   : > { %881 = vmatpush.bf16.msra.mxu1 %v3127_v31  ;;  %899 = vmatpush.bf16.msra.mxu2 %v3131_v34  ;;  %v722_v63 = vrot.slane %v720_v53, 7  ;;  %v3095_v1 = vor.u32 %v3955_v58, %v3094_v57  ;;  %v3950_v2 = vld [vmem:[#allocation3 + $0x4] sm:$0xf]  ;;  %v3076_v3 = vld [vmem:[#allocation3 + $0xc] sm:$0xf0]  ;;  %v3087_v6 = vor.u32 %v3954_v62, %v3086_v61  ;;  %s4939_s7 = smov 0  }
  0x48   : > { %v3082_v4 = vld [vmem:[#allocation3 + $0x8] sm:$0xf]  ;;  %v3952_v5 = vld [vmem:[#allocation3 + $0x10] sm:$0xf0]  ;;  %vm729_vm1 = vsmask.f32 256  ;;  %v3079_v7 = vor.u32 %v3950_v2, %v3076_v3 }
  0x49   : > { %v725_v8 = vor.u32 %v723_v0, %v722_v63  ;;  %v3074_v9 = vld [vmem:[#allocation3] sm:$0xf]  ;;  %v3951_v10 = vld [vmem:[#allocation3 + $0x8] sm:$0xf0]  ;;  %v3083_v11 = vor.u32 %v3952_v5, %v3082_v4  ;;  %vm4914_vm2 = vmand %vm728_vm0, %vm729_vm1 }
  0x4a   : > { %864 = vmatpush.bf16.msra.mxu0 %v3123_v39  ;;  %4173 = vmatpush.bf16.msra.mxu3 %v3123_v39  ;;  %v3075_v13 = vor.u32 %v3951_v10, %v3074_v9  ;;  %v732_v15 = vsel %vm4914_vm2, %v722_v63, 0  ;;  %v4351_v29 = vld [vmem:[%s5296_s2] ss:$0 sm:$0xff] }
  0x4b   : > { %882 = vmatpush.bf16.msra.mxu1 %v3115_v40  ;;  %900 = vmatpush.bf16.msra.mxu2 %v3119_v44  ;;  %v731_v14 = vsel %vm4914_vm2, 0, %v725_v8 }
  0x4e   : > { %865 = vmatpush.bf16.msra.mxu0 %v3111_v49  ;;  %4174 = vmatpush.bf16.msra.mxu3 %v3111_v49 }
  0x4f   : > { %883 = vmatpush.bf16.msra.mxu1 %v3103_v50  ;;  %901 = vmatpush.bf16.msra.mxu2 %v3107_v54 }
  0x52   : > { %866 = vmatpush.bf16.msra.mxu0 %v3099_v59  ;;  %4175 = vmatpush.bf16.msra.mxu3 %v3099_v59 }
  0x53   : > { %884 = vmatpush.bf16.msra.mxu1 %v3091_v60  ;;  %902 = vmatpush.bf16.msra.mxu2 %v3095_v1 }
  0x56   : > { %867 = vmatpush.bf16.msra.mxu0 %v3087_v6  ;;  %4176 = vmatpush.bf16.msra.mxu3 %v3087_v6 }
  0x57   : > { %885 = vmatpush.bf16.msra.mxu1 %v3079_v7  ;;  %903 = vmatpush.bf16.msra.mxu2 %v3083_v11 }
  0x5a   : > { %886 = vmatmul.bf16.vlgmr.msra.gmra.mxu1 %v731_v14  ;;  %868 = vmatpush.bf16.msra.mxu0 %v3075_v13 }
  0x5b   : > { %904 = vmatmul.bf16.vlgmr.msra.gmra.mxu2 %v731_v14  ;;  %4177 = vmatpush.bf16.msra.mxu3 %v3075_v13 }
  0x5d   : > { %869 = vmatmul.bf16.vlgmr.msra.gmra.mxu0 %v731_v14 }
  0x5e   : > { %874 = vmatmul.bf16.vlgmr.msra.gmra.mxu3 %v732_v15 }
  0x6a   : > { %891 = vmatmul.bf16.gmra.mxu1 %v732_v15 }
  0x6b   : > { %909 = vmatmul.bf16.gmra.mxu2 %v732_v15 }
  0xd7   : > { %v887_v16 = vpop.f32.mrf.mxu1 }
  0xd8   : > { %v918_v21 = vrot.slane %v887_v16, 1 }
  0xda   : > { %v870_v22 = vpop.f32.mrf.mxu0 }
  0xde   : > { %v905_v17 = vpop.f32.mrf.mxu2 }
  0xdf   : > { %v889_v18 = vpop.f32.mrf.mxu1  ;;  %v931_v25 = vrot.slane %v905_v17, 2 }
  0xe0   : > { %v919_v19 = vrot.slane %v889_v18, 1 }
  0xe1   : > { %v875_v20 = vpop.f32.mrf.mxu3 }
  0xe2   : > { %v920_v23 = vsel %vm917_vm3, %v918_v21, %v919_v19  ;;  %v872_v38 = vpop.f32.mrf.mxu0 }
  0xe3   : > { %v925_v28 = vadd.f32 %v920_v23, %v870_v22 }
  0xe6   : > { %v907_v24 = vpop.f32.mrf.mxu2 }
  0xe7   : > { %v932_v26 = vrot.slane %v907_v24, 2  ;;  %v892_v27 = vpop.f32.mrf.mxu1 }
  0xe8   : > { %v921_v31 = vrot.slane %v892_v27, 1 }
  0xe9   : > { %v933_v30 = vsel %vm930_vm4, %v931_v25, %v932_v26  ;;  %v876_v32 = vpop.f32.mrf.mxu3 }
  0xea   : > { %v938_v33 = vadd.f32 %v933_v30, %v925_v28  ;;  %v922_v35 = vsel %vm917_vm3, %v919_v19, %v921_v31 }
  0xeb   : > { %v926_v42 = vadd.f32 %v922_v35, %v872_v38 }
  0xec   : > { %v943_v34 = vadd.f32 %v4351_v29, %v938_v33 }
  0xee   : > { %vm945_vm5 = vcmp.ge.f32.partialorder %v943_v34, 0.0  ;;  %v947_v36 = vmul.f32 0.2, %v943_v34  ;;  %v910_v37 = vpop.f32.mrf.mxu2 }
  0xef   : > { %v934_v39 = vrot.slane %v910_v37, 2  ;;  %v894_v40 = vpop.f32.mrf.mxu1 }
  0xf0   : > { %v949_v41 = vsel %vm945_vm5, %v943_v34, %v947_v36 }
  0xf1   : > { %v4928_v43 = vpack.c.bf16 %v949_v41, %v949_v41   ;;  %v935_v44 = vsel %vm930_vm4, %v932_v26, %v934_v39 }
  0xf2   : > { %v939_v45 = vadd.f32 %v935_v44, %v926_v42 }
  0xf3   : > { %v5333_v52 = vmov %v4928_v43 }
  0xf4   : > { %v944_v46 = vadd.f32 %v4351_v29, %v939_v45 }
  0xf6   : > { %vm946_vm6 = vcmp.ge.f32.partialorder %v944_v46, 0.0  ;;  %v948_v47 = vmul.f32 0.2, %v944_v46  ;;  %v912_v48 = vpop.f32.mrf.mxu2 }
  0xf8   : > { %v950_v49 = vsel %vm946_vm6, %v944_v46, %v948_v47 }
  0xf9   : > { %v4931_v50 = vpack.c.bf16 %v950_v49, %v950_v49  }
  0xfb   : > { %v5332_v51 = vmov %v4931_v50 }
  0xfc LB: >> { %s3974_s22 = smul.u32 192, %s4673_s7  ;;  %v1000_v24 = vunpack.c.l.b16 %v4669_v52  ;;  %v1001_v25 = vunpack.c.l.b16 %v4665_v51  ;;  %s996_s21 = scalar_lea.vmem %s5298_s4, %s4673_s7  ;;  %s4673_s7 = sphi %s4939_s7, %s958_s7   ;;  %v4669_v52 = vphi %v5333_v52, %v5337_v52   ;;  %v4665_v51 = vphi %v5332_v51, %v5336_v51  }
  0xfd   : >> { %s958_s7 = sadd.s32 1, %s4673_s7  }
  0xfe   : >> { %s4951_s3 = scalar_lea.vmem [#allocation5], %s3974_s22  ;;  %v1002_v35 = vpack.c.b16 %v1001_v25, %v1000_v24  ;;  %p955_p7 = scmp.ge.s32.totalorder %s958_s7, 2  }
  0xff   : >> { %v3996_v53 = vld [vmem:[%s4951_s3 + $0xac] sm:$0xf]  ;;  %v3257_v54 = vld [vmem:[%s4951_s3 + $0xb4] sm:$0xf0]  ;;  %v3263_v55 = vld [vmem:[%s4951_s3 + $0xb0] sm:$0xf] }
 0x100   : >> { %v3260_v56 = vor.u32 %v3996_v53, %v3257_v54  ;;  %v3998_v57 = vld [vmem:[%s4951_s3 + $0xb8] sm:$0xf0]  ;;  %v3993_v58 = vld [vmem:[%s4951_s3 + $0x94] sm:$0xf]  ;;  %v3245_v59 = vld [vmem:[%s4951_s3 + $0x9c] sm:$0xf0] }
 0x101   : >> { %v3264_v60 = vor.u32 %v3998_v57, %v3263_v55  ;;  %v3251_v61 = vld [vmem:[%s4951_s3 + $0x98] sm:$0xf]  ;;  %v3995_v62 = vld [vmem:[%s4951_s3 + $0xa0] sm:$0xf0]  ;;  %v3255_v63 = vld [vmem:[%s4951_s3 + $0xa8] sm:$0xf]  ;;  %v3248_v0 = vor.u32 %v3993_v58, %v3245_v59 }
 0x102   : >> { %1159 = vmatpush.bf16.msra.mxu1 %v3260_v56  ;;  %v3997_v1 = vld [vmem:[%s4951_s3 + $0xb0] sm:$0xf0]  ;;  %v3252_v2 = vor.u32 %v3995_v62, %v3251_v61  ;;  %v3990_v4 = vld [vmem:[%s4951_s3 + $0x7c] sm:$0xf]  ;;  %v3233_v5 = vld [vmem:[%s4951_s3 + $0x84] sm:$0xf0] }
 0x103   : >> { %1177 = vmatpush.bf16.msra.mxu2 %v3264_v60  ;;  %v3256_v3 = vor.u32 %v3997_v1, %v3255_v63  ;;  %v3243_v6 = vld [vmem:[%s4951_s3 + $0x90] sm:$0xf]  ;;  %v3239_v7 = vld [vmem:[%s4951_s3 + $0x80] sm:$0xf]  ;;  %v3992_v8 = vld [vmem:[%s4951_s3 + $0x88] sm:$0xf0]  ;;  %v3236_v11 = vor.u32 %v3990_v4, %v3233_v5 }
 0x104   : >> { %v3994_v9 = vld [vmem:[%s4951_s3 + $0x98] sm:$0xf0]  ;;  %v3231_v13 = vld [vmem:[%s4951_s3 + $0x78] sm:$0xf]  ;;  %v3991_v14 = vld [vmem:[%s4951_s3 + $0x80] sm:$0xf0]  ;;  %v3240_v15 = vor.u32 %v3992_v8, %v3239_v7 }
 0x105   : >> { %1142 = vmatpush.bf16.msra.mxu0 %v3256_v3  ;;  %4178 = vmatpush.bf16.msra.mxu3 %v3256_v3  ;;  %v3244_v10 = vor.u32 %v3994_v9, %v3243_v6  ;;  %v3987_v16 = vld [vmem:[%s4951_s3 + $0x64] sm:$0xf]  ;;  %v3221_v17 = vld [vmem:[%s4951_s3 + $0x6c] sm:$0xf0]  ;;  %v3227_v18 = vld [vmem:[%s4951_s3 + $0x68] sm:$0xf]  ;;  %v3232_v20 = vor.u32 %v3991_v14, %v3231_v13 }
 0x106   : >> { %1160 = vmatpush.bf16.msra.mxu1 %v3248_v0  ;;  %v3989_v19 = vld [vmem:[%s4951_s3 + $0x70] sm:$0xf0]  ;;  %v3224_v21 = vor.u32 %v3987_v16, %v3221_v17  ;;  %v3219_v22 = vld [vmem:[%s4951_s3 + $0x60] sm:$0xf]  ;;  %v3988_v23 = vld [vmem:[%s4951_s3 + $0x68] sm:$0xf0] }
 0x107   : >> { %1178 = vmatpush.bf16.msra.mxu2 %v3252_v2  ;;  %v3228_v26 = vor.u32 %v3989_v19, %v3227_v18  ;;  %v3984_v27 = vld [vmem:[%s4951_s3 + $0x4c] sm:$0xf]  ;;  %v3209_v28 = vld [vmem:[%s4951_s3 + $0x54] sm:$0xf0]  ;;  %v3215_v29 = vld [vmem:[%s4951_s3 + $0x50] sm:$0xf]  ;;  %v3220_v31 = vor.u32 %v3988_v23, %v3219_v22 }
 0x108   : >> { %v3986_v30 = vld [vmem:[%s4951_s3 + $0x58] sm:$0xf0]  ;;  %v3212_v32 = vor.u32 %v3984_v27, %v3209_v28  ;;  %v3207_v33 = vld [vmem:[%s4951_s3 + $0x48] sm:$0xf]  ;;  %v3985_v34 = vld [vmem:[%s4951_s3 + $0x50] sm:$0xf0] }
 0x109   : >> { %1143 = vmatpush.bf16.msra.mxu0 %v3244_v10  ;;  %4179 = vmatpush.bf16.msra.mxu3 %v3244_v10  ;;  %v3216_v36 = vor.u32 %v3986_v30, %v3215_v29  ;;  %v3981_v37 = vld [vmem:[%s4951_s3 + $0x34] sm:$0xf]  ;;  %v3197_v38 = vld [vmem:[%s4951_s3 + $0x3c] sm:$0xf0]  ;;  %v3203_v39 = vld [vmem:[%s4951_s3 + $0x38] sm:$0xf]  ;;  %v3208_v41 = vor.u32 %v3985_v34, %v3207_v33 }
 0x10a   : >> { %1161 = vmatpush.bf16.msra.mxu1 %v3236_v11  ;;  %v3983_v40 = vld [vmem:[%s4951_s3 + $0x40] sm:$0xf0]  ;;  %v3200_v42 = vor.u32 %v3981_v37, %v3197_v38  ;;  %v3195_v44 = vld [vmem:[%s4951_s3 + $0x30] sm:$0xf]  ;;  %v3982_v45 = vld [vmem:[%s4951_s3 + $0x38] sm:$0xf0] }
 0x10b   : >> { %1179 = vmatpush.bf16.msra.mxu2 %v3240_v15  ;;  %v1004_v46 = vshrl.u32 %v1002_v35, 16  ;;  %v3204_v47 = vor.u32 %v3983_v40, %v3203_v39  ;;  %v3978_v48 = vld [vmem:[%s4951_s3 + $0x1c] sm:$0xf]  ;;  %v3185_v49 = vld [vmem:[%s4951_s3 + $0x24] sm:$0xf0]  ;;  %v3196_v53 = vor.u32 %v3982_v45, %v3195_v44  ;;  %v1007_v58 = vshll.u32 %v1002_v35, 16 }
 0x10c   : >> { %v3191_v51 = vld [vmem:[%s4951_s3 + $0x20] sm:$0xf]  ;;  %v3980_v52 = vld [vmem:[%s4951_s3 + $0x28] sm:$0xf0]  ;;  %v3188_v54 = vor.u32 %v3978_v48, %v3185_v49  ;;  %v3183_v55 = vld [vmem:[%s4951_s3 + $0x18] sm:$0xf] }
 0x10d   : >> { %1144 = vmatpush.bf16.msra.mxu0 %v3232_v20  ;;  %4180 = vmatpush.bf16.msra.mxu3 %v3232_v20  ;;  %v3979_v56 = vld [vmem:[%s4951_s3 + $0x20] sm:$0xf0]  ;;  %v1006_v57 = vrot.slane %v1004_v46, 7  ;;  %v3192_v59 = vor.u32 %v3980_v52, %v3191_v51  ;;  %v3173_v61 = vld [vmem:[%s4951_s3 + $0xc] sm:$0xf0]  ;;  %vm1267_vm11 = vcmask (%p955_p7), 1043456  }
 0x10e   : >> { %1162 = vmatpush.bf16.msra.mxu1 %v3224_v21  ;;  %v3975_v60 = vld [vmem:[%s4951_s3 + $0x4] sm:$0xf]  ;;  %v3179_v62 = vld [vmem:[%s4951_s3 + $0x8] sm:$0xf]  ;;  %v3977_v63 = vld [vmem:[%s4951_s3 + $0x10] sm:$0xf0]  ;;  %v3184_v0 = vor.u32 %v3979_v56, %v3183_v55 }
 0x10f   : >> { %1180 = vmatpush.bf16.msra.mxu2 %v3228_v26  ;;  %v3176_v1 = vor.u32 %v3975_v60, %v3173_v61  ;;  %v1009_v2 = vor.u32 %v1007_v58, %v1006_v57  ;;  %v3171_v3 = vld [vmem:[%s4951_s3] sm:$0xf]  ;;  %v3976_v4 = vld [vmem:[%s4951_s3 + $0x8] sm:$0xf0]  ;;  %v3180_v5 = vor.u32 %v3977_v63, %v3179_v62  ;;  %v1013_v8 = vsel %vm4914_vm2, %v1006_v57, 0  ;;  %s5044_s24 = smov (%p955_p7), 0  }
 0x110   : >> { %v3172_v6 = vor.u32 %v3976_v4, %v3171_v3  ;;  %v4352_v23 = vld [vmem:[%s996_s21] ss:$0 sm:$0xff]  ;;  %v4013_v46 = vld [vmem:[#allocation7 + $0x74] sm:$0xf] (%p955_p7)  ;;  %v4011_v57 = vld [vmem:[#allocation7 + $0x64] sm:$0xf] (%p955_p7) }
 0x111   : >> { %1145 = vmatpush.bf16.msra.mxu0 %v3220_v31  ;;  %4181 = vmatpush.bf16.msra.mxu3 %v3220_v31  ;;  %v1012_v7 = vsel %vm4914_vm2, 0, %v1009_v2  ;;  %v3387_v48 = vld [vmem:[#allocation7 + $0xf0] sm:$0xf] (%p955_p7)  ;;  %v3317_v58 = vld [vmem:[#allocation7 + $0x68] sm:$0xf0] (%p955_p7) }
 0x112   : >> { %1163 = vmatpush.bf16.msra.mxu1 %v3212_v32  ;;  %v3320_v60 = vor.u32 (%p955_p7), %v4011_v57, %v3317_v58  ;;  %v4028_v61 = vld [vmem:[#allocation7 + $0xe4] sm:$0xf0] (%p955_p7)  ;;  %v4027_v62 = vld [vmem:[#allocation7 + $0xe4] sm:$0xf] (%p955_p7)  ;;  %v3381_v63 = vld [vmem:[#allocation7 + $0xe8] sm:$0xf0] (%p955_p7) }
 0x113   : >> { %1181 = vmatpush.bf16.msra.mxu2 %v3216_v36  ;;  %v4014_v2 = vld [vmem:[#allocation7 + $0x74] sm:$0xf0] (%p955_p7)  ;;  %v4009_v3 = vld [vmem:[#allocation7 + $0x54] sm:$0xf] (%p955_p7)  ;;  %v3277_v57 = vld [vmem:[#allocation7 + $0x18] sm:$0xf0] (%p955_p7) }
 0x115   : >> { %1146 = vmatpush.bf16.msra.mxu0 %v3208_v41  ;;  %4182 = vmatpush.bf16.msra.mxu3 %v3208_v41 }
 0x116   : >> { %1164 = vmatpush.bf16.msra.mxu1 %v3200_v42 }
 0x117   : >> { %1182 = vmatpush.bf16.msra.mxu2 %v3204_v47  ;;  %v3325_v47 = vld [vmem:[#allocation7 + $0x78] sm:$0xf0] (%p955_p7) }
 0x118   : > { %v3328_v49 = vor.u32 (%p955_p7), %v4013_v46, %v3325_v47 }
 0x119   : >> { %1147 = vmatpush.bf16.msra.mxu0 %v3196_v53  ;;  %4183 = vmatpush.bf16.msra.mxu3 %v3196_v53  ;;  %v4029_v53 = vld [vmem:[#allocation7 + $0xf4] sm:$0xf] (%p955_p7) }
 0x11a   : >> { %1165 = vmatpush.bf16.msra.mxu1 %v3188_v54  ;;  %v3389_v54 = vld [vmem:[#allocation7 + $0xf8] sm:$0xf0] (%p955_p7) }
 0x11b   : >> { %1183 = vmatpush.bf16.msra.mxu2 %v3192_v59  ;;  %v3392_v56 = vor.u32 (%p955_p7), %v4029_v53, %v3389_v54  ;;  %v3379_v59 = vld [vmem:[#allocation7 + $0xe0] sm:$0xf] (%p955_p7)  ;;  %v4006_v53 = vld [vmem:[#allocation7 + $0x34] sm:$0xf0] (%p955_p7)  ;;  %v4020_v54 = vld [vmem:[#allocation7 + $0xa4] sm:$0xf0] (%p955_p7) }
 0x11d   : >> { %1148 = vmatpush.bf16.msra.mxu0 %v3184_v0  ;;  %4184 = vmatpush.bf16.msra.mxu3 %v3184_v0  ;;  %v3380_v0 = vor.u32 (%p955_p7), %v4028_v61, %v3379_v59  ;;  %v4018_v61 = vld [vmem:[#allocation7 + $0x94] sm:$0xf0] (%p955_p7) }
 0x11e   : >> { %1166 = vmatpush.bf16.msra.mxu1 %v3176_v1  ;;  %v3323_v1 = vld [vmem:[#allocation7 + $0x70] sm:$0xf] (%p955_p7) }
 0x11f   : >> { %1184 = vmatpush.bf16.msra.mxu2 %v3180_v5  ;;  %v3324_v4 = vor.u32 (%p955_p7), %v4014_v2, %v3323_v1  ;;  %v3309_v5 = vld [vmem:[#allocation7 + $0x58] sm:$0xf0] (%p955_p7)  ;;  %v4004_v1 = vld [vmem:[#allocation7 + $0x24] sm:$0xf0] (%p955_p7) }
 0x120   : > { %v3341_v2 = vld [vmem:[#allocation7 + $0x98] sm:$0xf0] (%p955_p7) }
 0x121   : >> { %1167 = vmatmul.bf16.vlgmr.msra.gmra.mxu1 %v1012_v7  ;;  %1149 = vmatpush.bf16.msra.mxu0 %v3172_v6 }
 0x122   : >> { %1185 = vmatmul.bf16.vlgmr.msra.gmra.mxu2 %v1012_v7  ;;  %4185 = vmatpush.bf16.msra.mxu3 %v3172_v6  ;;  %v3371_v6 = vld [vmem:[#allocation7 + $0xd0] sm:$0xf] (%p955_p7) }
 0x123   : > { %1381 = vmatpush.bf16.msra.mxu1 (%p955_p7), %v3328_v49  ;;  %v3347_v49 = vld [vmem:[#allocation7 + $0xa0] sm:$0xf] (%p955_p7) }
 0x124   : >> { %1150 = vmatmul.bf16.vlgmr.msra.gmra.mxu0 %v1012_v7  ;;  %v4026_v7 = vld [vmem:[#allocation7 + $0xd4] sm:$0xf0] (%p955_p7) }
 0x125   : >> { %1155 = vmatmul.bf16.vlgmr.msra.gmra.mxu3 %v1013_v8  ;;  %1368 = vmatpush.bf16.msra.mxu0 (%p955_p7), %v3324_v4 }
 0x126   : > { %1505 = vmatpush.bf16.msra.mxu3 (%p955_p7), %v3392_v56  ;;  %v4001_v56 = vld [vmem:[#allocation7 + $0x14] sm:$0xf] (%p955_p7) }
 0x127   : > { %1382 = vmatpush.bf16.msra.mxu1 (%p955_p7), %v3320_v60  ;;  %v3339_v60 = vld [vmem:[#allocation7 + $0x90] sm:$0xf] (%p955_p7) }
 0x131   : >> { %1172 = vmatmul.bf16.gmra.mxu1 %v1013_v8 }
 0x132   : >> { %1190 = vmatmul.bf16.gmra.mxu2 %v1013_v8  ;;  %v4025_v8 = vld [vmem:[#allocation7 + $0xd4] sm:$0xf] (%p955_p7) }
 0x19e   : >> { %v1168_v9 = vpop.f32.mrf.mxu1 }
 0x19f   : >> { %v1198_v15 = vrot.slane %v1168_v9, 1  ;;  %v3373_v9 = vld [vmem:[#allocation7 + $0xd8] sm:$0xf0] (%p955_p7) }
 0x1a1   : >> { %v1151_v16 = vpop.f32.mrf.mxu0 }
 0x1a5   : >> { %v1186_v10 = vpop.f32.mrf.mxu2 }
 0x1a6   : >> { %v1170_v11 = vpop.f32.mrf.mxu1  ;;  %v1210_v19 = vrot.slane %v1186_v10, 2  ;;  %v3315_v10 = vld [vmem:[#allocation7 + $0x60] sm:$0xf] (%p955_p7) }
 0x1a7   : >> { %v1199_v13 = vrot.slane %v1170_v11, 1  ;;  %v3312_v11 = vor.u32 (%p955_p7), %v4009_v3, %v3309_v5  ;;  %v3280_v5 = vor.u32 (%p955_p7), %v4001_v56, %v3277_v57 }
 0x1a8   : >> { %v1156_v14 = vpop.f32.mrf.mxu3 }
 0x1a9   : >> { %v1200_v17 = vsel %vm917_vm3, %v1198_v15, %v1199_v13  ;;  %v1153_v32 = vpop.f32.mrf.mxu0  ;;  %v4007_v14 = vld [vmem:[#allocation7 + $0x44] sm:$0xf] (%p955_p7)  ;;  %v3301_v15 = vld [vmem:[#allocation7 + $0x48] sm:$0xf0] (%p955_p7)  ;;  %1383 = vmatpush.bf16.msra.mxu1 (%p955_p7), %v3312_v11 }
 0x1aa   : >> { %v1205_v22 = vadd.f32 %v1200_v17, %v1151_v16  ;;  %v3372_v16 = vor.u32 (%p955_p7), %v4026_v7, %v3371_v6  ;;  %v3376_v17 = vor.u32 (%p955_p7), %v4025_v8, %v3373_v9  ;;  %v3340_v6 = vor.u32 (%p955_p7), %v4018_v61, %v3339_v60  ;;  %v3999_v8 = vld [vmem:[#allocation7 + $0x4] sm:$0xf] (%p955_p7)  ;;  %v3269_v9 = vld [vmem:[#allocation7 + $0x8] sm:$0xf0] (%p955_p7) }
 0x1ad   : >> { %v1188_v18 = vpop.f32.mrf.mxu2 }
 0x1ae   : >> { %v1211_v20 = vrot.slane %v1188_v18, 2  ;;  %v1173_v21 = vpop.f32.mrf.mxu1 }
 0x1af   : >> { %v1201_v25 = vrot.slane %v1173_v21, 1  ;;  %v4023_v21 = vld [vmem:[#allocation7 + $0xc4] sm:$0xf] (%p955_p7) }
 0x1b0   : >> { %v1212_v24 = vsel %vm930_vm4, %v1210_v19, %v1211_v20  ;;  %v1157_v26 = vpop.f32.mrf.mxu3  ;;  %v3363_v19 = vld [vmem:[#allocation7 + $0xc0] sm:$0xf] (%p955_p7) }
 0x1b1   : >> { %v1217_v27 = vadd.f32 %v1212_v24, %v1205_v22  ;;  %v1202_v29 = vsel %vm917_vm3, %v1199_v13, %v1201_v25  ;;  %v4012_v13 = vld [vmem:[#allocation7 + $0x64] sm:$0xf0] (%p955_p7)  ;;  %v3365_v22 = vld [vmem:[#allocation7 + $0xc8] sm:$0xf0] (%p955_p7)  ;;  %v4010_v24 = vld [vmem:[#allocation7 + $0x54] sm:$0xf0] (%p955_p7)  ;;  %v3304_v25 = vor.u32 (%p955_p7), %v4007_v14, %v3301_v15 }
 0x1b2   : >> { %v1206_v36 = vadd.f32 %v1202_v29, %v1153_v32  ;;  %v3316_v18 = vor.u32 (%p955_p7), %v4012_v13, %v3315_v10  ;;  %v3368_v32 = vor.u32 (%p955_p7), %v4023_v21, %v3365_v22  ;;  %v3331_v14 = vld [vmem:[#allocation7 + $0x80] sm:$0xf] (%p955_p7)  ;;  %v3275_v15 = vld [vmem:[#allocation7 + $0x10] sm:$0xf] (%p955_p7)  ;;  %v3333_v21 = vld [vmem:[#allocation7 + $0x88] sm:$0xf0] (%p955_p7) }
 0x1b3   : >> { %v1222_v28 = vadd.f32 %v4352_v23, %v1217_v27  ;;  %v4005_v27 = vld [vmem:[#allocation7 + $0x34] sm:$0xf] (%p955_p7)  ;;  %1384 = vmatpush.bf16.msra.mxu1 (%p955_p7), %v3304_v25 }
 0x1b4   : > { %1369 = vmatpush.bf16.msra.mxu0 (%p955_p7), %v3316_v18 }
 0x1b5   : >> { %vm1224_vm7 = vcmp.ge.f32.partialorder %v1222_v28, 0.0  ;;  %v1226_v30 = vmul.f32 0.2, %v1222_v28  ;;  %v1191_v31 = vpop.f32.mrf.mxu2 }
 0x1b6   : >> { %v1213_v33 = vrot.slane %v1191_v31, 2  ;;  %v1175_v34 = vpop.f32.mrf.mxu1 }
 0x1b7   : >> { %v1228_v35 = vsel %vm1224_vm7, %v1222_v28, %v1226_v30  ;;  %v3293_v28 = vld [vmem:[#allocation7 + $0x38] sm:$0xf0] (%p955_p7)  ;;  %v1234_v30 = vunpack.c.l.bf16 (%p955_p7), %v4928_v43  ;;  %v3299_v34 = vld [vmem:[#allocation7 + $0x40] sm:$0xf] (%p955_p7)  ;;  %v3285_v43 = vld [vmem:[#allocation7 + $0x28] sm:$0xf0] (%p955_p7) }
 0x1b8   : >> { %v5014_v52 = vpack.c.bf16 %v1228_v35, %v1228_v35   ;;  %v1214_v38 = vsel %vm930_vm4, %v1211_v20, %v1213_v33  ;;  %v4024_v20 = vld [vmem:[#allocation7 + $0xc4] sm:$0xf0] (%p955_p7)  ;;  %v3355_v33 = vld [vmem:[#allocation7 + $0xb0] sm:$0xf] (%p955_p7) }
 0x1b9   : >> { %v1218_v39 = vadd.f32 %v1214_v38, %v1206_v36  ;;  %v3364_v31 = vor.u32 (%p955_p7), %v4024_v20, %v3363_v19  ;;  %v4008_v35 = vld [vmem:[#allocation7 + $0x44] sm:$0xf0] (%p955_p7)  ;;  %v1235_v38 = vunpack.c.l.bf16 (%p955_p7), %v4931_v50  ;;  %v4019_v50 = vld [vmem:[#allocation7 + $0xa4] sm:$0xf] (%p955_p7) }
 0x1ba   : >> { %v5334_v37 = vmov %v5014_v52  ;;  %v4016_v19 = vld [vmem:[#allocation7 + $0x84] sm:$0xf0] (%p955_p7)  ;;  %v4015_v20 = vld [vmem:[#allocation7 + $0x84] sm:$0xf] (%p955_p7) }
 0x1bb   : >> { %v1223_v40 = vadd.f32 %v4352_v23, %v1218_v39  ;;  %v5337_v52 = vmov %v5334_v37  ;;  %v3307_v23 = vld [vmem:[#allocation7 + $0x50] sm:$0xf] (%p955_p7)  ;;  %v1232_v29 = vunpack.c.l.bf16 (%p955_p7), %v5334_v37  ;;  %v4022_v39 = vld [vmem:[#allocation7 + $0xb4] sm:$0xf0] (%p955_p7)  ;;  %v3300_v37 = vor.u32 (%p955_p7), %v4008_v35, %v3299_v34 }
 0x1bc   : > { %v4030_v52 = vld [vmem:[#allocation7 + $0xf4] sm:$0xf0] (%p955_p7)  ;;  %v3308_v26 = vor.u32 (%p955_p7), %v4010_v24, %v3307_v23  ;;  %v3356_v47 = vor.u32 (%p955_p7), %v4022_v39, %v3355_v33  ;;  %v3272_v24 = vor.u32 (%p955_p7), %v3999_v8, %v3269_v9 }
 0x1bd   : >> { %vm1225_vm8 = vcmp.ge.f32.partialorder %v1223_v40, 0.0  ;;  %v1227_v41 = vmul.f32 0.2, %v1223_v40  ;;  %v1193_v42 = vpop.f32.mrf.mxu2  ;;  %v3388_v55 = vor.u32 (%p955_p7), %v4030_v52, %v3387_v48  ;;  %v1236_v46 = vadd.f32 (%p955_p7), %v1234_v30, %v1232_v29  ;;  %v3291_v52 = vld [vmem:[#allocation7 + $0x30] sm:$0xf] (%p955_p7) }
 0x1be   : > { %1370 = vmatpush.bf16.msra.mxu0 (%p955_p7), %v3308_v26  ;;  %v3296_v42 = vor.u32 (%p955_p7), %v4005_v27, %v3293_v28  ;;  %v3292_v59 = vor.u32 (%p955_p7), %v4006_v53, %v3291_v52  ;;  %v3332_v26 = vor.u32 (%p955_p7), %v4016_v19, %v3331_v14  ;;  %v3336_v27 = vor.u32 (%p955_p7), %v4015_v20, %v3333_v21  ;;  %v3267_v28 = vld [vmem:[#allocation7] sm:$0xf] (%p955_p7)  ;;  %v4000_v29 = vld [vmem:[#allocation7 + $0x4] sm:$0xf0] (%p955_p7) }
 0x1bf   : >> { %v1229_v44 = vsel %vm1225_vm8, %v1223_v40, %v1227_v41  ;;  %957 = sbr.rel (!%p955_p7) target bundleno = 252 (0xfc), region = 191  ;;  %1492 = vmatpush.bf16.msra.mxu2 (%p955_p7), %v3388_v55  ;;  %v4021_v40 = vld [vmem:[#allocation7 + $0xb4] sm:$0xf] (%p955_p7)  ;;  %v3357_v41 = vld [vmem:[#allocation7 + $0xb8] sm:$0xf0] (%p955_p7)  ;;  %vm1238_vm9 = vcmp.ge.f32.partialorder (%p955_p7), %v1236_v46, 0.0  ;;  %v3268_v30 = vor.u32 (%p955_p7), %v4000_v29, %v3267_v28 }
 0x1c0   : >> { %v5017_v51 = vpack.c.bf16 %v1229_v44, %v1229_v44   ;;  %v4003_v44 = vld [vmem:[#allocation7 + $0x24] sm:$0xf] (%p955_p7)  ;;  %v3360_v48 = vor.u32 (%p955_p7), %v4021_v40, %v3357_v41  ;;  %v3349_v55 = vld [vmem:[#allocation7 + $0xa8] sm:$0xf0] (%p955_p7)  ;;  %1385 = vmatpush.bf16.msra.mxu1 (%p955_p7), %v3296_v42  ;;  %v1240_v3 = vmul.f32 (%p955_p7), 0.2, %v1236_v46 }
 0x1c1   : > { %v3288_v58 = vor.u32 (%p955_p7), %v4003_v44, %v3285_v43 }
 0x1c2   : >> { %v5335_v45 = vmov %v5017_v51  ;;  %1371 = vmatpush.bf16.msra.mxu0 (%p955_p7), %v3300_v37  ;;  %v1242_v10 = vsel (%p955_p7), %vm1238_vm9, %v1236_v46, %v1240_v3 }
 0x1c3   : >> { %v5336_v51 = vmov %v5335_v45  ;;  %1493 = vmatpush.bf16.msra.mxu2 (%p955_p7), %v3380_v0  ;;  %v1233_v36 = vunpack.c.l.bf16 (%p955_p7), %v5335_v45  ;;  %v3352_v0 = vor.u32 (%p955_p7), %v4019_v50, %v3349_v55 }
 0x1c4   : > { %v3384_v51 = vor.u32 %v4027_v62, %v3381_v63  ;;  %v4017_v62 = vld [vmem:[#allocation7 + $0x94] sm:$0xf]  ;;  %v3348_v63 = vor.u32 %v4020_v54, %v3347_v49  ;;  %1386 = vmatpush.bf16.msra.mxu1 %v3288_v58 }
 0x1c5   : > { %v1237_v45 = vadd.f32 %v1235_v38, %v1233_v36  ;;  %v3344_v13 = vor.u32 %v4017_v62, %v3341_v2 }
 0x1c6   : > { %1506 = vmatpush.bf16.msra.mxu3 %v3384_v51  ;;  %v3283_v51 = vld [vmem:[#allocation7 + $0x20] sm:$0xf]  ;;  %1372 = vmatpush.bf16.msra.mxu0 %v3292_v59  ;;  %v4353_v59 = vld [vmem:[%s5300_s6] ss:$0 sm:$0xff] }
 0x1c7   : > { %1494 = vmatpush.bf16.msra.mxu2 %v3372_v16  ;;  %vm1239_vm10 = vcmp.ge.f32.partialorder %v1237_v45, 0.0  ;;  %v1241_v4 = vmul.f32 0.2, %v1237_v45  ;;  %v3284_v7 = vor.u32 %v4004_v1, %v3283_v51  ;;  %v4002_v16 = vld [vmem:[#allocation7 + $0x14] sm:$0xf0] }
 0x1c8   : > { %1387 = vmatpush.bf16.msra.mxu1 %v3280_v5  ;;  %v3276_v25 = vor.u32 %v4002_v16, %v3275_v15 }
 0x1c9   : > { %v1243_v11 = vsel %vm1239_vm10, %v1237_v45, %v1241_v4 }
 0x1ca   : > { %1507 = vmatpush.bf16.msra.mxu3 %v3376_v17  ;;  %v1244_v17 = vpack.c.bf16 %v1242_v10, %v1242_v10  ;;  %v1245_v18 = vpack.c.bf16 %v1243_v11, %v1243_v11  ;;  %1373 = vmatpush.bf16.msra.mxu0 %v3284_v7 }
 0x1cb   : > { %1495 = vmatpush.bf16.msra.mxu2 %v3364_v31 }
 0x1cc   : > { %v1246_v22 = vunpack.c.l.bf16 %v1244_v17  ;;  %v1247_v23 = vunpack.c.l.bf16 %v1245_v18  ;;  %1388 = vmatpush.bf16.msra.mxu1 %v3272_v24 }
 0x1ce   : > { %1508 = vmatpush.bf16.msra.mxu3 %v3368_v32  ;;  %1248 = vst [vmem:[#allocation2] sm:$0xff] %v1246_v22  ;;  %1374 = vmatpush.bf16.msra.mxu0 %v3276_v25 }
 0x1cf   : > { %1496 = vmatpush.bf16.msra.mxu2 %v3356_v47  ;;  %1249 = vst [vmem:[#allocation2 + $0x8] sm:$0xff] %v1247_v23 }
 0x1d2   : > { %1509 = vmatpush.bf16.msra.mxu3 %v3360_v48  ;;  %1375 = vmatpush.bf16.msra.mxu0 %v3268_v30 }
 0x1d3   : > { %1497 = vmatpush.bf16.msra.mxu2 %v3348_v63 }
 0x1d6   : > { %1510 = vmatpush.bf16.msra.mxu3 %v3352_v0  ;;  %v1253_v31 = vld [vmem:[#allocation2 + $0x1] ss:$2 sm:$0xff]  ;;  %v1250_v32 = vld [vmem:[#allocation2] ss:$2 sm:$0xff] }
 0x1d7   : > { %1498 = vmatpush.bf16.msra.mxu2 %v3340_v6  ;;  %v1254_v33 = vpack.c.bf16 %v1253_v31, %v1253_v31  ;;  %v1251_v34 = vpack.c.bf16 %v1250_v32, %v1250_v32 }
 0x1d9   : > { %v1256_v35 = vunpack.c.l.b16 %v1254_v33 }
 0x1da   : > { %1511 = vmatpush.bf16.msra.mxu3 %v3344_v13 }
 0x1db   : > { %1499 = vmatpush.bf16.msra.mxu2 %v3332_v26  ;;  %v1257_v36 = vpack.c.b16 %v1256_v35, %v1256_v35 }
 0x1dd   : > { %v1259_v38 = vshrl.u32 %v1257_v36, 16  ;;  %v1262_v39 = vshll.u32 %v1257_v36, 16 }
 0x1de   : > { %1512 = vmatpush.bf16.msra.mxu3 %v3336_v27  ;;  %3393 = vmatmul.msk.bf16.vlgmr.msra.gmra.mxu2 %vm1267_vm11, %v1251_v34 }
 0x1df   : > { %v1261_v40 = vrot.slane %v1259_v38, 7 }
 0x1e1   : > { %3394 = vmatmul.msk.bf16.vlgmr.msra.gmra.mxu3 %vm1267_vm11, %v1251_v34  ;;  %v1264_v41 = vor.u32 %v1262_v39, %v1261_v40 }
 0x1e3   : > { %v1266_v42 = vsel %vm4914_vm2, 0, %v1264_v41 }
 0x1e4   : > { %1389 = vmatmul.bf16.vlgmr.msra.gmra.mxu1 %v1266_v42  ;;  %1376 = vmatmul.bf16.vlgmr.msra.gmra.mxu0 %v1266_v42 }
 0x261   : > { %v1501_v37 = vpop.f32.mrf.mxu2  ;;  %v1390_v43 = vpop.f32.mrf.mxu1 }
 0x262   : > { %v1377_v46 = vpop.f32.mrf.mxu0  ;;  %v1522_v54 = vrot.slane %v1390_v43, 1 }
 0x263   : > { %v1519_v52 = vadd.f32 %v1501_v37, %v1377_v46 }
 0x264   : > { %v1514_v44 = vpop.f32.mrf.mxu3 }
 0x265   : > { %v1529_v50 = vrot.slane %v1514_v44, 1 }
 0x269   : > { %v1503_v47 = vpop.f32.mrf.mxu2  ;;  %v1392_v53 = vpop.f32.mrf.mxu1 }
 0x26a   : > { %v1379_v45 = vpop.f32.mrf.mxu0  ;;  %v1523_v55 = vrot.slane %v1392_v53, 1 }
 0x26c   : > { %v1516_v48 = vpop.f32.mrf.mxu3  ;;  %v1524_v56 = vsel %vm917_vm3, %v1522_v54, %v1523_v55 }
 0x26d   : > { %v1530_v49 = vrot.slane %v1516_v48, 1  ;;  %v1526_v58 = vadd.f32 %v1524_v56, %v1519_v52 }
 0x26f   : > { %v1531_v57 = vsel %vm917_vm3, %v1529_v50, %v1530_v49 }
 0x270   : > { %v1533_v60 = vadd.f32 %v1531_v57, %v1526_v58 }
 0x272   : > { %v1538_v61 = vadd.f32 %v4353_v59, %v1533_v60 }
 0x274   : > { %vm1539_vm12 = vcmp.ge.f32.partialorder %v1538_v61, 0.0  ;;  %v1540_v62 = vmul.f32 0.2, %v1538_v61 }
 0x276   : > { %v1541_v63 = vsel %vm1539_vm12, %v1538_v61, %v1540_v62 }
 0x277   : > { %v5039_v0 = vpack.c.bf16 %v1541_v63, %v1541_v63  }
 0x279   : > { %v5338_v51 = vmov %v5039_v0 }
 0x27a LB: >> { %s4031_s29 = smul.u32 192, %s4681_s24  ;;  %v1588_v30 = vunpack.c.l.b16 %v4677_v51  ;;  %vm1599_vm13 = vcmask 1044480   ;;  %vm1600_vm14 = vsmask.f32 4352  ;;  %s1585_s27 = scalar_lea.vmem %s5302_s8, %s4681_s24  ;;  %s4681_s24 = sphi %s5044_s24, %s1548_s24   ;;  %v4677_v51 = vphi %v5338_v51, %v5340_v51  }
 0x27b   : >> { %vm1601_vm15 = vmand %vm1599_vm13, %vm1600_vm14  ;;  %s1548_s24 = sadd.s32 1, %s4681_s24  }
 0x27c   : >> { %s5051_s0 = scalar_lea.vmem [#allocation8], %s4031_s29  ;;  %v1589_v41 = vpack.c.b16 %v1588_v30, %v1588_v30  ;;  %p1545_p8 = scmp.ge.s32.totalorder %s1548_s24, 2  }
 0x27d   : >> { %v4053_v1 = vld [vmem:[%s5051_s0 + $0xac] sm:$0xf]  ;;  %v3484_v2 = vld [vmem:[%s5051_s0 + $0xb4] sm:$0xf0]  ;;  %v3490_v3 = vld [vmem:[%s5051_s0 + $0xb0] sm:$0xf] }
 0x27e   : >> { %v3487_v4 = vor.u32 %v4053_v1, %v3484_v2  ;;  %v4055_v5 = vld [vmem:[%s5051_s0 + $0xb8] sm:$0xf0]  ;;  %v4050_v6 = vld [vmem:[%s5051_s0 + $0x94] sm:$0xf]  ;;  %v3472_v7 = vld [vmem:[%s5051_s0 + $0x9c] sm:$0xf0] }
 0x27f   : >> { %v3491_v8 = vor.u32 %v4055_v5, %v3490_v3  ;;  %v3478_v9 = vld [vmem:[%s5051_s0 + $0x98] sm:$0xf]  ;;  %v4052_v10 = vld [vmem:[%s5051_s0 + $0xa0] sm:$0xf0]  ;;  %v3482_v11 = vld [vmem:[%s5051_s0 + $0xa8] sm:$0xf]  ;;  %v3475_v13 = vor.u32 %v4050_v6, %v3472_v7 }
 0x280   : >> { %1744 = vmatpush.bf16.msra.mxu1 %v3487_v4  ;;  %v4054_v14 = vld [vmem:[%s5051_s0 + $0xb0] sm:$0xf0]  ;;  %v3479_v15 = vor.u32 %v4052_v10, %v3478_v9  ;;  %v4047_v17 = vld [vmem:[%s5051_s0 + $0x7c] sm:$0xf]  ;;  %v3460_v18 = vld [vmem:[%s5051_s0 + $0x84] sm:$0xf0] }
 0x281   : >> { %1758 = vmatpush.bf16.msra.mxu2 %v3491_v8  ;;  %v3483_v16 = vor.u32 %v4054_v14, %v3482_v11  ;;  %v3470_v19 = vld [vmem:[%s5051_s0 + $0x90] sm:$0xf]  ;;  %v3466_v20 = vld [vmem:[%s5051_s0 + $0x80] sm:$0xf]  ;;  %v4049_v21 = vld [vmem:[%s5051_s0 + $0x88] sm:$0xf0]  ;;  %v3463_v24 = vor.u32 %v4047_v17, %v3460_v18 }
 0x282   : >> { %v4051_v22 = vld [vmem:[%s5051_s0 + $0x98] sm:$0xf0]  ;;  %v3458_v25 = vld [vmem:[%s5051_s0 + $0x78] sm:$0xf]  ;;  %v4048_v26 = vld [vmem:[%s5051_s0 + $0x80] sm:$0xf0]  ;;  %v3467_v27 = vor.u32 %v4049_v21, %v3466_v20 }
 0x283   : >> { %1731 = vmatpush.bf16.msra.mxu0 %v3483_v16  ;;  %v3471_v23 = vor.u32 %v4051_v22, %v3470_v19  ;;  %v4044_v28 = vld [vmem:[%s5051_s0 + $0x64] sm:$0xf]  ;;  %v3448_v29 = vld [vmem:[%s5051_s0 + $0x6c] sm:$0xf0]  ;;  %v3454_v31 = vld [vmem:[%s5051_s0 + $0x68] sm:$0xf]  ;;  %v3459_v33 = vor.u32 %v4048_v26, %v3458_v25 }
 0x284   : >> { %1745 = vmatpush.bf16.msra.mxu1 %v3475_v13  ;;  %v4046_v32 = vld [vmem:[%s5051_s0 + $0x70] sm:$0xf0]  ;;  %v3451_v34 = vor.u32 %v4044_v28, %v3448_v29  ;;  %v3446_v35 = vld [vmem:[%s5051_s0 + $0x60] sm:$0xf]  ;;  %v4045_v36 = vld [vmem:[%s5051_s0 + $0x68] sm:$0xf0] }
 0x285   : >> { %1759 = vmatpush.bf16.msra.mxu2 %v3479_v15  ;;  %v3455_v38 = vor.u32 %v4046_v32, %v3454_v31  ;;  %v4041_v39 = vld [vmem:[%s5051_s0 + $0x4c] sm:$0xf]  ;;  %v3436_v40 = vld [vmem:[%s5051_s0 + $0x54] sm:$0xf0]  ;;  %v3442_v42 = vld [vmem:[%s5051_s0 + $0x50] sm:$0xf]  ;;  %v3447_v44 = vor.u32 %v4045_v36, %v3446_v35 }
 0x286   : >> { %v4043_v37 = vld [vmem:[%s5051_s0 + $0x58] sm:$0xf0]  ;;  %v3439_v43 = vor.u32 %v4041_v39, %v3436_v40  ;;  %v3434_v46 = vld [vmem:[%s5051_s0 + $0x48] sm:$0xf]  ;;  %v4042_v47 = vld [vmem:[%s5051_s0 + $0x50] sm:$0xf0] }
 0x287   : >> { %1732 = vmatpush.bf16.msra.mxu0 %v3471_v23  ;;  %v3443_v48 = vor.u32 %v4043_v37, %v3442_v42  ;;  %v4038_v49 = vld [vmem:[%s5051_s0 + $0x34] sm:$0xf]  ;;  %v3424_v52 = vld [vmem:[%s5051_s0 + $0x3c] sm:$0xf0]  ;;  %v1591_v53 = vshrl.u32 %v1589_v41, 16  ;;  %v3435_v50 = vor.u32 %v4042_v47, %v3434_v46  ;;  %v1594_v62 = vshll.u32 %v1589_v41, 16 }
 0x288   : >> { %1746 = vmatpush.bf16.msra.mxu1 %v3463_v24  ;;  %v3430_v45 = vld [vmem:[%s5051_s0 + $0x38] sm:$0xf]  ;;  %v4040_v54 = vld [vmem:[%s5051_s0 + $0x40] sm:$0xf0]  ;;  %v3427_v55 = vor.u32 %v4038_v49, %v3424_v52  ;;  %v3422_v56 = vld [vmem:[%s5051_s0 + $0x30] sm:$0xf] }
 0x289   : >> { %1760 = vmatpush.bf16.msra.mxu2 %v3467_v27  ;;  %v4039_v57 = vld [vmem:[%s5051_s0 + $0x38] sm:$0xf0]  ;;  %v3431_v58 = vor.u32 %v4040_v54, %v3430_v45  ;;  %v3412_v60 = vld [vmem:[%s5051_s0 + $0x24] sm:$0xf0]  ;;  %v1593_v61 = vrot.slane %v1591_v53, 7  ;;  %s5131_s18 = smov (%p1545_p8), 0  }
 0x28a   : >> { %v4035_v59 = vld [vmem:[%s5051_s0 + $0x1c] sm:$0xf]  ;;  %v3418_v63 = vld [vmem:[%s5051_s0 + $0x20] sm:$0xf]  ;;  %v4037_v51 = vld [vmem:[%s5051_s0 + $0x28] sm:$0xf0]  ;;  %v3423_v1 = vor.u32 %v4039_v57, %v3422_v56 }
 0x28b   : >> { %1733 = vmatpush.bf16.msra.mxu0 %v3459_v33  ;;  %v3415_v2 = vor.u32 %v4035_v59, %v3412_v60  ;;  %v3410_v3 = vld [vmem:[%s5051_s0 + $0x18] sm:$0xf]  ;;  %v4036_v4 = vld [vmem:[%s5051_s0 + $0x20] sm:$0xf0]  ;;  %v3419_v5 = vor.u32 %v4037_v51, %v3418_v63  ;;  %v3400_v7 = vld [vmem:[%s5051_s0 + $0xc] sm:$0xf0]  ;;  %v1596_v9 = vor.u32 %v1594_v62, %v1593_v61 }
 0x28c   : >> { %1747 = vmatpush.bf16.msra.mxu1 %v3451_v34  ;;  %v4032_v6 = vld [vmem:[%s5051_s0 + $0x4] sm:$0xf]  ;;  %v3406_v8 = vld [vmem:[%s5051_s0 + $0x8] sm:$0xf]  ;;  %v4034_v10 = vld [vmem:[%s5051_s0 + $0x10] sm:$0xf0]  ;;  %v3411_v11 = vor.u32 %v4036_v4, %v3410_v3 }
 0x28d   : >> { %1761 = vmatpush.bf16.msra.mxu2 %v3455_v38  ;;  %v3403_v13 = vor.u32 %v4032_v6, %v3400_v7  ;;  %v3398_v14 = vld [vmem:[%s5051_s0] sm:$0xf]  ;;  %v4033_v15 = vld [vmem:[%s5051_s0 + $0x8] sm:$0xf0]  ;;  %v3407_v16 = vor.u32 %v4034_v10, %v3406_v8  ;;  %v1598_v17 = vsel %vm4914_vm2, 0, %v1596_v9 }
 0x28e   : >> { %v3399_v18 = vor.u32 %v4033_v15, %v3398_v14  ;;  %v1602_v19 = vsel %vm1601_vm15, %v1598_v17, 0  ;;  %v4354_v32 = vld [vmem:[%s1585_s27] ss:$0 sm:$0xff]  ;;  %v4071_v41 = vld [vmem:[#allocation10 + $0x74] sm:$0xf0] (%p1545_p8) }
 0x28f   : >> { %1734 = vmatpush.bf16.msra.mxu0 %v3447_v44  ;;  %v3550_v40 = vld [vmem:[#allocation10 + $0x70] sm:$0xf] (%p1545_p8)  ;;  %v4070_v42 = vld [vmem:[#allocation10 + $0x74] sm:$0xf] (%p1545_p8)  ;;  %v3552_v44 = vld [vmem:[#allocation10 + $0x78] sm:$0xf0] (%p1545_p8) }
 0x290   : >> { %1748 = vmatpush.bf16.msra.mxu1 %v3439_v43  ;;  %v3551_v37 = vor.u32 (%p1545_p8), %v4071_v41, %v3550_v40  ;;  %v3614_v43 = vld [vmem:[#allocation10 + $0xf0] sm:$0xf] (%p1545_p8)  ;;  %v4087_v46 = vld [vmem:[#allocation10 + $0xf4] sm:$0xf0] (%p1545_p8)  ;;  %v3555_v47 = vor.u32 (%p1545_p8), %v4070_v42, %v3552_v44  ;;  %v4086_v49 = vld [vmem:[#allocation10 + $0xf4] sm:$0xf] (%p1545_p8) }
 0x291   : >> { %1762 = vmatpush.bf16.msra.mxu2 %v3443_v48  ;;  %v3615_v48 = vor.u32 (%p1545_p8), %v4087_v46, %v3614_v43  ;;  %v3616_v52 = vld [vmem:[#allocation10 + $0xf8] sm:$0xf0] (%p1545_p8)  ;;  %v3542_v53 = vld [vmem:[#allocation10 + $0x60] sm:$0xf] (%p1545_p8)  ;;  %v4069_v54 = vld [vmem:[#allocation10 + $0x64] sm:$0xf0] (%p1545_p8) }
 0x292   : > { %v3619_v45 = vor.u32 (%p1545_p8), %v4086_v49, %v3616_v52  ;;  %v3543_v56 = vor.u32 (%p1545_p8), %v4069_v54, %v3542_v53  ;;  %v4085_v59 = vld [vmem:[#allocation10 + $0xe4] sm:$0xf0] (%p1545_p8)  ;;  %v4084_v60 = vld [vmem:[#allocation10 + $0xe4] sm:$0xf] (%p1545_p8)  ;;  %v3608_v62 = vld [vmem:[#allocation10 + $0xe8] sm:$0xf0] (%p1545_p8) }
 0x293   : >> { %1735 = vmatpush.bf16.msra.mxu0 %v3435_v50  ;;  %v4068_v50 = vld [vmem:[#allocation10 + $0x64] sm:$0xf] (%p1545_p8)  ;;  %v3534_v63 = vld [vmem:[#allocation10 + $0x50] sm:$0xf] (%p1545_p8)  ;;  %v3536_v3 = vld [vmem:[#allocation10 + $0x58] sm:$0xf0] (%p1545_p8) }
 0x294   : >> { %1749 = vmatpush.bf16.msra.mxu1 %v3427_v55  ;;  %v3544_v55 = vld [vmem:[#allocation10 + $0x68] sm:$0xf0] (%p1545_p8)  ;;  %2055 = vmatpush.bf16.msra.mxu3 (%p1545_p8), %v3619_v45  ;;  %v3598_v4 = vld [vmem:[#allocation10 + $0xd0] sm:$0xf] (%p1545_p8)  ;;  %v4083_v6 = vld [vmem:[#allocation10 + $0xd4] sm:$0xf0] (%p1545_p8) }
 0x295   : >> { %1763 = vmatpush.bf16.msra.mxu2 %v3431_v58  ;;  %v3547_v57 = vor.u32 (%p1545_p8), %v4068_v50, %v3544_v55  ;;  %v3606_v58 = vld [vmem:[#allocation10 + $0xe0] sm:$0xf] (%p1545_p8)  ;;  %v4082_v7 = vld [vmem:[#allocation10 + $0xd4] sm:$0xf] (%p1545_p8)  ;;  %v3600_v8 = vld [vmem:[#allocation10 + $0xd8] sm:$0xf0] (%p1545_p8)  ;;  %v3599_v10 = vor.u32 (%p1545_p8), %v4083_v6, %v3598_v4 }
 0x296   : > { %v3607_v61 = vor.u32 (%p1545_p8), %v4085_v59, %v3606_v58  ;;  %v4064_v14 = vld [vmem:[#allocation10 + $0x44] sm:$0xf] (%p1545_p8)  ;;  %v3603_v15 = vor.u32 (%p1545_p8), %v4082_v7, %v3600_v8  ;;  %v3590_v17 = vld [vmem:[#allocation10 + $0xc0] sm:$0xf] (%p1545_p8)  ;;  %v4061_v41 = vld [vmem:[#allocation10 + $0x24] sm:$0xf0] (%p1545_p8) }
 0x297   : >> { %1736 = vmatpush.bf16.msra.mxu0 %v3423_v1  ;;  %v3611_v1 = vor.u32 (%p1545_p8), %v4084_v60, %v3608_v62  ;;  %v3510_v40 = vld [vmem:[#allocation10 + $0x20] sm:$0xf] (%p1545_p8)  ;;  %v4060_v42 = vld [vmem:[#allocation10 + $0x24] sm:$0xf] (%p1545_p8)  ;;  %v3512_v44 = vld [vmem:[#allocation10 + $0x28] sm:$0xf0] (%p1545_p8) }
 0x298   : >> { %1750 = vmatpush.bf16.msra.mxu1 %v3415_v2  ;;  %v4066_v2 = vld [vmem:[#allocation10 + $0x54] sm:$0xf] (%p1545_p8)  ;;  %v3574_v43 = vld [vmem:[#allocation10 + $0xa0] sm:$0xf] (%p1545_p8)  ;;  %v4077_v46 = vld [vmem:[#allocation10 + $0xa4] sm:$0xf0] (%p1545_p8)  ;;  %v3515_v53 = vor.u32 (%p1545_p8), %v4060_v42, %v3512_v44 }
 0x299   : >> { %1764 = vmatpush.bf16.msra.mxu2 %v3419_v5  ;;  %v3539_v9 = vor.u32 (%p1545_p8), %v4066_v2, %v3536_v3  ;;  %2056 = vmatpush.bf16.msra.mxu3 (%p1545_p8), %v3611_v1  ;;  %v3502_v49 = vld [vmem:[#allocation10 + $0x10] sm:$0xf] (%p1545_p8)  ;;  %v4059_v52 = vld [vmem:[#allocation10 + $0x14] sm:$0xf0] (%p1545_p8)  ;;  %v3575_v45 = vor.u32 (%p1545_p8), %v4077_v46, %v3574_v43  ;;  %v4058_v54 = vld [vmem:[#allocation10 + $0x14] sm:$0xf] (%p1545_p8) }
 0x29a   : > { %v3504_v50 = vld [vmem:[#allocation10 + $0x18] sm:$0xf0] (%p1545_p8)  ;;  %v3566_v55 = vld [vmem:[#allocation10 + $0x90] sm:$0xf] (%p1545_p8)  ;;  %v4074_v59 = vld [vmem:[#allocation10 + $0x94] sm:$0xf] (%p1545_p8) }
 0x29b   : >> { %1737 = vmatpush.bf16.msra.mxu0 %v3411_v11  ;;  %v3526_v11 = vld [vmem:[#allocation10 + $0x40] sm:$0xf] (%p1545_p8)  ;;  %v3568_v60 = vld [vmem:[#allocation10 + $0x98] sm:$0xf0] (%p1545_p8)  ;;  %v4057_v2 = vld [vmem:[#allocation10 + $0x4] sm:$0xf0] (%p1545_p8) }
 0x29c   : >> { %1751 = vmatpush.bf16.msra.mxu1 %v3403_v13  ;;  %v4065_v13 = vld [vmem:[#allocation10 + $0x44] sm:$0xf0] (%p1545_p8)  ;;  %v3494_v1 = vld [vmem:[#allocation10] sm:$0xf] (%p1545_p8)  ;;  %v4056_v3 = vld [vmem:[#allocation10 + $0x4] sm:$0xf] (%p1545_p8) }
 0x29d   : >> { %1765 = vmatpush.bf16.msra.mxu2 %v3407_v16  ;;  %v3528_v16 = vld [vmem:[#allocation10 + $0x48] sm:$0xf0] (%p1545_p8)  ;;  %2057 = vmatpush.bf16.msra.mxu3 (%p1545_p8), %v3603_v15  ;;  %v3558_v7 = vld [vmem:[#allocation10 + $0x80] sm:$0xf] (%p1545_p8)  ;;  %v4073_v8 = vld [vmem:[#allocation10 + $0x84] sm:$0xf0] (%p1545_p8) }
 0x29e   : > { %v3496_v6 = vld [vmem:[#allocation10 + $0x8] sm:$0xf0] (%p1545_p8)  ;;  %v3559_v15 = vor.u32 (%p1545_p8), %v4073_v8, %v3558_v7 }
 0x29f   : >> { %1752 = vmatmul.bf16.vlgmr.msra.gmra.mxu1 %v1602_v19  ;;  %1738 = vmatpush.bf16.msra.mxu0 %v3399_v18  ;;  %v4081_v18 = vld [vmem:[#allocation10 + $0xc4] sm:$0xf0] (%p1545_p8) }
 0x2a0   : >> { %1766 = vmatmul.bf16.vlgmr.msra.gmra.mxu2 %v1602_v19  ;;  %1932 = vmatpush.bf16.msra.mxu1 (%p1545_p8), %v3555_v47 }
 0x2a1   : > { %2042 = vmatpush.bf16.msra.mxu2 (%p1545_p8), %v3615_v48  ;;  %v3576_v48 = vld [vmem:[#allocation10 + $0xa8] sm:$0xf0] (%p1545_p8) }
 0x2a2   : >> { %1739 = vmatmul.bf16.vlgmr.msra.gmra.mxu0 %v1602_v19  ;;  %v4080_v19 = vld [vmem:[#allocation10 + $0xc4] sm:$0xf] (%p1545_p8) }
 0x2a3   : > { %1919 = vmatpush.bf16.msra.mxu0 (%p1545_p8), %v3551_v37 }
 0x2a4   : > { %1933 = vmatpush.bf16.msra.mxu1 (%p1545_p8), %v3547_v57  ;;  %v4075_v57 = vld [vmem:[#allocation10 + $0x94] sm:$0xf0] (%p1545_p8) }
 0x2a5   : > { %2043 = vmatpush.bf16.msra.mxu2 (%p1545_p8), %v3607_v61  ;;  %v3503_v61 = vor.u32 (%p1545_p8), %v4059_v52, %v3502_v49 }
 0x2a7   : > { %1920 = vmatpush.bf16.msra.mxu0 (%p1545_p8), %v3543_v56 }
 0x2a8   : > { %1934 = vmatpush.bf16.msra.mxu1 (%p1545_p8), %v3539_v9  ;;  %v4072_v9 = vld [vmem:[#allocation10 + $0x84] sm:$0xf] (%p1545_p8) }
 0x2a9   : > { %2044 = vmatpush.bf16.msra.mxu2 (%p1545_p8), %v3599_v10  ;;  %v3560_v10 = vld [vmem:[#allocation10 + $0x88] sm:$0xf0] (%p1545_p8) }
 0x31c   : >> { %v1753_v20 = vpop.f32.mrf.mxu1 }
 0x31d   : >> { %v1774_v26 = vrot.slane %v1753_v20, 1  ;;  %v3592_v20 = vld [vmem:[#allocation10 + $0xc8] sm:$0xf0] (%p1545_p8) }
 0x31f   : >> { %v1740_v21 = vpop.f32.mrf.mxu0 }
 0x323   : >> { %v1767_v22 = vpop.f32.mrf.mxu2 }
 0x324   : >> { %v1755_v23 = vpop.f32.mrf.mxu1  ;;  %v1781_v29 = vrot.slane %v1767_v22, 2  ;;  %v3531_v22 = vor.u32 (%p1545_p8), %v4064_v14, %v3528_v16  ;;  %v3499_v14 = vor.u32 (%p1545_p8), %v4056_v3, %v3496_v6  ;;  %v3563_v16 = vor.u32 (%p1545_p8), %v4072_v9, %v3560_v10 }
 0x325   : >> { %v1775_v24 = vrot.slane %v1755_v23, 1  ;;  %v3591_v23 = vor.u32 (%p1545_p8), %v4081_v18, %v3590_v17 }
 0x326   : > { %1935 = vmatpush.bf16.msra.mxu1 (%p1545_p8), %v3531_v22 }
 0x327   : >> { %v1742_v25 = vpop.f32.mrf.mxu0  ;;  %v1776_v27 = vsel %vm917_vm3, %v1774_v26, %v1775_v24  ;;  %v3518_v24 = vld [vmem:[#allocation10 + $0x30] sm:$0xf] (%p1545_p8)  ;;  %v4062_v26 = vld [vmem:[#allocation10 + $0x34] sm:$0xf] (%p1545_p8)  ;;  %2045 = vmatpush.bf16.msra.mxu2 (%p1545_p8), %v3591_v23 }
 0x328   : >> { %v1778_v31 = vadd.f32 %v1776_v27, %v1740_v21  ;;  %v3527_v21 = vor.u32 (%p1545_p8), %v4065_v13, %v3526_v11  ;;  %v4063_v25 = vld [vmem:[#allocation10 + $0x34] sm:$0xf0] (%p1545_p8)  ;;  %v3595_v27 = vor.u32 (%p1545_p8), %v4080_v19, %v3592_v20  ;;  %v3495_v13 = vor.u32 (%p1545_p8), %v4057_v2, %v3494_v1 }
 0x32a   : > { %2058 = vmatpush.bf16.msra.mxu3 (%p1545_p8), %v3595_v27 }
 0x32b   : >> { %v1769_v28 = vpop.f32.mrf.mxu2 }
 0x32c   : >> { %v1782_v30 = vrot.slane %v1769_v28, 2  ;;  %v3520_v28 = vld [vmem:[#allocation10 + $0x38] sm:$0xf0] (%p1545_p8) }
 0x32e   : >> { %v1783_v33 = vsel %vm930_vm4, %v1781_v29, %v1782_v30  ;;  %v3582_v29 = vld [vmem:[#allocation10 + $0xb0] sm:$0xf] (%p1545_p8)  ;;  %v4079_v30 = vld [vmem:[#allocation10 + $0xb4] sm:$0xf0] (%p1545_p8)  ;;  %vm1819_vm4 = vcmask (%p1545_p8), 1041408  }
 0x32f   : >> { %v1785_v34 = vadd.f32 %v1783_v33, %v1778_v31  ;;  %v4078_v33 = vld [vmem:[#allocation10 + $0xb4] sm:$0xf] (%p1545_p8) }
 0x331   : >> { %v1789_v35 = vadd.f32 %v4354_v32, %v1785_v34  ;;  %v1795_v32 = vunpack.c.l.bf16 (%p1545_p8), %v5039_v0  ;;  %v3584_v34 = vld [vmem:[#allocation10 + $0xb8] sm:$0xf0] (%p1545_p8)  ;;  %v3511_v0 = vor.u32 (%p1545_p8), %v4061_v41, %v3510_v40 }
 0x332   : > { %v3587_v37 = vor.u32 (%p1545_p8), %v4078_v33, %v3584_v34 }
 0x333   : >> { %vm1790_vm1 = vcmp.ge.f32.partialorder %v1789_v35, 0.0  ;;  %v1791_v36 = vmul.f32 0.2, %v1789_v35 }
 0x334   : > { %2059 = vmatpush.bf16.msra.mxu3 (%p1545_p8), %v3587_v37 }
 0x335   : >> { %v1792_v38 = vsel %vm1790_vm1, %v1789_v35, %v1791_v36  ;;  %1547 = sbr.rel (!%p1545_p8) target bundleno = 634 (0x27a), region = 202  ;;  %v3519_v35 = vor.u32 (%p1545_p8), %v4063_v25, %v3518_v24  ;;  %v3523_v36 = vor.u32 (%p1545_p8), %v4062_v26, %v3520_v28 }
 0x336   : >> { %v5109_v51 = vpack.c.bf16 %v1792_v38, %v1792_v38   ;;  %v3583_v38 = vor.u32 (%p1545_p8), %v4079_v30, %v3582_v29 }
 0x337   : > { %1936 = vmatpush.bf16.msra.mxu1 (%p1545_p8), %v3523_v36  ;;  %v4355_v36 = vld [vmem:[%s5304_s10] ss:$0 sm:$0xff] (%p1545_p8) }
 0x338   : >> { %v5339_v39 = vmov %v5109_v51  ;;  %2046 = vmatpush.bf16.msra.mxu2 (%p1545_p8), %v3583_v38 }
 0x339   : >> { %v5340_v51 = vmov %v5339_v39  ;;  %v1794_v31 = vunpack.c.l.bf16 (%p1545_p8), %v5339_v39  ;;  %v4076_v39 = vld [vmem:[#allocation10 + $0xa4] sm:$0xf] (%p1545_p8) }
 0x33a   : > { %v4067_v51 = vld [vmem:[#allocation10 + $0x54] sm:$0xf0]  ;;  %v3579_v56 = vor.u32 %v4076_v39, %v3576_v48 }
 0x33b   : > { %v3535_v5 = vor.u32 %v4067_v51, %v3534_v63  ;;  %v1796_v47 = vadd.f32 %v1795_v32, %v1794_v31  ;;  %1937 = vmatpush.bf16.msra.mxu1 %v3515_v53  ;;  %v3507_v63 = vor.u32 %v4058_v54, %v3504_v50  ;;  %v3567_v51 = vor.u32 %v4075_v57, %v3566_v55 }
 0x33c   : > { %2047 = vmatpush.bf16.msra.mxu2 %v3575_v45  ;;  %2060 = vmatpush.bf16.msra.mxu3 %v3579_v56 }
 0x33d   : > { %1921 = vmatpush.bf16.msra.mxu0 %v3535_v5  ;;  %vm1797_vm3 = vcmp.ge.f32.partialorder %v1796_v47, 0.0  ;;  %v1798_v58 = vmul.f32 0.2, %v1796_v47  ;;  %v3571_v5 = vor.u32 %v4074_v59, %v3568_v60 }
 0x33f   : > { %v1799_v62 = vsel %vm1797_vm3, %v1796_v47, %v1798_v58  ;;  %1938 = vmatpush.bf16.msra.mxu1 %v3507_v63 }
 0x340   : > { %v1800_v4 = vpack.c.bf16 %v1799_v62, %v1799_v62  ;;  %2048 = vmatpush.bf16.msra.mxu2 %v3567_v51  ;;  %2061 = vmatpush.bf16.msra.mxu3 %v3571_v5 }
 0x341   : > { %1922 = vmatpush.bf16.msra.mxu0 %v3527_v21 }
 0x342   : > { %v1801_v11 = vunpack.c.l.bf16 %v1800_v4 }
 0x343   : > { %1939 = vmatpush.bf16.msra.mxu1 %v3499_v14 }
 0x344   : > { %1802 = vst [vmem:[#allocation2] sm:$0xff] %v1801_v11  ;;  %2049 = vmatpush.bf16.msra.mxu2 %v3559_v15  ;;  %2062 = vmatpush.bf16.msra.mxu3 %v3563_v16 }
 0x345   : > { %1923 = vmatpush.bf16.msra.mxu0 %v3519_v35 }
 0x349   : > { %1924 = vmatpush.bf16.msra.mxu0 %v3511_v0 }
 0x34b   : > { %v1805_v17 = vld [vmem:[#allocation2 + $0x1] ss:$2 sm:$0xf]  ;;  %v1803_v18 = vld [vmem:[#allocation2] ss:$2 sm:$0xf] }
 0x34c   : > { %v1806_v19 = vpack.c.bf16 %v1805_v17, %v1805_v17  ;;  %v1804_v20 = vpack.c.bf16 %v1803_v18, %v1803_v18 }
 0x34d   : > { %1925 = vmatpush.bf16.msra.mxu0 %v3503_v61 }
 0x34e   : > { %v1808_v21 = vunpack.c.l.b16 %v1806_v19  ;;  %3620 = vmatmul.msk.bf16.vlgmr.msra.gmra.mxu2 %vm1819_vm4, %v1804_v20  ;;  %3621 = vmatmul.msk.bf16.vlgmr.msra.gmra.mxu3 %vm1819_vm4, %v1804_v20 }
 0x350   : > { %v1809_v22 = vpack.c.b16 %v1808_v21, %v1808_v21 }
 0x351   : > { %1926 = vmatpush.bf16.msra.mxu0 %v3495_v13 }
 0x352   : > { %v1811_v23 = vshrl.u32 %v1809_v22, 16  ;;  %v1814_v24 = vshll.u32 %v1809_v22, 16 }
 0x354   : > { %v1813_v25 = vrot.slane %v1811_v23, 7 }
 0x356   : > { %v1816_v26 = vor.u32 %v1814_v24, %v1813_v25 }
 0x358   : > { %v1818_v27 = vsel %vm4914_vm2, 0, %v1816_v26 }
 0x359   : > { %1927 = vmatmul.bf16.vlgmr.msra.gmra.mxu0 %v1818_v27  ;;  %1940 = vmatmul.bf16.vlgmr.msra.gmra.mxu1 %v1818_v27 }
 0x3d1   : > { %v2051_v28 = vpop.f32.mrf.mxu2  ;;  %v2064_v29 = vpop.f32.mrf.mxu3 }
 0x3d2   : > { %v2074_v34 = vrot.slane %v2064_v29, 1 }
 0x3d6   : > { %v1928_v30 = vpop.f32.mrf.mxu0  ;;  %v1941_v31 = vpop.f32.mrf.mxu1 }
 0x3d7   : > { %v2070_v32 = vrot.slane %v1941_v31, 1  ;;  %v2068_v33 = vadd.f32 %v2051_v28, %v1928_v30 }
 0x3d9   : > { %v2072_v35 = vadd.f32 %v2070_v32, %v2068_v33  ;;  %v2053_v38 = vpop.f32.mrf.mxu2  ;;  %v2066_v40 = vpop.f32.mrf.mxu3 }
 0x3db   : > { %v2076_v41 = vadd.f32 %v2074_v34, %v2072_v35 }
 0x3dd   : > { %v2081_v42 = vadd.f32 %v4355_v36, %v2076_v41 }
 0x3de   : > { %v1930_v37 = vpop.f32.mrf.mxu0  ;;  %v1943_v44 = vpop.f32.mrf.mxu1 }
 0x3df   : > { %vm2082_vm5 = vcmp.ge.f32.partialorder %v2081_v42, 0.0  ;;  %v2083_v43 = vmul.f32 0.2, %v2081_v42 }
 0x3e1   : > { %v2084_v46 = vsel %vm2082_vm5, %v2081_v42, %v2083_v43 }
 0x3e2   : > { %v5126_v47 = vpack.c.bf16 %v2084_v46, %v2084_v46  }
 0x3e4   : > { %v5341_v39 = vmov %v5126_v47 }
 0x3e5 LB: >> { %s4088_s7 = smul.u32 192, %s4689_s18  ;;  %v2131_v14 = vunpack.c.l.b16 %v4685_v39  ;;  %vm2142_vm6 = vcmask 1042432   ;;  %vm2143_vm7 = vsmask.f32 2304  ;;  %s2128_s19 = scalar_lea.vmem %s5306_s12, %s4689_s18  ;;  %s4689_s18 = sphi %s5131_s18, %s2091_s18   ;;  %v4685_v39 = vphi %v5341_v39, %v5343_v39  }
 0x3e6   : >> { %vm2144_vm8 = vmand %vm2142_vm6, %vm2143_vm7  ;;  %s2091_s18 = sadd.s32 1, %s4689_s18  }
 0x3e7   : >> { %s5138_s22 = scalar_lea.vmem [#allocation11], %s4088_s7  ;;  %v2132_v24 = vpack.c.b16 %v2131_v14, %v2131_v14  ;;  %p2088_p9 = scmp.ge.s32.totalorder %s2091_s18, 2  }
 0x3e8   : >> { %v3709_v48 = vld [vmem:[%s5138_s22 + $0xa8] sm:$0xf]  ;;  %v4111_v0 = vld [vmem:[%s5138_s22 + $0xb0] sm:$0xf0]  ;;  %v4110_v49 = vld [vmem:[%s5138_s22 + $0xac] sm:$0xf] }
 0x3e9   : >> { %v3710_v52 = vor.u32 %v4111_v0, %v3709_v48  ;;  %v3711_v53 = vld [vmem:[%s5138_s22 + $0xb4] sm:$0xf0]  ;;  %v3717_v45 = vld [vmem:[%s5138_s22 + $0xb0] sm:$0xf]  ;;  %v4112_v54 = vld [vmem:[%s5138_s22 + $0xb8] sm:$0xf0] }
 0x3ea   : >> { %v3714_v50 = vor.u32 %v4110_v49, %v3711_v53  ;;  %v3718_v55 = vor.u32 %v4112_v54, %v3717_v45  ;;  %v3697_v56 = vld [vmem:[%s5138_s22 + $0x90] sm:$0xf]  ;;  %v4108_v57 = vld [vmem:[%s5138_s22 + $0x98] sm:$0xf0]  ;;  %v4107_v58 = vld [vmem:[%s5138_s22 + $0x94] sm:$0xf] }
 0x3eb   : >> { %2274 = vmatpush.bf16.msra.mxu0 %v3710_v52  ;;  %v3698_v59 = vor.u32 %v4108_v57, %v3697_v56  ;;  %v3699_v60 = vld [vmem:[%s5138_s22 + $0x9c] sm:$0xf0]  ;;  %v3705_v61 = vld [vmem:[%s5138_s22 + $0x98] sm:$0xf]  ;;  %v4109_v62 = vld [vmem:[%s5138_s22 + $0xa0] sm:$0xf0] }
 0x3ec   : >> { %2287 = vmatpush.bf16.msra.mxu1 %v3714_v50  ;;  %2300 = vmatpush.bf16.msra.mxu2 %v3718_v55  ;;  %v3702_v63 = vor.u32 %v4107_v58, %v3699_v60  ;;  %v3706_v51 = vor.u32 %v4109_v62, %v3705_v61  ;;  %v3685_v1 = vld [vmem:[%s5138_s22 + $0x78] sm:$0xf]  ;;  %v4105_v2 = vld [vmem:[%s5138_s22 + $0x80] sm:$0xf0]  ;;  %v4104_v3 = vld [vmem:[%s5138_s22 + $0x7c] sm:$0xf] }
 0x3ed   : >> { %v3687_v4 = vld [vmem:[%s5138_s22 + $0x84] sm:$0xf0]  ;;  %v3693_v5 = vld [vmem:[%s5138_s22 + $0x80] sm:$0xf]  ;;  %v4106_v6 = vld [vmem:[%s5138_s22 + $0x88] sm:$0xf0]  ;;  %v3686_v7 = vor.u32 %v4105_v2, %v3685_v1 }
 0x3ee   : >> { %v3690_v8 = vor.u32 %v4104_v3, %v3687_v4  ;;  %v3694_v9 = vor.u32 %v4106_v6, %v3693_v5  ;;  %v3673_v10 = vld [vmem:[%s5138_s22 + $0x60] sm:$0xf]  ;;  %v4102_v11 = vld [vmem:[%s5138_s22 + $0x68] sm:$0xf0]  ;;  %v4101_v13 = vld [vmem:[%s5138_s22 + $0x64] sm:$0xf] }
 0x3ef   : >> { %2275 = vmatpush.bf16.msra.mxu0 %v3698_v59  ;;  %v3675_v15 = vld [vmem:[%s5138_s22 + $0x6c] sm:$0xf0]  ;;  %v3681_v16 = vld [vmem:[%s5138_s22 + $0x68] sm:$0xf]  ;;  %v4103_v17 = vld [vmem:[%s5138_s22 + $0x70] sm:$0xf0]  ;;  %v3674_v18 = vor.u32 %v4102_v11, %v3673_v10 }
 0x3f0   : >> { %2288 = vmatpush.bf16.msra.mxu1 %v3702_v63  ;;  %2301 = vmatpush.bf16.msra.mxu2 %v3706_v51  ;;  %v3678_v19 = vor.u32 %v4101_v13, %v3675_v15  ;;  %v3682_v20 = vor.u32 %v4103_v17, %v3681_v16  ;;  %v3661_v21 = vld [vmem:[%s5138_s22 + $0x48] sm:$0xf]  ;;  %v4099_v22 = vld [vmem:[%s5138_s22 + $0x50] sm:$0xf0]  ;;  %v4098_v23 = vld [vmem:[%s5138_s22 + $0x4c] sm:$0xf] }
 0x3f1   : >> { %v3663_v25 = vld [vmem:[%s5138_s22 + $0x54] sm:$0xf0]  ;;  %v3669_v26 = vld [vmem:[%s5138_s22 + $0x50] sm:$0xf]  ;;  %v4100_v27 = vld [vmem:[%s5138_s22 + $0x58] sm:$0xf0]  ;;  %v3662_v28 = vor.u32 %v4099_v22, %v3661_v21 }
 0x3f2   : >> { %v3649_v29 = vld [vmem:[%s5138_s22 + $0x30] sm:$0xf]  ;;  %v3666_v30 = vor.u32 %v4098_v23, %v3663_v25  ;;  %v3670_v31 = vor.u32 %v4100_v27, %v3669_v26  ;;  %v4096_v32 = vld [vmem:[%s5138_s22 + $0x38] sm:$0xf0]  ;;  %v4095_v33 = vld [vmem:[%s5138_s22 + $0x34] sm:$0xf] }
 0x3f3   : >> { %2276 = vmatpush.bf16.msra.mxu0 %v3686_v7  ;;  %v2134_v34 = vshrl.u32 %v2132_v24, 16  ;;  %v3651_v35 = vld [vmem:[%s5138_s22 + $0x3c] sm:$0xf0]  ;;  %v3657_v36 = vld [vmem:[%s5138_s22 + $0x38] sm:$0xf]  ;;  %v3650_v40 = vor.u32 %v4096_v32, %v3649_v29  ;;  %v2137_v39 = vshll.u32 %v2132_v24, 16 }
 0x3f4   : >> { %2289 = vmatpush.bf16.msra.mxu1 %v3690_v8  ;;  %2302 = vmatpush.bf16.msra.mxu2 %v3694_v9  ;;  %v4097_v38 = vld [vmem:[%s5138_s22 + $0x40] sm:$0xf0]  ;;  %v3637_v41 = vld [vmem:[%s5138_s22 + $0x18] sm:$0xf]  ;;  %v3654_v42 = vor.u32 %v4095_v33, %v3651_v35  ;;  %v4092_v43 = vld [vmem:[%s5138_s22 + $0x1c] sm:$0xf] }
 0x3f5   : >> { %v3658_v37 = vor.u32 %v4097_v38, %v3657_v36  ;;  %v4093_v44 = vld [vmem:[%s5138_s22 + $0x20] sm:$0xf0]  ;;  %v2136_v46 = vrot.slane %v2134_v34, 7  ;;  %v3639_v48 = vld [vmem:[%s5138_s22 + $0x24] sm:$0xf0]  ;;  %s5216_s5 = smov (%p2088_p9), 0  }
 0x3f6   : >> { %v3645_v0 = vld [vmem:[%s5138_s22 + $0x20] sm:$0xf]  ;;  %v4094_v49 = vld [vmem:[%s5138_s22 + $0x28] sm:$0xf0]  ;;  %v3638_v52 = vor.u32 %v4093_v44, %v3637_v41  ;;  %v3642_v54 = vor.u32 %v4092_v43, %v3639_v48  ;;  %v4089_v55 = vld [vmem:[%s5138_s22 + $0x4] sm:$0xf] }
 0x3f7   : >> { %2277 = vmatpush.bf16.msra.mxu0 %v3674_v18  ;;  %v3625_v53 = vld [vmem:[%s5138_s22] sm:$0xf]  ;;  %v4090_v45 = vld [vmem:[%s5138_s22 + $0x8] sm:$0xf0]  ;;  %v3646_v50 = vor.u32 %v4094_v49, %v3645_v0  ;;  %v3627_v56 = vld [vmem:[%s5138_s22 + $0xc] sm:$0xf0]  ;;  %v2139_v58 = vor.u32 %v2137_v39, %v2136_v46 }
 0x3f8   : >> { %2290 = vmatpush.bf16.msra.mxu1 %v3678_v19  ;;  %2303 = vmatpush.bf16.msra.mxu2 %v3682_v20  ;;  %v3633_v57 = vld [vmem:[%s5138_s22 + $0x8] sm:$0xf]  ;;  %v4091_v59 = vld [vmem:[%s5138_s22 + $0x10] sm:$0xf0]  ;;  %v3626_v60 = vor.u32 %v4090_v45, %v3625_v53  ;;  %v3630_v61 = vor.u32 %v4089_v55, %v3627_v56  ;;  %v4356_v7 = vld [vmem:[%s2128_s19] ss:$0 sm:$0xff] }
 0x3f9   : >> { %v3634_v62 = vor.u32 %v4091_v59, %v3633_v57  ;;  %v2141_v63 = vsel %vm4914_vm2, 0, %v2139_v58  ;;  %v3777_v17 = vld [vmem:[#allocation13 + $0x70] sm:$0xf] (%p2088_p9)  ;;  %v4128_v18 = vld [vmem:[#allocation13 + $0x74] sm:$0xf0] (%p2088_p9) }
 0x3fa   : >> { %v2145_v51 = vsel %vm2144_vm8, %v2141_v63, 0  ;;  %v4127_v19 = vld [vmem:[#allocation13 + $0x74] sm:$0xf] (%p2088_p9)  ;;  %v3778_v20 = vor.u32 (%p2088_p9), %v4128_v18, %v3777_v17  ;;  %v3779_v21 = vld [vmem:[#allocation13 + $0x78] sm:$0xf0] (%p2088_p9) }
 0x3fb   : >> { %2278 = vmatpush.bf16.msra.mxu0 %v3662_v28  ;;  %v3841_v22 = vld [vmem:[#allocation13 + $0xf0] sm:$0xf] (%p2088_p9)  ;;  %v4144_v23 = vld [vmem:[#allocation13 + $0xf4] sm:$0xf0] (%p2088_p9)  ;;  %v3782_v24 = vor.u32 (%p2088_p9), %v4127_v19, %v3779_v21  ;;  %v4143_v26 = vld [vmem:[#allocation13 + $0xf4] sm:$0xf] (%p2088_p9) }
 0x3fc   : >> { %2291 = vmatpush.bf16.msra.mxu1 %v3666_v30  ;;  %2304 = vmatpush.bf16.msra.mxu2 %v3670_v31  ;;  %v3842_v25 = vor.u32 (%p2088_p9), %v4144_v23, %v3841_v22  ;;  %v3843_v27 = vld [vmem:[#allocation13 + $0xf8] sm:$0xf0] (%p2088_p9)  ;;  %v3769_v28 = vld [vmem:[#allocation13 + $0x60] sm:$0xf] (%p2088_p9)  ;;  %v4126_v30 = vld [vmem:[#allocation13 + $0x64] sm:$0xf0] (%p2088_p9) }
 0x3fd   : > { %v3846_v29 = vor.u32 (%p2088_p9), %v4143_v26, %v3843_v27  ;;  %v4125_v31 = vld [vmem:[#allocation13 + $0x64] sm:$0xf] (%p2088_p9)  ;;  %v3771_v32 = vld [vmem:[#allocation13 + $0x68] sm:$0xf0] (%p2088_p9)  ;;  %v3770_v33 = vor.u32 (%p2088_p9), %v4126_v30, %v3769_v28  ;;  %v3833_v35 = vld [vmem:[#allocation13 + $0xe0] sm:$0xf] (%p2088_p9) }
 0x3fe   : > { %v3774_v34 = vor.u32 (%p2088_p9), %v4125_v31, %v3771_v32  ;;  %v4142_v36 = vld [vmem:[#allocation13 + $0xe4] sm:$0xf0] (%p2088_p9)  ;;  %v4141_v38 = vld [vmem:[#allocation13 + $0xe4] sm:$0xf] (%p2088_p9)  ;;  %v3835_v41 = vld [vmem:[#allocation13 + $0xe8] sm:$0xf0] (%p2088_p9) }
 0x3ff   : >> { %2279 = vmatpush.bf16.msra.mxu0 %v3650_v40  ;;  %2590 = vmatpush.bf16.msra.mxu3 (%p2088_p9), %v3846_v29  ;;  %v3834_v40 = vor.u32 (%p2088_p9), %v4142_v36, %v3833_v35  ;;  %v3838_v44 = vor.u32 (%p2088_p9), %v4141_v38, %v3835_v41  ;;  %v4123_v43 = vld [vmem:[#allocation13 + $0x54] sm:$0xf] (%p2088_p9)  ;;  %v3763_v46 = vld [vmem:[#allocation13 + $0x58] sm:$0xf0] (%p2088_p9)  ;;  %v4140_v0 = vld [vmem:[#allocation13 + $0xd4] sm:$0xf0] (%p2088_p9) }
 0x400   : >> { %2292 = vmatpush.bf16.msra.mxu1 %v3654_v42  ;;  %2305 = vmatpush.bf16.msra.mxu2 %v3658_v37  ;;  %v3761_v42 = vld [vmem:[#allocation13 + $0x50] sm:$0xf] (%p2088_p9)  ;;  %v4124_v37 = vld [vmem:[#allocation13 + $0x54] sm:$0xf0] (%p2088_p9)  ;;  %v4139_v49 = vld [vmem:[#allocation13 + $0xd4] sm:$0xf] (%p2088_p9)  ;;  %v3766_v53 = vor.u32 (%p2088_p9), %v4123_v43, %v3763_v46 }
 0x401   : > { %v3762_v48 = vor.u32 (%p2088_p9), %v4124_v37, %v3761_v42  ;;  %v4121_v55 = vld [vmem:[#allocation13 + $0x44] sm:$0xf] (%p2088_p9)  ;;  %v3755_v57 = vld [vmem:[#allocation13 + $0x48] sm:$0xf0] (%p2088_p9)  ;;  %v3817_v58 = vld [vmem:[#allocation13 + $0xc0] sm:$0xf] (%p2088_p9) }
 0x402   : > { %v4138_v59 = vld [vmem:[#allocation13 + $0xc4] sm:$0xf0] (%p2088_p9)  ;;  %v3758_v63 = vor.u32 (%p2088_p9), %v4121_v55, %v3755_v57  ;;  %v3737_v17 = vld [vmem:[#allocation13 + $0x20] sm:$0xf] (%p2088_p9)  ;;  %v4117_v19 = vld [vmem:[#allocation13 + $0x24] sm:$0xf] (%p2088_p9) }
 0x403   : >> { %2280 = vmatpush.bf16.msra.mxu0 %v3638_v52  ;;  %v3827_v52 = vld [vmem:[#allocation13 + $0xd8] sm:$0xf0] (%p2088_p9)  ;;  %2591 = vmatpush.bf16.msra.mxu3 (%p2088_p9), %v3838_v44  ;;  %v4118_v18 = vld [vmem:[#allocation13 + $0x24] sm:$0xf0] (%p2088_p9)  ;;  %v3739_v21 = vld [vmem:[#allocation13 + $0x28] sm:$0xf0] (%p2088_p9) }
 0x404   : >> { %2293 = vmatpush.bf16.msra.mxu1 %v3642_v54  ;;  %2306 = vmatpush.bf16.msra.mxu2 %v3646_v50  ;;  %v3753_v54 = vld [vmem:[#allocation13 + $0x40] sm:$0xf] (%p2088_p9)  ;;  %v4122_v50 = vld [vmem:[#allocation13 + $0x44] sm:$0xf0] (%p2088_p9)  ;;  %v3830_v56 = vor.u32 (%p2088_p9), %v4139_v49, %v3827_v52  ;;  %v3729_v26 = vld [vmem:[#allocation13 + $0x10] sm:$0xf] (%p2088_p9)  ;;  %v3742_v28 = vor.u32 (%p2088_p9), %v4117_v19, %v3739_v21 }
 0x405   : > { %v3801_v22 = vld [vmem:[#allocation13 + $0xa0] sm:$0xf] (%p2088_p9)  ;;  %v4134_v23 = vld [vmem:[#allocation13 + $0xa4] sm:$0xf0] (%p2088_p9)  ;;  %v4116_v27 = vld [vmem:[#allocation13 + $0x14] sm:$0xf0] (%p2088_p9) }
 0x406   : > { %v3802_v29 = vor.u32 (%p2088_p9), %v4134_v23, %v3801_v22  ;;  %v4115_v30 = vld [vmem:[#allocation13 + $0x14] sm:$0xf] (%p2088_p9)  ;;  %v3731_v31 = vld [vmem:[#allocation13 + $0x18] sm:$0xf0] (%p2088_p9)  ;;  %v3793_v32 = vld [vmem:[#allocation13 + $0x90] sm:$0xf] (%p2088_p9) }
 0x407   : >> { %2281 = vmatpush.bf16.msra.mxu0 %v3626_v60  ;;  %v4137_v60 = vld [vmem:[#allocation13 + $0xc4] sm:$0xf] (%p2088_p9)  ;;  %2592 = vmatpush.bf16.msra.mxu3 (%p2088_p9), %v3830_v56  ;;  %v4131_v36 = vld [vmem:[#allocation13 + $0x94] sm:$0xf] (%p2088_p9)  ;;  %v3795_v38 = vld [vmem:[#allocation13 + $0x98] sm:$0xf0] (%p2088_p9)  ;;  %v3734_v42 = vor.u32 (%p2088_p9), %v4115_v30, %v3731_v31 }
 0x408   : >> { %2294 = vmatpush.bf16.msra.mxu1 %v3630_v61  ;;  %2307 = vmatpush.bf16.msra.mxu2 %v3634_v62  ;;  %v3819_v61 = vld [vmem:[#allocation13 + $0xc8] sm:$0xf0] (%p2088_p9)  ;;  %v3754_v62 = vor.u32 (%p2088_p9), %v4122_v50, %v3753_v54  ;;  %v3721_v44 = vld [vmem:[#allocation13] sm:$0xf] (%p2088_p9)  ;;  %v4114_v43 = vld [vmem:[#allocation13 + $0x4] sm:$0xf0] (%p2088_p9) }
 0x409   : > { %v4113_v46 = vld [vmem:[#allocation13 + $0x4] sm:$0xf] (%p2088_p9)  ;;  %v3785_v49 = vld [vmem:[#allocation13 + $0x80] sm:$0xf] (%p2088_p9)  ;;  %v4130_v52 = vld [vmem:[#allocation13 + $0x84] sm:$0xf0] (%p2088_p9)  ;;  %v3722_v50 = vor.u32 (%p2088_p9), %v4114_v43, %v3721_v44 }
 0x40a   : >> { %2282 = vmatmul.bf16.vlgmr.msra.gmra.mxu0 %v2145_v51  ;;  %v3786_v56 = vor.u32 (%p2088_p9), %v4130_v52, %v3785_v49 }
 0x40b   : >> { %2295 = vmatmul.bf16.vlgmr.msra.gmra.mxu1 %v2145_v51  ;;  %2308 = vmatmul.bf16.vlgmr.msra.gmra.mxu2 %v2145_v51  ;;  %v3818_v51 = vor.u32 (%p2088_p9), %v4138_v59, %v3817_v58 }
 0x40c   : > { %2454 = vmatpush.bf16.msra.mxu0 (%p2088_p9), %v3778_v20  ;;  %2467 = vmatpush.bf16.msra.mxu1 (%p2088_p9), %v3782_v24 }
 0x40d   : > { %2577 = vmatpush.bf16.msra.mxu2 (%p2088_p9), %v3842_v25  ;;  %v3803_v25 = vld [vmem:[#allocation13 + $0xa8] sm:$0xf0] (%p2088_p9) }
 0x410   : > { %2455 = vmatpush.bf16.msra.mxu0 (%p2088_p9), %v3770_v33  ;;  %2468 = vmatpush.bf16.msra.mxu1 (%p2088_p9), %v3774_v34  ;;  %v4132_v34 = vld [vmem:[#allocation13 + $0x94] sm:$0xf0] (%p2088_p9) }
 0x411   : > { %2578 = vmatpush.bf16.msra.mxu2 (%p2088_p9), %v3834_v40  ;;  %v3730_v40 = vor.u32 (%p2088_p9), %v4116_v27, %v3729_v26  ;;  %v3794_v37 = vor.u32 (%p2088_p9), %v4132_v34, %v3793_v32 }
 0x414   : > { %2456 = vmatpush.bf16.msra.mxu0 (%p2088_p9), %v3762_v48  ;;  %2469 = vmatpush.bf16.msra.mxu1 (%p2088_p9), %v3766_v53  ;;  %v3798_v48 = vor.u32 (%p2088_p9), %v4131_v36, %v3795_v38  ;;  %v4129_v53 = vld [vmem:[#allocation13 + $0x84] sm:$0xf] (%p2088_p9) }
 0x418   : > { %2457 = vmatpush.bf16.msra.mxu0 (%p2088_p9), %v3754_v62  ;;  %2470 = vmatpush.bf16.msra.mxu1 (%p2088_p9), %v3758_v63 }
 0x487   : >> { %v2283_v1 = vpop.f32.mrf.mxu0 }
 0x488   : >> { %v2296_v2 = vpop.f32.mrf.mxu1 }
 0x489   : >> { %v2314_v3 = vrot.slane %v2296_v2, 1  ;;  %v4120_v2 = vld [vmem:[#allocation13 + $0x34] sm:$0xf0] (%p2088_p9) }
 0x48b   : >> { %v2316_v4 = vadd.f32 %v2314_v3, %v2283_v1  ;;  %v3745_v1 = vld [vmem:[#allocation13 + $0x30] sm:$0xf] (%p2088_p9)  ;;  %v4119_v3 = vld [vmem:[#allocation13 + $0x34] sm:$0xf] (%p2088_p9) }
 0x48e   : >> { %v2309_v5 = vpop.f32.mrf.mxu2 }
 0x48f   : >> { %v2318_v6 = vrot.slane %v2309_v5, 2  ;;  %v2285_v8 = vpop.f32.mrf.mxu0  ;;  %v3747_v5 = vld [vmem:[#allocation13 + $0x38] sm:$0xf0] (%p2088_p9) }
 0x490   : >> { %v2298_v9 = vpop.f32.mrf.mxu1 }
 0x491   : >> { %v2320_v10 = vadd.f32 %v2318_v6, %v2316_v4  ;;  %v3822_v4 = vor.u32 (%p2088_p9), %v4137_v60, %v3819_v61  ;;  %v3809_v6 = vld [vmem:[#allocation13 + $0xb0] sm:$0xf] (%p2088_p9)  ;;  %v2330_v9 = vunpack.c.l.bf16 (%p2088_p9), %v5126_v47  ;;  %v3738_v47 = vor.u32 (%p2088_p9), %v4118_v18, %v3737_v17 }
 0x493   : >> { %v2324_v11 = vadd.f32 %v4356_v7, %v2320_v10  ;;  %v4136_v7 = vld [vmem:[#allocation13 + $0xb4] sm:$0xf0] (%p2088_p9)  ;;  %v4135_v10 = vld [vmem:[#allocation13 + $0xb4] sm:$0xf] (%p2088_p9)  ;;  %2593 = vmatpush.bf16.msra.mxu3 (%p2088_p9), %v3822_v4 }
 0x495   : >> { %vm2325_vm9 = vcmp.ge.f32.partialorder %v2324_v11, 0.0  ;;  %v2326_v13 = vmul.f32 0.2, %v2324_v11 }
 0x496   : >> { %v2311_v14 = vpop.f32.mrf.mxu2 }
 0x497   : >> { %v2327_v15 = vsel %vm2325_vm9, %v2324_v11, %v2326_v13  ;;  %2090 = sbr.rel (!%p2088_p9) target bundleno = 997 (0x3e5), region = 213  ;;  %v3811_v11 = vld [vmem:[#allocation13 + $0xb8] sm:$0xf0] (%p2088_p9)  ;;  %v3746_v13 = vor.u32 (%p2088_p9), %v4120_v2, %v3745_v1  ;;  %v3750_v14 = vor.u32 (%p2088_p9), %v4119_v3, %v3747_v5 }
 0x498   : >> { %v5194_v39 = vpack.c.bf16 %v2327_v15, %v2327_v15   ;;  %v3810_v15 = vor.u32 (%p2088_p9), %v4136_v7, %v3809_v6  ;;  %v3814_v20 = vor.u32 (%p2088_p9), %v4135_v10, %v3811_v11 }
 0x499   : > { %2458 = vmatpush.bf16.msra.mxu0 (%p2088_p9), %v3746_v13  ;;  %2471 = vmatpush.bf16.msra.mxu1 (%p2088_p9), %v3750_v14  ;;  %v4357_v14 = vld [vmem:[%s5308_s14] ss:$0 sm:$0xff] (%p2088_p9) }
 0x49a   : >> { %v5342_v16 = vmov %v5194_v39  ;;  %2594 = vmatpush.bf16.msra.mxu3 (%p2088_p9), %v3814_v20 }
 0x49b   : >> { %v5343_v39 = vmov %v5342_v16  ;;  %v2329_v8 = vunpack.c.l.bf16 (%p2088_p9), %v5342_v16  ;;  %v4133_v16 = vld [vmem:[#allocation13 + $0xa4] sm:$0xf] (%p2088_p9) }
 0x49c   : > { %v3825_v39 = vld [vmem:[#allocation13 + $0xd0] sm:$0xf]  ;;  %v3806_v33 = vor.u32 %v4133_v16, %v3803_v25 }
 0x49d   : > { %v3826_v45 = vor.u32 %v4140_v0, %v3825_v39  ;;  %v2331_v24 = vadd.f32 %v2330_v9, %v2329_v8  ;;  %2459 = vmatpush.bf16.msra.mxu0 %v3738_v47  ;;  %2472 = vmatpush.bf16.msra.mxu1 %v3742_v28  ;;  %v3723_v0 = vld [vmem:[#allocation13 + $0x8] sm:$0xf0] }
 0x49e   : > { %2595 = vmatpush.bf16.msra.mxu3 %v3806_v33  ;;  %v3726_v55 = vor.u32 %v4113_v46, %v3723_v0 }
 0x49f   : > { %2579 = vmatpush.bf16.msra.mxu2 %v3826_v45  ;;  %vm2332_vm10 = vcmp.ge.f32.partialorder %v2331_v24, 0.0  ;;  %v2333_v35 = vmul.f32 0.2, %v2331_v24  ;;  %v3787_v45 = vld [vmem:[#allocation13 + $0x88] sm:$0xf0] }
 0x4a0   : > { %v3790_v57 = vor.u32 %v4129_v53, %v3787_v45 }
 0x4a1   : > { %v2334_v41 = vsel %vm2332_vm10, %v2331_v24, %v2333_v35  ;;  %2460 = vmatpush.bf16.msra.mxu0 %v3730_v40  ;;  %2473 = vmatpush.bf16.msra.mxu1 %v3734_v42 }
 0x4a2   : > { %v2335_v39 = vpack.c.bf16 %v2334_v41, %v2334_v41  ;;  %2596 = vmatpush.bf16.msra.mxu3 %v3798_v48 }
 0x4a3   : > { %2580 = vmatpush.bf16.msra.mxu2 %v3818_v51 }
 0x4a4   : > { %v2336_v54 = vunpack.c.l.bf16 %v2335_v39 }
 0x4a5   : > { %2461 = vmatpush.bf16.msra.mxu0 %v3722_v50  ;;  %2474 = vmatpush.bf16.msra.mxu1 %v3726_v55 }
 0x4a6   : > { %2337 = vst [vmem:[#allocation2] sm:$0xf] %v2336_v54  ;;  %2597 = vmatpush.bf16.msra.mxu3 %v3790_v57 }
 0x4a7   : > { %2581 = vmatpush.bf16.msra.mxu2 %v3810_v15 }
 0x4ab   : > { %2582 = vmatpush.bf16.msra.mxu2 %v3802_v29 }
 0x4ad   : > { %v2340_v58 = vld [vmem:[#allocation2 + $0x1] ss:$2 sm:$0x3]  ;;  %v2338_v59 = vld [vmem:[#allocation2] ss:$2 sm:$0x3] }
 0x4ae   : > { %v2341_v60 = vpack.c.bf16 %v2340_v58, %v2340_v58  ;;  %v2339_v61 = vpack.c.bf16 %v2338_v59, %v2338_v59 }
 0x4af   : > { %2583 = vmatpush.bf16.msra.mxu2 %v3794_v37 }
 0x4b0   : > { %v2343_v62 = vunpack.c.l.b16 %v2341_v60  ;;  %3848 = vmatmul.msk.bf16.vlgmr.msra.gmra.mxu3 %vm728_vm0, %v2339_v61 }
 0x4b2   : > { %v2344_v63 = vpack.c.b16 %v2343_v62, %v2343_v62 }
 0x4b3   : > { %2584 = vmatpush.bf16.msra.mxu2 %v3786_v56 }
 0x4b4   : > { %v2346_v51 = vshrl.u32 %v2344_v63, 16  ;;  %v2349_v1 = vshll.u32 %v2344_v63, 16 }
 0x4b6   : > { %3847 = vmatmul.msk.bf16.vlgmr.msra.gmra.mxu2 %vm728_vm0, %v2339_v61  ;;  %v2348_v2 = vrot.slane %v2346_v51, 7 }
 0x4b8   : > { %v2351_v3 = vor.u32 %v2349_v1, %v2348_v2 }
 0x4ba   : > { %v2353_v4 = vsel %vm4914_vm2, 0, %v2351_v3 }
 0x4bb   : > { %2462 = vmatmul.bf16.vlgmr.msra.gmra.mxu0 %v2353_v4  ;;  %2475 = vmatmul.bf16.vlgmr.msra.gmra.mxu1 %v2353_v4 }
 0x533   : > { %v2599_v6 = vpop.f32.mrf.mxu3 }
 0x534   : > { %v2609_v11 = vrot.slane %v2599_v6, 1 }
 0x538   : > { %v2463_v7 = vpop.f32.mrf.mxu0  ;;  %v2476_v8 = vpop.f32.mrf.mxu1 }
 0x539   : > { %v2586_v5 = vpop.f32.mrf.mxu2  ;;  %v2605_v9 = vrot.slane %v2476_v8, 1 }
 0x53a   : > { %v2603_v10 = vadd.f32 %v2586_v5, %v2463_v7 }
 0x53b   : > { %v2601_v17 = vpop.f32.mrf.mxu3 }
 0x53c   : > { %v2607_v13 = vadd.f32 %v2605_v9, %v2603_v10 }
 0x53e   : > { %v2611_v18 = vadd.f32 %v2609_v11, %v2607_v13 }
 0x540   : > { %v2616_v19 = vadd.f32 %v4357_v14, %v2611_v18  ;;  %v2465_v20 = vpop.f32.mrf.mxu0  ;;  %v2478_v21 = vpop.f32.mrf.mxu1 }
 0x541   : > { %v2588_v15 = vpop.f32.mrf.mxu2 }
 0x542   : > { %vm2617_vm0 = vcmp.ge.f32.partialorder %v2616_v19, 0.0  ;;  %v2618_v22 = vmul.f32 0.2, %v2616_v19 }
 0x544   : > { %v2619_v23 = vsel %vm2617_vm0, %v2616_v19, %v2618_v22 }
 0x545   : > { %v5211_v24 = vpack.c.bf16 %v2619_v23, %v2619_v23  }
 0x547   : > { %v5344_v16 = vmov %v5211_v24 }
 0x548 LB: >> { %s4145_s24 = smul.u32 192, %s4697_s5  ;;  %v2666_v55 = vunpack.c.l.b16 %v4693_v16  ;;  %vm2678_vm11 = vsmask.f32 1280  ;;  %s2663_s23 = scalar_lea.vmem %s5310_s16, %s4697_s5  ;;  %s4697_s5 = sphi %s5216_s5, %s2626_s5   ;;  %v4693_v16 = vphi %v5344_v16, %v5345_v16  }
 0x549   : >> { %vm2679_vm12 = vmand %vm1819_vm4, %vm2678_vm11  ;;  %s2626_s5 = sadd.s32 1, %s4697_s5  }
 0x54a   : >> { %s5223_s29 = scalar_lea.vmem [#allocation14], %s4145_s24  ;;  %v2667_v1 = vpack.c.b16 %v2666_v55, %v2666_v55  ;;  %p2623_p10 = scmp.ge.s32.totalorder %s2626_s5, 2  }
 0x54b   : >> { %v3936_v25 = vld [vmem:[%s5223_s29 + $0xa8] sm:$0xf]  ;;  %v4168_v47 = vld [vmem:[%s5223_s29 + $0xb0] sm:$0xf0]  ;;  %v4167_v26 = vld [vmem:[%s5223_s29 + $0xac] sm:$0xf] }
 0x54c   : >> { %v3937_v27 = vor.u32 %v4168_v47, %v3936_v25  ;;  %v3938_v28 = vld [vmem:[%s5223_s29 + $0xb4] sm:$0xf0]  ;;  %v3944_v29 = vld [vmem:[%s5223_s29 + $0xb0] sm:$0xf]  ;;  %v4169_v30 = vld [vmem:[%s5223_s29 + $0xb8] sm:$0xf0] }
 0x54d   : >> { %v3941_v31 = vor.u32 %v4167_v26, %v3938_v28  ;;  %v3945_v32 = vor.u32 %v4169_v30, %v3944_v29  ;;  %v3924_v33 = vld [vmem:[%s5223_s29 + $0x90] sm:$0xf]  ;;  %v4165_v34 = vld [vmem:[%s5223_s29 + $0x98] sm:$0xf0]  ;;  %v4164_v35 = vld [vmem:[%s5223_s29 + $0x94] sm:$0xf] }
 0x54e   : >> { %2809 = vmatpush.bf16.msra.mxu0 %v3937_v27  ;;  %v3925_v36 = vor.u32 %v4165_v34, %v3924_v33  ;;  %v3926_v38 = vld [vmem:[%s5223_s29 + $0x9c] sm:$0xf0]  ;;  %v3932_v40 = vld [vmem:[%s5223_s29 + $0x98] sm:$0xf]  ;;  %v4166_v41 = vld [vmem:[%s5223_s29 + $0xa0] sm:$0xf0] }
 0x54f   : >> { %2822 = vmatpush.bf16.msra.mxu1 %v3941_v31  ;;  %2835 = vmatpush.bf16.msra.mxu2 %v3945_v32  ;;  %v3929_v42 = vor.u32 %v4164_v35, %v3926_v38  ;;  %v3933_v37 = vor.u32 %v4166_v41, %v3932_v40  ;;  %v3912_v44 = vld [vmem:[%s5223_s29 + $0x78] sm:$0xf]  ;;  %v4162_v43 = vld [vmem:[%s5223_s29 + $0x80] sm:$0xf0]  ;;  %v4161_v46 = vld [vmem:[%s5223_s29 + $0x7c] sm:$0xf] }
 0x550   : >> { %v3914_v39 = vld [vmem:[%s5223_s29 + $0x84] sm:$0xf0]  ;;  %v3920_v48 = vld [vmem:[%s5223_s29 + $0x80] sm:$0xf]  ;;  %v4163_v0 = vld [vmem:[%s5223_s29 + $0x88] sm:$0xf0]  ;;  %v3913_v49 = vor.u32 %v4162_v43, %v3912_v44 }
 0x551   : >> { %v3917_v52 = vor.u32 %v4161_v46, %v3914_v39  ;;  %v3921_v53 = vor.u32 %v4163_v0, %v3920_v48  ;;  %v3900_v45 = vld [vmem:[%s5223_s29 + $0x60] sm:$0xf]  ;;  %v4159_v54 = vld [vmem:[%s5223_s29 + $0x68] sm:$0xf0]  ;;  %v4158_v50 = vld [vmem:[%s5223_s29 + $0x64] sm:$0xf] }
 0x552   : >> { %2810 = vmatpush.bf16.msra.mxu0 %v3925_v36  ;;  %v3902_v56 = vld [vmem:[%s5223_s29 + $0x6c] sm:$0xf0]  ;;  %v3908_v57 = vld [vmem:[%s5223_s29 + $0x68] sm:$0xf]  ;;  %v4160_v58 = vld [vmem:[%s5223_s29 + $0x70] sm:$0xf0]  ;;  %v3901_v59 = vor.u32 %v4159_v54, %v3900_v45 }
 0x553   : >> { %2823 = vmatpush.bf16.msra.mxu1 %v3929_v42  ;;  %2836 = vmatpush.bf16.msra.mxu2 %v3933_v37  ;;  %v3905_v60 = vor.u32 %v4158_v50, %v3902_v56  ;;  %v3909_v61 = vor.u32 %v4160_v58, %v3908_v57  ;;  %v3888_v62 = vld [vmem:[%s5223_s29 + $0x48] sm:$0xf]  ;;  %v4156_v63 = vld [vmem:[%s5223_s29 + $0x50] sm:$0xf0]  ;;  %v4155_v51 = vld [vmem:[%s5223_s29 + $0x4c] sm:$0xf] }
 0x554   : >> { %v3890_v2 = vld [vmem:[%s5223_s29 + $0x54] sm:$0xf0]  ;;  %v3896_v3 = vld [vmem:[%s5223_s29 + $0x50] sm:$0xf]  ;;  %v4157_v4 = vld [vmem:[%s5223_s29 + $0x58] sm:$0xf0]  ;;  %v3889_v5 = vor.u32 %v4156_v63, %v3888_v62 }
 0x555   : >> { %v3876_v6 = vld [vmem:[%s5223_s29 + $0x30] sm:$0xf]  ;;  %v3893_v7 = vor.u32 %v4155_v51, %v3890_v2  ;;  %v3897_v8 = vor.u32 %v4157_v4, %v3896_v3  ;;  %v4153_v9 = vld [vmem:[%s5223_s29 + $0x38] sm:$0xf0]  ;;  %v4152_v10 = vld [vmem:[%s5223_s29 + $0x34] sm:$0xf] }
 0x556   : >> { %2811 = vmatpush.bf16.msra.mxu0 %v3913_v49  ;;  %v2669_v11 = vshrl.u32 %v2667_v1, 16  ;;  %v3878_v13 = vld [vmem:[%s5223_s29 + $0x3c] sm:$0xf0]  ;;  %v3884_v14 = vld [vmem:[%s5223_s29 + $0x38] sm:$0xf]  ;;  %v3877_v17 = vor.u32 %v4153_v9, %v3876_v6  ;;  %v2672_v16 = vshll.u32 %v2667_v1, 16 }
 0x557   : >> { %2824 = vmatpush.bf16.msra.mxu1 %v3917_v52  ;;  %2837 = vmatpush.bf16.msra.mxu2 %v3921_v53  ;;  %v4154_v15 = vld [vmem:[%s5223_s29 + $0x40] sm:$0xf0]  ;;  %v3864_v18 = vld [vmem:[%s5223_s29 + $0x18] sm:$0xf]  ;;  %v3881_v19 = vor.u32 %v4152_v10, %v3878_v13  ;;  %v4149_v22 = vld [vmem:[%s5223_s29 + $0x1c] sm:$0xf] }
 0x558   : >> { %v3885_v20 = vor.u32 %v4154_v15, %v3884_v14  ;;  %v4150_v21 = vld [vmem:[%s5223_s29 + $0x20] sm:$0xf0]  ;;  %v2671_v23 = vrot.slane %v2669_v11, 7  ;;  %v3866_v25 = vld [vmem:[%s5223_s29 + $0x24] sm:$0xf0] }
 0x559   : >> { %v3872_v47 = vld [vmem:[%s5223_s29 + $0x20] sm:$0xf]  ;;  %v4151_v26 = vld [vmem:[%s5223_s29 + $0x28] sm:$0xf0]  ;;  %v3865_v27 = vor.u32 %v4150_v21, %v3864_v18  ;;  %v3869_v29 = vor.u32 %v4149_v22, %v3866_v25  ;;  %v4146_v32 = vld [vmem:[%s5223_s29 + $0x4] sm:$0xf] }
 0x55a   : >> { %2812 = vmatpush.bf16.msra.mxu0 %v3901_v59  ;;  %v3852_v28 = vld [vmem:[%s5223_s29] sm:$0xf]  ;;  %v3873_v30 = vor.u32 %v4151_v26, %v3872_v47  ;;  %v4147_v31 = vld [vmem:[%s5223_s29 + $0x8] sm:$0xf0]  ;;  %v3854_v33 = vld [vmem:[%s5223_s29 + $0xc] sm:$0xf0]  ;;  %v2674_v34 = vor.u32 %v2672_v16, %v2671_v23  ;;  %v2865_v59 = vunpack.c.l.bf16 (%p2623_p10), %v5211_v24 }
 0x55b   : >> { %2825 = vmatpush.bf16.msra.mxu1 %v3905_v60  ;;  %2838 = vmatpush.bf16.msra.mxu2 %v3909_v61  ;;  %v3860_v35 = vld [vmem:[%s5223_s29 + $0x8] sm:$0xf]  ;;  %v4148_v36 = vld [vmem:[%s5223_s29 + $0x10] sm:$0xf0]  ;;  %v3853_v38 = vor.u32 %v4147_v31, %v3852_v28  ;;  %v3857_v40 = vor.u32 %v4146_v32, %v3854_v33  ;;  %v4358_v49 = vld [vmem:[%s2663_s23] ss:$0 sm:$0xff] }
 0x55c   : >> { %v3861_v41 = vor.u32 %v4148_v36, %v3860_v35  ;;  %v2676_v42 = vsel %vm4914_vm2, 0, %v2674_v34 }
 0x55d   : >> { %v2680_v37 = vsel %vm2679_vm12, %v2676_v42, 0 }
 0x55e   : >> { %2813 = vmatpush.bf16.msra.mxu0 %v3889_v5 }
 0x55f   : >> { %2826 = vmatpush.bf16.msra.mxu1 %v3893_v7  ;;  %2839 = vmatpush.bf16.msra.mxu2 %v3897_v8 }
 0x562   : >> { %2814 = vmatpush.bf16.msra.mxu0 %v3877_v17 }
 0x563   : >> { %2827 = vmatpush.bf16.msra.mxu1 %v3881_v19  ;;  %2840 = vmatpush.bf16.msra.mxu2 %v3885_v20 }
 0x566   : >> { %2815 = vmatpush.bf16.msra.mxu0 %v3865_v27 }
 0x567   : >> { %2828 = vmatpush.bf16.msra.mxu1 %v3869_v29  ;;  %2841 = vmatpush.bf16.msra.mxu2 %v3873_v30 }
 0x56a   : >> { %2816 = vmatpush.bf16.msra.mxu0 %v3853_v38 }
 0x56b   : >> { %2829 = vmatpush.bf16.msra.mxu1 %v3857_v40  ;;  %2842 = vmatpush.bf16.msra.mxu2 %v3861_v41 }
 0x56d   : >> { %2817 = vmatmul.bf16.vlgmr.msra.gmra.mxu0 %v2680_v37 }
 0x56e   : >> { %2830 = vmatmul.bf16.vlgmr.msra.gmra.mxu1 %v2680_v37  ;;  %2843 = vmatmul.bf16.vlgmr.msra.gmra.mxu2 %v2680_v37 }
 0x5ea   : >> { %v2818_v44 = vpop.f32.mrf.mxu0 }
 0x5eb   : >> { %v2831_v43 = vpop.f32.mrf.mxu1 }
 0x5ec   : >> { %v2849_v46 = vrot.slane %v2831_v43, 1 }
 0x5ee   : >> { %v2851_v39 = vadd.f32 %v2849_v46, %v2818_v44 }
 0x5f1   : >> { %v2844_v48 = vpop.f32.mrf.mxu2 }
 0x5f2   : >> { %v2853_v0 = vrot.slane %v2844_v48, 2  ;;  %v2820_v52 = vpop.f32.mrf.mxu0 }
 0x5f3   : >> { %v2833_v53 = vpop.f32.mrf.mxu1 }
 0x5f4   : >> { %v2855_v45 = vadd.f32 %v2853_v0, %v2851_v39 }
 0x5f6   : >> { %v2859_v54 = vadd.f32 %v4358_v49, %v2855_v45 }
 0x5f8   : >> { %vm2860_vm13 = vcmp.ge.f32.partialorder %v2859_v54, 0.0  ;;  %v2861_v50 = vmul.f32 0.2, %v2859_v54 }
 0x5f9   : >> { %v2846_v55 = vpop.f32.mrf.mxu2  ;;  %2625 = sbr.rel (!%p2623_p10) target bundleno = 1352 (0x548), region = 224 }
 0x5fa   : >> { %v2862_v56 = vsel %vm2860_vm13, %v2859_v54, %v2861_v50 }
 0x5fb   : >> { %v2863_v57 = vpack.c.bf16 %v2862_v56, %v2862_v56  }
 0x5fd   : >> { %v5345_v16 = vmov %v2863_v57  ;;  %v2864_v58 = vunpack.c.l.bf16 (%p2623_p10), %v2863_v57 }
 0x5ff   : > { %v2866_v60 = vadd.f32 %v2865_v59, %v2864_v58 }
 0x601   : > { %vm2867_vm14 = vcmp.ge.f32.partialorder %v2866_v60, 0.0  ;;  %v2868_v61 = vmul.f32 0.2, %v2866_v60 }
 0x603   : > { %v2869_v62 = vsel %vm2867_vm14, %v2866_v60, %v2868_v61 }
 0x604   : > { %v2870_v63 = vpack.c.bf16 %v2869_v62, %v2869_v62 }
 0x606   : > { %2871 = vst [vmem:[%s677_s20] sm:$0x1] %v2870_v63 }
 0x607 PF: > { %s5346_s1 = sld [smem:[#allocation21_spill]] }
 0x60d   : > { %s32_s24 = sadd.s32 1, %s5346_s1  }
 0x60e   : > { %p29_p11 = scmp.ge.s32.totalorder %s32_s24, 4  }
 0x610   :  { %31 = sbr.rel (!%p29_p11) target bundleno = 12 (0xc), region = 235 }
 0x615   :  { %2889 = vsyncpa [#allocation4], 1 }
 0x616   :  { %2891 = vsyncpa [#allocation4 + $0x1], 1 }
 0x617   :  { %2892 = vsyncpa [#allocation6], 1 }
 0x618   :  { %2893 = vsyncpa [#allocation9], 1 }
 0x619   :  { %2894 = vsyncpa [#allocation12], 1 }
 0x61a   :  { %2895 = vsyncpa [#allocation15], 1 }

</bundles_post_ra>
